<compile_context>
chip_gen: v7x
topology: tpu7x:2x2x1
jax: 0.10.0
libtpu: 0.0.40
codegen_flags: <defaults>
</compile_context>

<pallas_src>
import functools
import math

import numpy as np

import jax
import jax.numpy as jnp
from jax.experimental import pallas as pl
from jax.experimental.pallas import tpu as pltpu


# ----------------------------------------------------------------------------
# Pallas kernels
# ----------------------------------------------------------------------------
def _conv_relu6_meansub_kernel(a_ref, w_ref, o_ref, *, inv_n):
    """One (batch, cout-block) grid step of conv + ReLU6 + mean-subtract.

    a_ref: (1, K, N)        bf16  im2col patches, K = kh*kw*Cin, N = Ho*Wo
    w_ref: (Cout_blk, K)    bf16  transposed conv weight (resident)
    o_ref: (1, Cout_blk, N) bf16  output block
    """
    y = jnp.dot(w_ref[...], a_ref[0], preferred_element_type=jnp.float32)
    y = jnp.clip(y, 0.0, 6.0)                               # ReLU6, f32 epilogue
    mu = jnp.sum(y, axis=-1, keepdims=True) * inv_n         # per-channel mean
    o_ref[...] = (y - mu)[None].astype(o_ref.dtype)


def _tail_kernel(a_ref, w6_ref, poolbd_ref, wlin_ref, gsum_ref, o_ref):
    """conv6 + AvgPool2d(4,2,1) + Sigmoid + NCHW flatten + Linear + sg*0.3+0.7.

    a_ref     : (B*S, K6)   bf16  spatial-major im2col patches of x5 (k=3,p=1)
    w6_ref    : (K6, C6)    bf16  conv6 weight in (kh,kw,cin) x cout order
    poolbd_ref: (B*P, B*S)  f32   block-diagonal avg-pool matrix (incl. pad)
    wlin_ref  : (B*P, C6)   f32   linear weight, NCHW-flatten order, batch-tiled
    gsum_ref  : (B, B*P)    f32   per-batch group-sum matrix
    o_ref     : (B, 1)      f32
    """
    # conv6: channel dim on lanes, batch folded into M -> lane-dense everywhere.
    x6 = jnp.dot(a_ref[...], w6_ref[...],
                 preferred_element_type=jnp.float32)          # (B*S, C6)
    pooled = jnp.dot(poolbd_ref[...], x6,
                     preferred_element_type=jnp.float32)      # (B*P, C6)
    prod = jax.nn.sigmoid(pooled) * wlin_ref[...]             # (B*P, C6)
    summed = jnp.dot(gsum_ref[...], prod,
                     preferred_element_type=jnp.float32)      # (B, C6)
    lin = jnp.sum(summed, axis=-1, keepdims=True)             # (B, 1)
    o_ref[...] = jax.nn.sigmoid(lin) * 0.3 + 0.7


# ----------------------------------------------------------------------------
# Plain-JAX glue: im2col (NCHW) — TODO(synk): fold into the kernels via
# strided ref reads / strided DMA to remove the patch-tensor HBM round trips.
# ----------------------------------------------------------------------------
def im2col_nchw(x, kh, kw, stride, pad, *, spatial_major=False):
    """x: (B, C, H, W) -> (B, K, N) or (B, N, K); K ordered (kh, kw, cin)."""
    B, C, H, W = x.shape
    Ho = (H + 2 * pad - kh) // stride + 1
    Wo = (W + 2 * pad - kw) // stride + 1
    xp = jnp.pad(x, ((0, 0), (0, 0), (pad, pad), (pad, pad)))
    cols = []
    for i in range(kh):
        for j in range(kw):
            cols.append(
                xp[:, :, i:i + stride * (Ho - 1) + 1:stride,
                         j:j + stride * (Wo - 1) + 1:stride])
    p = jnp.stack(cols, axis=1)                     # (B, kh*kw, C, Ho, Wo)
    if spatial_major:
        p = jnp.transpose(p, (0, 3, 4, 1, 2))       # (B, Ho, Wo, kh*kw, C)
        return p.reshape(B, Ho * Wo, kh * kw * C), Ho, Wo
    return p.reshape(B, kh * kw * C, Ho * Wo), Ho, Wo


def avgpool_matrix_t(H, W, k, s, pad):
    """PoolT: (Ho*Wo, H*W) with pooledT = PoolT @ x (count_include_pad=True)."""
    Ho = (H + 2 * pad - k) // s + 1
    Wo = (W + 2 * pad - k) // s + 1
    P = np.zeros((Ho * Wo, H * W), np.float32)
    inv = 1.0 / (k * k)
    for ph in range(Ho):
        for pw in range(Wo):
            for di in range(k):
                for dj in range(k):
                    r = ph * s - pad + di
                    c = pw * s - pad + dj
                    if 0 <= r < H and 0 <= c < W:
                        P[ph * Wo + pw, r * W + c] += inv
    return P, Ho, Wo


# ----------------------------------------------------------------------------
# Pallas wrappers
# ----------------------------------------------------------------------------
_VMEM_LIMIT = 64 * 1024 * 1024   # <= physical VMEM on v5e / v6e / v7x


def conv_relu6_meansub(x, wt, *, kh, kw, stride, pad):
    """Fused Conv2d(bias=False) + ReLU6 + per-(b,c) spatial-mean subtraction.

    x : (B, Cin, H, W) bf16;  wt: (Cout, kh*kw*Cin) bf16 (preprocessed weight).
    Returns (B, Cout, Ho, Wo) bf16.
    """
    B, Cin, H, W = x.shape
    Cout, K = wt.shape
    assert K == kh * kw * Cin
    patches, Ho, Wo = im2col_nchw(x, kh, kw, stride, pad)     # bf16 (B, K, N)
    N = Ho * Wo

    # v7x megacore: when the batch axis can't feed both TensorCores, split Cout.
    cs = 2 if (B == 1 and Cout % 32 == 0) else 1
    co_blk = Cout // cs

    kernel = functools.partial(_conv_relu6_meansub_kernel, inv_n=1.0 / N)
    y = pl.pallas_call(
        kernel,
        out_shape=jax.ShapeDtypeStruct((B, Cout, N), jnp.bfloat16),
        grid=(B, cs),
        in_specs=[
            pl.BlockSpec((1, K, N), lambda b, c: (b, 0, 0)),
            pl.BlockSpec((co_blk, K), lambda b, c: (c, 0)),
        ],
        out_specs=pl.BlockSpec((1, co_blk, N), lambda b, c: (b, c, 0)),
        compiler_params=pltpu.CompilerParams(
            dimension_semantics=("parallel", "parallel"),
            vmem_limit_bytes=_VMEM_LIMIT,
        ),
    )(patches, wt)
    return y.reshape(B, Cout, Ho, Wo)


def gnet_tail(x5, pp):
    """conv6(k3,s1,p1) -> AvgPool2d(4,2,1) -> Sigmoid -> flatten(NCHW) ->
    Linear(bias=False) -> sigmoid*0.3+0.7, in one Pallas kernel."""
    B, C5, H, W = x5.shape
    patches, Ho, Wo = im2col_nchw(x5, 3, 3, 1, 1, spatial_major=True)  # (B,S,K6)
    S = Ho * Wo
    K6 = 9 * C5
    aT = patches.reshape(B * S, K6)                                    # bf16

    return pl.pallas_call(
        _tail_kernel,
        out_shape=jax.ShapeDtypeStruct((B, 1), jnp.float32),
        compiler_params=pltpu.CompilerParams(vmem_limit_bytes=_VMEM_LIMIT),
    )(aT, pp["w6T"], pp["poolbdT"], pp["wlinT"], pp["gsum"])


# ----------------------------------------------------------------------------
# Parameters (PyTorch layouts) + one-time preprocessing + forward
# ----------------------------------------------------------------------------
def init_params(key, conv_dim):
    """Weights in PyTorch layouts: conv (Cout, Cin, kh, kw); linear (1, in)."""
    chans = [3, conv_dim, conv_dim * 2, conv_dim * 4, conv_dim * 8,
             conv_dim * 16, conv_dim * 32]
    ksizes = [4, 4, 4, 4, 4, 3]
    convs = []
    for li in range(6):
        key, sub = jax.random.split(key)
        k = ksizes[li]
        cin, cout = chans[li], chans[li + 1]
        fan_in = k * k * cin
        w = jax.random.normal(sub, (cout, cin, k, k), jnp.float32) / math.sqrt(fan_in)
        convs.append(w)
    key, sub = jax.random.split(key)
    lin_in = conv_dim * 16 * 8             # curr_dim * 8, as in the module
    w_lin = jax.random.normal(sub, (1, lin_in), jnp.float32) / math.sqrt(lin_in)
    return {"convs": convs, "linear": w_lin}


def preprocess_params(params, *, batch, image_size):
    """One-time layout transforms (hoisted out of the jitted forward):
    conv weights -> (Cout, K) bf16 in (kh,kw,cin) contraction order, conv6 as
    (K6, C6) bf16, plus the constant pooling / linear / group-sum matrices."""
    conv_wts = []
    for w in params["convs"][:5]:
        Cout, Cin, kh, kw = w.shape
        conv_wts.append(jnp.transpose(w, (0, 2, 3, 1))
                        .reshape(Cout, kh * kw * Cin).astype(jnp.bfloat16))

    w6 = params["convs"][5]
    C6, C5, kh6, kw6 = w6.shape
    K6 = kh6 * kw6 * C5
    w6T = jnp.transpose(w6, (2, 3, 1, 0)).reshape(K6, C6).astype(jnp.bfloat16)

    h5 = image_size // 32                              # spatial of x5 / conv6 out
    poolT, Po, Pw = avgpool_matrix_t(h5, h5, 4, 2, 1)  # (P, S)
    P, S = Po * Pw, h5 * h5

    poolbd = np.zeros((batch * P, batch * S), np.float32)
    gsum = np.zeros((batch, batch * P), np.float32)
    for b in range(batch):
        poolbd[b * P:(b + 1) * P, b * S:(b + 1) * S] = poolT
        gsum[b, b * P:(b + 1) * P] = 1.0

    w_lin = params["linear"]
    assert w_lin.shape[1] == C6 * P, (w_lin.shape, C6, P)
    # torch x6.view(B,-1) flattens NCHW as (c, ph, pw) -> (C6, P) then transpose.
    wlinT = jnp.tile(w_lin.reshape(C6, P).T, (batch, 1)).astype(jnp.float32)

    return {"convs": conv_wts, "w6T": w6T,
            "poolbdT": jnp.asarray(poolbd), "wlinT": wlinT,
            "gsum": jnp.asarray(gsum)}


@jax.jit
def gnet_forward(x_nchw, pp):
    # Cast once; every layer stores bf16 so im2col always runs on bf16 data.
    x = x_nchw.astype(jnp.bfloat16)
    for wt in pp["convs"]:
        x = conv_relu6_meansub(x, wt, kh=4, kw=4, stride=2, pad=1)
    return gnet_tail(x, pp)                             # (B, 1) f32


# ----------------------------------------------------------------------------
if __name__ == "__main__":
    # IMG=128 is the smallest spatial size consistent with Linear(curr_dim*8, 1):
    # five stride-2 convs + one stride-2 avg-pool -> 2x2 spatial, so flat
    # features = (conv_dim*32)*2*2 = conv_dim*128 = curr_dim*8.
    B, CONV_DIM, IMG = 2, 4, 128

    key = jax.random.PRNGKey(0)
    pkey, xkey = jax.random.split(key)
    params = init_params(pkey, CONV_DIM)
    pp = preprocess_params(params, batch=B, image_size=IMG)
    x = jax.random.normal(xkey, (B, 3, IMG, IMG), jnp.float32)

    out = gnet_forward(x, pp)
    out = jax.block_until_ready(out)
    assert out.shape == (B, 1), out.shape
    assert bool(jnp.all(jnp.isfinite(out)))
    # Final op is sigmoid(.)*0.3 + 0.7 -> values must lie in (0.7, 1.0).
    assert bool(jnp.all((out > 0.69) & (out < 1.01)))
    print("KERNEL_OK")
</pallas_src>

<mosaic_0001>
module attributes {stable_mosaic.version = 11 : i64} {
  func.func @_conv_relu6_meansub_kernel(%arg0: i32, %arg1: i32, %arg2: memref<1x48x4096xbf16, #tpu.memory_space<vmem>>, %arg3: memref<4x48xbf16, #tpu.memory_space<vmem>>, %arg4: memref<1x4x4096xbf16, #tpu.memory_space<vmem>>) attributes {dimension_semantics = [#tpu.dimension_semantics<parallel>, #tpu.dimension_semantics<parallel>], iteration_bounds = array<i64: 2, 1>, scalar_prefetch = 0 : i64, scratch_operands = 0 : i64, tpu.core_type = #tpu.core_type<tc>, window_params = [{transform_indices = @transform_0, window_bounds = array<i64: 1, 48, 4096>}, {transform_indices = @transform_1, window_bounds = array<i64: 4, 48>}, {transform_indices = @transform_2, window_bounds = array<i64: 1, 4, 4096>}]} {
    %c0 = arith.constant 0 : index
    %c0_0 = arith.constant 0 : index
    %0 = vector.load %arg3[%c0, %c0_0] : memref<4x48xbf16, #tpu.memory_space<vmem>>, vector<4x48xbf16>
    %c0_1 = arith.constant 0 : index
    %c0_2 = arith.constant 0 : index
    %c0_3 = arith.constant 0 : index
    %1 = vector.load %arg2[%c0_1, %c0_2, %c0_3] : memref<1x48x4096xbf16, #tpu.memory_space<vmem>>, vector<1x48x4096xbf16>
    %2 = vector.shape_cast %1 : vector<1x48x4096xbf16> to vector<48x4096xbf16>
    %cst = arith.constant dense<0.000000e+00> : vector<4x4096xf32>
    %3 = tpu.matmul %0, %2, %cst {dimension_numbers = #tpu.dot_dimension_numbers<[1], [0], [0], [1], [0, 0, 1, 1], [], []>} : vector<4x48xbf16>, vector<48x4096xbf16>, vector<4x4096xf32> -> vector<4x4096xf32>
    %cst_4 = arith.constant 0.000000e+00 : f32
    %cst_5 = arith.constant 6.000000e+00 : f32
    %4 = vector.broadcast %cst_4 : f32 to vector<4x4096xf32>
    %5 = arith.maximumf %4, %3 : vector<4x4096xf32>
    %6 = vector.broadcast %cst_5 : f32 to vector<4x4096xf32>
    %7 = arith.minimumf %6, %5 : vector<4x4096xf32>
    %cst_6 = arith.constant dense<0.000000e+00> : vector<4xf32>
    %8 = vector.multi_reduction <add>, %7, %cst_6 [1] : vector<4x4096xf32> to vector<4xf32>
    %9 = vector.shape_cast %8 : vector<4xf32> to vector<4x1xf32>
    %cst_7 = arith.constant 2.44140625E-4 : f32
    %10 = vector.broadcast %cst_7 : f32 to vector<4x1xf32>
    %11 = arith.mulf %9, %10 : vector<4x1xf32>
    %12 = vector.broadcast %11 : vector<4x1xf32> to vector<4x4096xf32>
    %13 = arith.subf %7, %12 : vector<4x4096xf32>
    %14 = vector.shape_cast %13 : vector<4x4096xf32> to vector<1x4x4096xf32>
    %15 = arith.truncf %14 : vector<1x4x4096xf32> to vector<1x4x4096xbf16>
    %c0_8 = arith.constant 0 : index
    %c0_9 = arith.constant 0 : index
    %c0_10 = arith.constant 0 : index
    %16 = vector.load %arg4[%c0_8, %c0_9, %c0_10] : memref<1x4x4096xbf16, #tpu.memory_space<vmem>>, vector<1x4x4096xbf16>
    tpu.vector_store %arg4[%c0_8, %c0_9, %c0_10], %15 {strides = array<i32>} : memref<1x4x4096xbf16, #tpu.memory_space<vmem>>, vector<1x4x4096xbf16>,
    return
  }
  func.func @transform_0(%arg0: i32, %arg1: i32) -> (i32, i32, i32) {
    %c0_i32 = arith.constant 0 : i32
    %c0_i32_0 = arith.constant 0 : i32
    %c0_i32_1 = arith.constant 0 : i32
    return %arg0, %c0_i32, %c0_i32_0 : i32, i32, i32
  }
  func.func @transform_1(%arg0: i32, %arg1: i32) -> (i32, i32) {
    %c0_i32 = arith.constant 0 : i32
    %c0_i32_0 = arith.constant 0 : i32
    return %arg1, %c0_i32 : i32, i32
  }
  func.func @transform_2(%arg0: i32, %arg1: i32) -> (i32, i32, i32) {
    %c0_i32 = arith.constant 0 : i32
    %c0_i32_0 = arith.constant 0 : i32
    return %arg0, %arg1, %c0_i32 : i32, i32, i32
  }
}

module attributes {stable_mosaic.version = 11 : i64} {
  func.func @_conv_relu6_meansub_kernel(%arg0: i32, %arg1: i32, %arg2: memref<1x64x1024xbf16, #tpu.memory_space<vmem>>, %arg3: memref<8x64xbf16, #tpu.memory_space<vmem>>, %arg4: memref<1x8x1024xbf16, #tpu.memory_space<vmem>>) attributes {dimension_semantics = [#tpu.dimension_semantics<parallel>, #tpu.dimension_semantics<parallel>], iteration_bounds = array<i64: 2, 1>, scalar_prefetch = 0 : i64, scratch_operands = 0 : i64, tpu.core_type = #tpu.core_type<tc>, window_params = [{transform_indices = @transform_0, window_bounds = array<i64: 1, 64, 1024>}, {transform_indices = @transform_1, window_bounds = array<i64: 8, 64>}, {transform_indices = @transform_2, window_bounds = array<i64: 1, 8, 1024>}]} {
    %c0 = arith.constant 0 : index
    %c0_0 = arith.constant 0 : index
    %0 = vector.load %arg3[%c0, %c0_0] : memref<8x64xbf16, #tpu.memory_space<vmem>>, vector<8x64xbf16>
    %c0_1 = arith.constant 0 : index
    %c0_2 = arith.constant 0 : index
    %c0_3 = arith.constant 0 : index
    %1 = vector.load %arg2[%c0_1, %c0_2, %c0_3] : memref<1x64x1024xbf16, #tpu.memory_space<vmem>>, vector<1x64x1024xbf16>
    %2 = vector.shape_cast %1 : vector<1x64x1024xbf16> to vector<64x1024xbf16>
    %cst = arith.constant dense<0.000000e+00> : vector<8x1024xf32>
    %3 = tpu.matmul %0, %2, %cst {dimension_numbers = #tpu.dot_dimension_numbers<[1], [0], [0], [1], [0, 0, 1, 1], [], []>} : vector<8x64xbf16>, vector<64x1024xbf16>, vector<8x1024xf32> -> vector<8x1024xf32>
    %cst_4 = arith.constant 0.000000e+00 : f32
    %cst_5 = arith.constant 6.000000e+00 : f32
    %4 = vector.broadcast %cst_4 : f32 to vector<8x1024xf32>
    %5 = arith.maximumf %4, %3 : vector<8x1024xf32>
    %6 = vector.broadcast %cst_5 : f32 to vector<8x1024xf32>
    %7 = arith.minimumf %6, %5 : vector<8x1024xf32>
    %cst_6 = arith.constant dense<0.000000e+00> : vector<8xf32>
    %8 = vector.multi_reduction <add>, %7, %cst_6 [1] : vector<8x1024xf32> to vector<8xf32>
    %9 = vector.shape_cast %8 : vector<8xf32> to vector<8x1xf32>
    %cst_7 = arith.constant 9.765625E-4 : f32
    %10 = vector.broadcast %cst_7 : f32 to vector<8x1xf32>
    %11 = arith.mulf %9, %10 : vector<8x1xf32>
    %12 = vector.broadcast %11 : vector<8x1xf32> to vector<8x1024xf32>
    %13 = arith.subf %7, %12 : vector<8x1024xf32>
    %14 = vector.shape_cast %13 : vector<8x1024xf32> to vector<1x8x1024xf32>
    %15 = arith.truncf %14 : vector<1x8x1024xf32> to vector<1x8x1024xbf16>
    %c0_8 = arith.constant 0 : index
    %c0_9 = arith.constant 0 : index
    %c0_10 = arith.constant 0 : index
    %16 = vector.load %arg4[%c0_8, %c0_9, %c0_10] : memref<1x8x1024xbf16, #tpu.memory_space<vmem>>, vector<1x8x1024xbf16>
    tpu.vector_store %arg4[%c0_8, %c0_9, %c0_10], %15 {strides = array<i32>} : memref<1x8x1024xbf16, #tpu.memory_space<vmem>>, vector<1x8x1024xbf16>,
    return
  }
  func.func @transform_0(%arg0: i32, %arg1: i32) -> (i32, i32, i32) {
    %c0_i32 = arith.constant 0 : i32
    %c0_i32_0 = arith.constant 0 : i32
    %c0_i32_1 = arith.constant 0 : i32
    return %arg0, %c0_i32, %c0_i32_0 : i32, i32, i32
  }
  func.func @transform_1(%arg0: i32, %arg1: i32) -> (i32, i32) {
    %c0_i32 = arith.constant 0 : i32
    %c0_i32_0 = arith.constant 0 : i32
    return %arg1, %c0_i32 : i32, i32
  }
  func.func @transform_2(%arg0: i32, %arg1: i32) -> (i32, i32, i32) {
    %c0_i32 = arith.constant 0 : i32
    %c0_i32_0 = arith.constant 0 : i32
    return %arg0, %arg1, %c0_i32 : i32, i32, i32
  }
}

module attributes {stable_mosaic.version = 11 : i64} {
  func.func @_conv_relu6_meansub_kernel(%arg0: i32, %arg1: i32, %arg2: memref<1x128x256xbf16, #tpu.memory_space<vmem>>, %arg3: memref<16x128xbf16, #tpu.memory_space<vmem>>, %arg4: memref<1x16x256xbf16, #tpu.memory_space<vmem>>) attributes {dimension_semantics = [#tpu.dimension_semantics<parallel>, #tpu.dimension_semantics<parallel>], iteration_bounds = array<i64: 2, 1>, scalar_prefetch = 0 : i64, scratch_operands = 0 : i64, tpu.core_type = #tpu.core_type<tc>, window_params = [{transform_indices = @transform_0, window_bounds = array<i64: 1, 128, 256>}, {transform_indices = @transform_1, window_bounds = array<i64: 16, 128>}, {transform_indices = @transform_2, window_bounds = array<i64: 1, 16, 256>}]} {
    %c0 = arith.constant 0 : index
    %c0_0 = arith.constant 0 : index
    %0 = vector.load %arg3[%c0, %c0_0] : memref<16x128xbf16, #tpu.memory_space<vmem>>, vector<16x128xbf16>
    %c0_1 = arith.constant 0 : index
    %c0_2 = arith.constant 0 : index
    %c0_3 = arith.constant 0 : index
    %1 = vector.load %arg2[%c0_1, %c0_2, %c0_3] : memref<1x128x256xbf16, #tpu.memory_space<vmem>>, vector<1x128x256xbf16>
    %2 = vector.shape_cast %1 : vector<1x128x256xbf16> to vector<128x256xbf16>
    %cst = arith.constant dense<0.000000e+00> : vector<16x256xf32>
    %3 = tpu.matmul %0, %2, %cst {dimension_numbers = #tpu.dot_dimension_numbers<[1], [0], [0], [1], [0, 0, 1, 1], [], []>} : vector<16x128xbf16>, vector<128x256xbf16>, vector<16x256xf32> -> vector<16x256xf32>
    %cst_4 = arith.constant 0.000000e+00 : f32
    %cst_5 = arith.constant 6.000000e+00 : f32
    %4 = vector.broadcast %cst_4 : f32 to vector<16x256xf32>
    %5 = arith.maximumf %4, %3 : vector<16x256xf32>
    %6 = vector.broadcast %cst_5 : f32 to vector<16x256xf32>
    %7 = arith.minimumf %6, %5 : vector<16x256xf32>
    %cst_6 = arith.constant dense<0.000000e+00> : vector<16xf32>
    %8 = vector.multi_reduction <add>, %7, %cst_6 [1] : vector<16x256xf32> to vector<16xf32>
    %9 = vector.shape_cast %8 : vector<16xf32> to vector<16x1xf32>
    %cst_7 = arith.constant 3.906250e-03 : f32
    %10 = vector.broadcast %cst_7 : f32 to vector<16x1xf32>
    %11 = arith.mulf %9, %10 : vector<16x1xf32>
    %12 = vector.broadcast %11 : vector<16x1xf32> to vector<16x256xf32>
    %13 = arith.subf %7, %12 : vector<16x256xf32>
    %14 = vector.shape_cast %13 : vector<16x256xf32> to vector<1x16x256xf32>
    %15 = arith.truncf %14 : vector<1x16x256xf32> to vector<1x16x256xbf16>
    %c0_8 = arith.constant 0 : index
    %c0_9 = arith.constant 0 : index
    %c0_10 = arith.constant 0 : index
    %16 = vector.load %arg4[%c0_8, %c0_9, %c0_10] : memref<1x16x256xbf16, #tpu.memory_space<vmem>>, vector<1x16x256xbf16>
    tpu.vector_store %arg4[%c0_8, %c0_9, %c0_10], %15 {strides = array<i32>} : memref<1x16x256xbf16, #tpu.memory_space<vmem>>, vector<1x16x256xbf16>,
    return
  }
  func.func @transform_0(%arg0: i32, %arg1: i32) -> (i32, i32, i32) {
    %c0_i32 = arith.constant 0 : i32
    %c0_i32_0 = arith.constant 0 : i32
    %c0_i32_1 = arith.constant 0 : i32
    return %arg0, %c0_i32, %c0_i32_0 : i32, i32, i32
  }
  func.func @transform_1(%arg0: i32, %arg1: i32) -> (i32, i32) {
    %c0_i32 = arith.constant 0 : i32
    %c0_i32_0 = arith.constant 0 : i32
    return %arg1, %c0_i32 : i32, i32
  }
  func.func @transform_2(%arg0: i32, %arg1: i32) -> (i32, i32, i32) {
    %c0_i32 = arith.constant 0 : i32
    %c0_i32_0 = arith.constant 0 : i32
    return %arg0, %arg1, %c0_i32 : i32, i32, i32
  }
}

module attributes {stable_mosaic.version = 11 : i64} {
  func.func @_conv_relu6_meansub_kernel(%arg0: i32, %arg1: i32, %arg2: memref<1x256x64xbf16, #tpu.memory_space<vmem>>, %arg3: memref<32x256xbf16, #tpu.memory_space<vmem>>, %arg4: memref<1x32x64xbf16, #tpu.memory_space<vmem>>) attributes {dimension_semantics = [#tpu.dimension_semantics<parallel>, #tpu.dimension_semantics<parallel>], iteration_bounds = array<i64: 2, 1>, scalar_prefetch = 0 : i64, scratch_operands = 0 : i64, tpu.core_type = #tpu.core_type<tc>, window_params = [{transform_indices = @transform_0, window_bounds = array<i64: 1, 256, 64>}, {transform_indices = @transform_1, window_bounds = array<i64: 32, 256>}, {transform_indices = @transform_2, window_bounds = array<i64: 1, 32, 64>}]} {
    %c0 = arith.constant 0 : index
    %c0_0 = arith.constant 0 : index
    %0 = vector.load %arg3[%c0, %c0_0] : memref<32x256xbf16, #tpu.memory_space<vmem>>, vector<32x256xbf16>
    %c0_1 = arith.constant 0 : index
    %c0_2 = arith.constant 0 : index
    %c0_3 = arith.constant 0 : index
    %1 = vector.load %arg2[%c0_1, %c0_2, %c0_3] : memref<1x256x64xbf16, #tpu.memory_space<vmem>>, vector<1x256x64xbf16>
    %2 = vector.shape_cast %1 : vector<1x256x64xbf16> to vector<256x64xbf16>
    %cst = arith.constant dense<0.000000e+00> : vector<32x64xf32>
    %3 = tpu.matmul %0, %2, %cst {dimension_numbers = #tpu.dot_dimension_numbers<[1], [0], [0], [1], [0, 0, 1, 1], [], []>} : vector<32x256xbf16>, vector<256x64xbf16>, vector<32x64xf32> -> vector<32x64xf32>
    %cst_4 = arith.constant 0.000000e+00 : f32
    %cst_5 = arith.constant 6.000000e+00 : f32
    %4 = vector.broadcast %cst_4 : f32 to vector<32x64xf32>
    %5 = arith.maximumf %4, %3 : vector<32x64xf32>
    %6 = vector.broadcast %cst_5 : f32 to vector<32x64xf32>
    %7 = arith.minimumf %6, %5 : vector<32x64xf32>
    %cst_6 = arith.constant dense<0.000000e+00> : vector<32xf32>
    %8 = vector.multi_reduction <add>, %7, %cst_6 [1] : vector<32x64xf32> to vector<32xf32>
    %9 = vector.shape_cast %8 : vector<32xf32> to vector<32x1xf32>
    %cst_7 = arith.constant 1.562500e-02 : f32
    %10 = vector.broadcast %cst_7 : f32 to vector<32x1xf32>
    %11 = arith.mulf %9, %10 : vector<32x1xf32>
    %12 = vector.broadcast %11 : vector<32x1xf32> to vector<32x64xf32>
    %13 = arith.subf %7, %12 : vector<32x64xf32>
    %14 = vector.shape_cast %13 : vector<32x64xf32> to vector<1x32x64xf32>
    %15 = arith.truncf %14 : vector<1x32x64xf32> to vector<1x32x64xbf16>
    %c0_8 = arith.constant 0 : index
    %c0_9 = arith.constant 0 : index
    %c0_10 = arith.constant 0 : index
    %16 = vector.load %arg4[%c0_8, %c0_9, %c0_10] : memref<1x32x64xbf16, #tpu.memory_space<vmem>>, vector<1x32x64xbf16>
    tpu.vector_store %arg4[%c0_8, %c0_9, %c0_10], %15 {strides = array<i32>} : memref<1x32x64xbf16, #tpu.memory_space<vmem>>, vector<1x32x64xbf16>,
    return
  }
  func.func @transform_0(%arg0: i32, %arg1: i32) -> (i32, i32, i32) {
    %c0_i32 = arith.constant 0 : i32
    %c0_i32_0 = arith.constant 0 : i32
    %c0_i32_1 = arith.constant 0 : i32
    return %arg0, %c0_i32, %c0_i32_0 : i32, i32, i32
  }
  func.func @transform_1(%arg0: i32, %arg1: i32) -> (i32, i32) {
    %c0_i32 = arith.constant 0 : i32
    %c0_i32_0 = arith.constant 0 : i32
    return %arg1, %c0_i32 : i32, i32
  }
  func.func @transform_2(%arg0: i32, %arg1: i32) -> (i32, i32, i32) {
    %c0_i32 = arith.constant 0 : i32
    %c0_i32_0 = arith.constant 0 : i32
    return %arg0, %arg1, %c0_i32 : i32, i32, i32
  }
}

module attributes {stable_mosaic.version = 11 : i64} {
  func.func @_conv_relu6_meansub_kernel(%arg0: i32, %arg1: i32, %arg2: memref<1x512x16xbf16, #tpu.memory_space<vmem>>, %arg3: memref<64x512xbf16, #tpu.memory_space<vmem>>, %arg4: memref<1x64x16xbf16, #tpu.memory_space<vmem>>) attributes {dimension_semantics = [#tpu.dimension_semantics<parallel>, #tpu.dimension_semantics<parallel>], iteration_bounds = array<i64: 2, 1>, scalar_prefetch = 0 : i64, scratch_operands = 0 : i64, tpu.core_type = #tpu.core_type<tc>, window_params = [{transform_indices = @transform_0, window_bounds = array<i64: 1, 512, 16>}, {transform_indices = @transform_1, window_bounds = array<i64: 64, 512>}, {transform_indices = @transform_2, window_bounds = array<i64: 1, 64, 16>}]} {
    %c0 = arith.constant 0 : index
    %c0_0 = arith.constant 0 : index
    %0 = vector.load %arg3[%c0, %c0_0] : memref<64x512xbf16, #tpu.memory_space<vmem>>, vector<64x512xbf16>
    %c0_1 = arith.constant 0 : index
    %c0_2 = arith.constant 0 : index
    %c0_3 = arith.constant 0 : index
    %1 = vector.load %arg2[%c0_1, %c0_2, %c0_3] : memref<1x512x16xbf16, #tpu.memory_space<vmem>>, vector<1x512x16xbf16>
    %2 = vector.shape_cast %1 : vector<1x512x16xbf16> to vector<512x16xbf16>
    %cst = arith.constant dense<0.000000e+00> : vector<64x16xf32>
    %3 = tpu.matmul %0, %2, %cst {dimension_numbers = #tpu.dot_dimension_numbers<[1], [0], [0], [1], [0, 0, 1, 1], [], []>} : vector<64x512xbf16>, vector<512x16xbf16>, vector<64x16xf32> -> vector<64x16xf32>
    %cst_4 = arith.constant 0.000000e+00 : f32
    %cst_5 = arith.constant 6.000000e+00 : f32
    %4 = vector.broadcast %cst_4 : f32 to vector<64x16xf32>
    %5 = arith.maximumf %4, %3 : vector<64x16xf32>
    %6 = vector.broadcast %cst_5 : f32 to vector<64x16xf32>
    %7 = arith.minimumf %6, %5 : vector<64x16xf32>
    %cst_6 = arith.constant dense<0.000000e+00> : vector<64xf32>
    %8 = vector.multi_reduction <add>, %7, %cst_6 [1] : vector<64x16xf32> to vector<64xf32>
    %9 = vector.shape_cast %8 : vector<64xf32> to vector<64x1xf32>
    %cst_7 = arith.constant 6.250000e-02 : f32
    %10 = vector.broadcast %cst_7 : f32 to vector<64x1xf32>
    %11 = arith.mulf %9, %10 : vector<64x1xf32>
    %12 = vector.broadcast %11 : vector<64x1xf32> to vector<64x16xf32>
    %13 = arith.subf %7, %12 : vector<64x16xf32>
    %14 = vector.shape_cast %13 : vector<64x16xf32> to vector<1x64x16xf32>
    %15 = arith.truncf %14 : vector<1x64x16xf32> to vector<1x64x16xbf16>
    %c0_8 = arith.constant 0 : index
    %c0_9 = arith.constant 0 : index
    %c0_10 = arith.constant 0 : index
    %16 = vector.load %arg4[%c0_8, %c0_9, %c0_10] : memref<1x64x16xbf16, #tpu.memory_space<vmem>>, vector<1x64x16xbf16>
    tpu.vector_store %arg4[%c0_8, %c0_9, %c0_10], %15 {strides = array<i32>} : memref<1x64x16xbf16, #tpu.memory_space<vmem>>, vector<1x64x16xbf16>,
    return
  }
  func.func @transform_0(%arg0: i32, %arg1: i32) -> (i32, i32, i32) {
    %c0_i32 = arith.constant 0 : i32
    %c0_i32_0 = arith.constant 0 : i32
    %c0_i32_1 = arith.constant 0 : i32
    return %arg0, %c0_i32, %c0_i32_0 : i32, i32, i32
  }
  func.func @transform_1(%arg0: i32, %arg1: i32) -> (i32, i32) {
    %c0_i32 = arith.constant 0 : i32
    %c0_i32_0 = arith.constant 0 : i32
    return %arg1, %c0_i32 : i32, i32
  }
  func.func @transform_2(%arg0: i32, %arg1: i32) -> (i32, i32, i32) {
    %c0_i32 = arith.constant 0 : i32
    %c0_i32_0 = arith.constant 0 : i32
    return %arg0, %arg1, %c0_i32 : i32, i32, i32
  }
}

module attributes {stable_mosaic.version = 11 : i64} {
  func.func @_tail_kernel(%arg0: memref<32x576xbf16, #tpu.memory_space<vmem>>, %arg1: memref<576x128xbf16, #tpu.memory_space<vmem>>, %arg2: memref<8x32xf32, #tpu.memory_space<vmem>>, %arg3: memref<8x128xf32, #tpu.memory_space<vmem>>, %arg4: memref<2x8xf32, #tpu.memory_space<vmem>>, %arg5: memref<2x1xf32, #tpu.memory_space<vmem>>) attributes {dimension_semantics = [], scalar_prefetch = 0 : i64, scratch_operands = 0 : i64, tpu.core_type = #tpu.core_type<tc>} {
    %c0 = arith.constant 0 : index
    %c0_0 = arith.constant 0 : index
    %0 = vector.load %arg0[%c0, %c0_0] : memref<32x576xbf16, #tpu.memory_space<vmem>>, vector<32x576xbf16>
    %c0_1 = arith.constant 0 : index
    %c0_2 = arith.constant 0 : index
    %1 = vector.load %arg1[%c0_1, %c0_2] : memref<576x128xbf16, #tpu.memory_space<vmem>>, vector<576x128xbf16>
    %cst = arith.constant dense<0.000000e+00> : vector<32x128xf32>
    %2 = tpu.matmul %0, %1, %cst {dimension_numbers = #tpu.dot_dimension_numbers<[1], [0], [0], [1], [0, 0, 1, 1], [], []>} : vector<32x576xbf16>, vector<576x128xbf16>, vector<32x128xf32> -> vector<32x128xf32>
    %c0_3 = arith.constant 0 : index
    %c0_4 = arith.constant 0 : index
    %3 = vector.load %arg2[%c0_3, %c0_4] : memref<8x32xf32, #tpu.memory_space<vmem>>, vector<8x32xf32>
    %cst_5 = arith.constant dense<0.000000e+00> : vector<8x128xf32>
    %4 = tpu.matmul %3, %2, %cst_5 {dimension_numbers = #tpu.dot_dimension_numbers<[1], [0], [0], [1], [0, 0, 1, 1], [], []>} : vector<8x32xf32>, vector<32x128xf32>, vector<8x128xf32> -> vector<8x128xf32>
    %5 = arith.negf %4 : vector<8x128xf32>
    %6 = math.exp %5 : vector<8x128xf32>
    %cst_6 = arith.constant 1.000000e+00 : f32
    %7 = vector.broadcast %cst_6 : f32 to vector<8x128xf32>
    %8 = arith.addf %7, %6 : vector<8x128xf32>
    %9 = arith.divf %7, %8 : vector<8x128xf32>
    %c0_7 = arith.constant 0 : index
    %c0_8 = arith.constant 0 : index
    %10 = vector.load %arg3[%c0_7, %c0_8] : memref<8x128xf32, #tpu.memory_space<vmem>>, vector<8x128xf32>
    %11 = arith.mulf %9, %10 : vector<8x128xf32>
    %c0_9 = arith.constant 0 : index
    %c0_10 = arith.constant 0 : index
    %12 = vector.load %arg4[%c0_9, %c0_10] : memref<2x8xf32, #tpu.memory_space<vmem>>, vector<2x8xf32>
    %cst_11 = arith.constant dense<0.000000e+00> : vector<2x128xf32>
    %13 = tpu.matmul %12, %11, %cst_11 {dimension_numbers = #tpu.dot_dimension_numbers<[1], [0], [0], [1], [0, 0, 1, 1], [], []>} : vector<2x8xf32>, vector<8x128xf32>, vector<2x128xf32> -> vector<2x128xf32>
    %cst_12 = arith.constant dense<0.000000e+00> : vector<2xf32>
    %14 = vector.multi_reduction <add>, %13, %cst_12 [1] : vector<2x128xf32> to vector<2xf32>
    %15 = vector.shape_cast %14 : vector<2xf32> to vector<2x1xf32>
    %16 = arith.negf %15 : vector<2x1xf32>
    %17 = math.exp %16 : vector<2x1xf32>
    %cst_13 = arith.constant 1.000000e+00 : f32
    %18 = vector.broadcast %cst_13 : f32 to vector<2x1xf32>
    %19 = arith.addf %18, %17 : vector<2x1xf32>
    %20 = arith.divf %18, %19 : vector<2x1xf32>
    %cst_14 = arith.constant 3.000000e-01 : f32
    %21 = vector.broadcast %cst_14 : f32 to vector<2x1xf32>
    %22 = arith.mulf %20, %21 : vector<2x1xf32>
    %cst_15 = arith.constant 0.699999988 : f32
    %23 = vector.broadcast %cst_15 : f32 to vector<2x1xf32>
    %24 = arith.addf %22, %23 : vector<2x1xf32>
    %c0_16 = arith.constant 0 : index
    %c0_17 = arith.constant 0 : index
    %25 = vector.load %arg5[%c0_16, %c0_17] : memref<2x1xf32, #tpu.memory_space<vmem>>, vector<2x1xf32>
    tpu.vector_store %arg5[%c0_16, %c0_17], %24 {strides = array<i32>} : memref<2x1xf32, #tpu.memory_space<vmem>>, vector<2x1xf32>,
    return
  }
}

</mosaic_0001>

<bundles_post_ra>
// kernel: gnet_forward.6
= control target key start
LH: loop header
LB: loop body
LE: loop exit
PB: predicated region body
PF: predicated region fallthrough
CT: control target
= control target key end

     0   :  { %7 = vsyncpa [#allocation3], 0  ;;  %s2894_s0 = inlined_call_operand.hbm [shape: bf16[2,48,4096], index: 0, kind: input, shape index: {}]   ;;  %s2895_s1 = inlined_call_operand.hbm [shape: bf16[4,48], index: 1, kind: input, shape index: {}]   ;;  %s2896_s2 = inlined_call_operand.hbm [shape: bf16[2,4,4096], index: 2, kind: output, shape index: {}]  }
   0x1   :  { %9 = vsyncpa [#allocation3 + $0x1], 0 }
   0x2   :  { %10 = vsyncpa [#allocation6], 0 }
   0x3   :  { %11 = vsyncpa [#allocation4], 0 }
   0x4   :  { %13 = vsyncpa [#allocation4 + $0x1], 0  ;;  %s2314_s9 = smov 0   ;;  %s2316_s10 = smov 0  }
   0x5   :  { %s2318_s11 = smov 0   ;;  %s2320_s12 = smov 0  }
   0x6   :  { %s2322_s13 = smov 0   ;;  %s2324_s14 = smov 0  }
   0x7 LB: > { %s1923_s15 = sadd.s32 4294967295, %s2290_s14   ;;  %s1924_s16 = sadd.s32 4294967294, %s2290_s14   ;;  %s2290_s14 = sphi %s2324_s14, %s19_s14   ;;  %s2286_s13 = sphi %s2322_s13, %s2924_s13   ;;  %s2282_s12 = sphi %s2320_s12, %s2923_s12   ;;  %s2278_s11 = sphi %s2318_s11, %s2922_s11   ;;  %s2274_s10 = sphi %s2316_s10, %s2921_s10   ;;  %s2270_s9 = sphi %s2314_s9, %s2920_s9  }
   0x8   : > { %s38_s17 = sadd.s32 1, %s2278_s11  ;;  %p45_p0 = scmp.ne.s32.totalorder %s2278_s11, %s2274_s10 }
   0x9   : > { %p46_p1 = scmp.eq.s32.totalorder %s2290_s14, 0  ;;  %p51_p2 = scmp.ne.s32.totalorder %s2274_s10, %s2270_s9 }
   0xa   : > { %p2352_p3 = scmp.eq.s32.totalorder %s1923_s15, 0  ;;  %p103_p4 = scmp.eq.s32.totalorder %s1923_s15, 1 }
   0xb   : > { %p2356_p5 = por %p46_p1, %p45_p0  ;;  %p109_p6 = scmp.eq.s32.totalorder %s1924_s16, 1 }
   0xc   : > { %s2903_s18 = scalar_select %p2352_p3, 1, 0 }
   0xd   : > { %p2362_p7 = por %p2352_p3, %p51_p2  ;;  %p2366_p8 = por %p103_p4, %p45_p0 }
   0xe   : > { %p2370_p9 = por %p109_p6, %p51_p2  ;;  %p1925_p10 = scmp.ge.s32.totalorder %s2290_s14, 1 }
   0xf   : > { %s2905_s20 = scalar_select %p2362_p7, 1, 0 }
  0x10   : > { %s2906_s21 = scalar_select %p2366_p8, 1, 0 }
  0x11   : > { %s2907_s22 = scalar_select %p2370_p9, 1, 0 }
  0x12   : > { %p116_p11 = scmp.lt.s32.totalorder %s2290_s14, 3  ;;  %s2292_s24 = smov [#allocation5]  }
  0x13   : > { %s131_s25 = sshll.u32 %s2292_s24, 4  ;;  %p2090_p1 = scmp.lt.s32.totalorder %s2290_s14, 2  ;;  %s132_s25 = int_to_ptr.vmem [resolvable:$true] %s131_s25 }
  0x14   : > { %p2377_p13 = pnand %p1925_p10, %p116_p11  ;;  %s31_s28 = sadd.s32 1, %s2286_s13 }
  0x15   : > { %p2386_p4 = pnand %p2090_p1, %p2356_p5  ;;  %p2397_p6 = scmp.ge.s32.totalorder %s31_s28, 2 }
  0x16   : > { %s2908_s23 = scalar_select %p2377_p13, 1, 0 }
  0x17   : > { %p2077_p0 = pneg %p2377_p13  ;;  %s142_s30 = sand.u32 1, %s2278_s11  }
  0x18   : > { %s2909_s26 = scalar_select %p2386_p4, 1, 0 }
  0x19   : > { %p2392_p2 = pnand %p2077_p0, %p2352_p3  ;;  %s2146_s5 = scalar_lea.hbm %s2895_s1, 32 }
  0x1a   : > { %s2911_s29 = scalar_select %p2397_p6, 1, 0 }
  0x1b   : > { %p2147_p5 = scmp.ne.s32.totalorder %s2895_s1, %s2146_s5  ;;  %p2148_p10 = pneg %p2392_p2 }
  0x1c   : > { %p2153_p0 = scmp.lt.u32.totalorder %s2146_s5, %s2895_s1 }
  0x1d   : > { %p2149_p11 = pnand %p2148_p10, %p2147_p5 }
  0x1f   : > { %p2150_p1 = pneg %p2149_p11 }
  0x21   : > { %p2155_p12 = pnand %p2153_p0, %p2150_p1 }
  0x23   : > { %2158 = shalt.err (!%p2155_p12)
}
  0x24   : > { %s2159_s16 = scalar_lea.vmem %s132_s25, 32  ;;  %p2167_p7 = scmp.lt.s32.totalorder %s132_s25, %s132_s25 }
  0x25   : > { %p2160_p9 = scmp.ne.s32.totalorder %s132_s25, %s2159_s16  ;;  %p2168_p13 = scmp.lt.s32.totalorder %s2159_s16, %s2159_s16 }
  0x27   : > { %p2162_p8 = pnand %p2160_p9, %p2148_p10  ;;  %p2169_p4 = por %p2168_p13, %p2167_p7 }
  0x29   : > { %p2163_p3 = pneg %p2162_p8 }
  0x2b   : > { %p2170_p6 = pnand %p2169_p4, %p2163_p3 }
  0x2d   : > { %2173 = shalt.err (!%p2170_p6)
}
  0x2e   : > { %2080 = dma.hbm_to_vmem [thread:$0]  (!%p2392_p2), %s2895_s1, 32, %s132_s25, [#allocation6]  }
  0x2f   : > { %p2912_p9 = scmp.ne.s32.totalorder %s2911_s29, 0  ;;  %s2066_s3 = smul.u32 768, %s142_s30 }
  0x30   : > { %s2067_s5 = smul.u32 12288, %s2286_s13  ;;  %s2437_s29 = scalar_lea.sflag [#allocation3], %s142_s30 }
  0x31   : > { %s2926_s28 = smov (%p2912_p9, %s31_s28), 0  ;;  %s146_s8 = scalar_lea.vmem [#allocation2], %s2066_s3 }
  0x32   : > { %s35_s4 = ssub.s32 %s2286_s13, %s2926_s28  ;;  %s2428_s7 = scalar_lea.hbm %s2894_s0, %s2067_s5 }
  0x33   : > { %p36_p3 = scmp.eq.s32.totalorder %s35_s4, 0  ;;  %s153_s15 = sshll.u32 %s146_s8, 4  ;;  %s2435_s15 = int_to_ptr.vmem [resolvable:$true] %s153_s15 }
  0x34   : > { %s2174_s16 = scalar_lea.hbm %s2428_s7, 12288  ;;  %p2913_p8 = scmp.ne.s32.totalorder %s2909_s26, 0 }
  0x35   : > { %s2433_s25 = scalar_select %p36_p3, %s2278_s11, %s38_s17  }
  0x36   : > { %p2175_p7 = scmp.ne.s32.totalorder %s2428_s7, %s2174_s16  ;;  %p2176_p12 = pneg %p2913_p8 }
  0x37   : > { %s2179_s3 = scalar_lea.hbm %s2894_s0, 24576  ;;  %p2180_p2 = scmp.lt.u32.totalorder %s2428_s7, %s2894_s0 }
  0x38   : > { %p2177_p13 = pnand %p2176_p12, %p2175_p7  ;;  %p2181_p6 = scmp.lt.u32.totalorder %s2179_s3, %s2174_s16 }
  0x39   : > { %p2183_p10 = scmp.lt.u32.totalorder %s2174_s16, %s2428_s7 }
  0x3a   : > { %p2178_p4 = pneg %p2177_p13  ;;  %p2182_p5 = por %p2181_p6, %p2180_p2 }
  0x3c   : > { %p2184_p11 = por %p2183_p10, %p2182_p5 }
  0x3e   : > { %p2185_p1 = pnand %p2184_p11, %p2178_p4 }
  0x40   : > { %2188 = shalt.err (!%p2185_p1)
}
  0x41   : > { %s2189_s17 = scalar_lea.vmem %s2435_s15, 12288  ;;  %s2293_s30 = smov [#allocation2]  }
  0x42   : > { %p2190_p0 = scmp.ne.s32.totalorder %s2435_s15, %s2189_s17  ;;  %s2194_s27 = sshll.u32 %s2293_s30, 4  ;;  %s2195_s27 = int_to_ptr.vmem [resolvable:$false] %s2194_s27 }
  0x43   : > { %s2196_s6 = scalar_lea.vmem %s2195_s27, 24576  ;;  %p2197_p7 = scmp.lt.s32.totalorder %s2435_s15, %s2195_s27 }
  0x44   : > { %p2192_p9 = pnand %p2190_p0, %p2176_p12  ;;  %p2198_p13 = scmp.lt.s32.totalorder %s2196_s6, %s2189_s17 }
  0x46   : > { %p2193_p3 = pneg %p2192_p9  ;;  %p2199_p2 = por %p2198_p13, %p2197_p7 }
  0x48   : > { %p2200_p6 = pnand %p2199_p2, %p2193_p3 }
  0x4a   : > { %2203 = shalt.err (!%p2200_p6)
}
  0x4b   : > { %s2294_s8 = smov 2048   ;;  %s2295_s16 = smov 128  }
  0x4c   : > { %2084 = dma.hbm_to_vmem [thread:$0]  (!%p2913_p8), %s2428_s7, 12288, %s2435_s15, %s2437_s29, %s2294_s8, %s2294_s8, %s2295_s16  }
  0x4d   : > { %p2914_p12 = scmp.ne.s32.totalorder %s2908_s23, 0 }
  0x4e   : > { %s2468_s19 = sand.u32 (!%p2914_p12), 1, %s2274_s10   ;;  %p2915_p4 = scmp.ne.s32.totalorder (!%p2914_p12), %s2905_s20, 0 }
  0x4f   : > { %165 = sbr.rel (%p2914_p12) target bundleno = 594 (0x252), region = 28  ;;  %s168_s3 = scalar_lea.sflag (!%p2914_p12), [#allocation3], %s2468_s19 }
  0x50   : > { %s2068_s24 = smul.u32 (!%p2914_p12), 768, %s2468_s19 }
  0x52   : > { %s2472_s4 = scalar_lea.vmem (!%p2914_p12), [#allocation2], %s2068_s24 }
  0x56   : > { %2257 = dma.done.wait (%p2915_p4), %s168_s3, 12288  }
  0x57   : > { %2259 = vsyncadd (%p2915_p4), %s168_s3, 4294955008  ;;  %p2916_p8 = scmp.ne.s32.totalorder %s2903_s18, 0 }
  0x59   : > { %2261 = dma.done.wait (%p2916_p8), [#allocation6], 32  }
  0x5a   : > { %2263 = vsyncadd (%p2916_p8), [#allocation6], 4294967264  ;;  %v2296_v0 = vmov 0   ;;  %v198_v1 = vld [vmem:[%s2472_s4] sm:$0xff]  ;;  %v199_v3 = vld [vmem:[%s2472_s4 + $0x8] sm:$0xff]  ;;  %vm774_vm0 = vcmask 392192  }
  0x5b   : > { %810 = vmatprep.mubr.bf16.mxu0 %v2296_v0  ;;  %851 = vmatprep.mubr.bf16.mxu1 %v2296_v0  ;;  %v214_v2 = vld [vmem:[%s2472_s4 + $0x80] sm:$0xff]  ;;  %v215_v6 = vld [vmem:[%s2472_s4 + $0x88] sm:$0xff]  ;;  %v200_v23 = vld [vmem:[%s2472_s4 + $0x10] sm:$0xff]  ;;  %vm1498_vm1 = vcmask 1043456   ;;  %s1931_s18 = sshll.u32 %s2468_s19, 6  ;;  %s2065_s23 = sshll.u32 %s2282_s12, 10 }
  0x5c   : > { %v1933_v4 = vcombine.high %v198_v1, %v214_v2  ;;  %v1932_v5 = vcombine.low %v198_v1, %v214_v2  ;;  %v230_v7 = vld [vmem:[%s2472_s4 + $0x100] sm:$0xff]  ;;  %v1935_v9 = vcombine.high %v199_v3, %v215_v6  ;;  %v1934_v10 = vcombine.low %v199_v3, %v215_v6  ;;  %v231_v12 = vld [vmem:[%s2472_s4 + $0x108] sm:$0xff]  ;;  %v216_v24 = vld [vmem:[%s2472_s4 + $0x90] sm:$0xff]  ;;  %s195_s20 = scalar_lea.vmem [#allocation7], %s1931_s18  ;;  %s2845_s29 = scalar_lea.hbm %s2896_s2, %s2065_s23 }
  0x5d   : > { %v246_v8 = vld [vmem:[%s2472_s4 + $0x180] sm:$0xff]  ;;  %v247_v13 = vld [vmem:[%s2472_s4 + $0x188] sm:$0xff]  ;;  %v201_v25 = vld [vmem:[%s2472_s4 + $0x18] sm:$0xff]  ;;  %v1937_v29 = vcombine.high %v200_v23, %v216_v24  ;;  %v1936_v36 = vcombine.low %v200_v23, %v216_v24  ;;  %s1830_s26 = sshll.u32 %s195_s20, 4  ;;  %s1814_s12 = scalar_lea.sflag [#allocation4], %s2468_s19  ;;  %s2847_s26 = int_to_ptr.vmem [resolvable:$true] %s1830_s26 }
  0x5e   : > { %v1965_v11 = vcombine.high %v230_v7, %v246_v8  ;;  %v262_v14 = vld [vmem:[%s2472_s4 + $0x200] sm:$0xff]  ;;  %778 = vmatprep.subr.bf16.mxu0 %v1933_v4  ;;  %v1967_v15 = vcombine.high %v231_v12, %v247_v13  ;;  %v263_v17 = vld [vmem:[%s2472_s4 + $0x208] sm:$0xff]  ;;  %819 = vmatprep.subr.bf16.mxu1 %v1935_v9  ;;  %v1964_v19 = vcombine.low %v230_v7, %v246_v8  ;;  %v217_v26 = vld [vmem:[%s2472_s4 + $0x98] sm:$0xff]  ;;  %s2204_s5 = scalar_lea.vmem %s2847_s26, 1024  ;;  %p2917_p10 = scmp.ne.s32.totalorder %s2906_s21, 0 }
  0x5f   : > { %v278_v16 = vld [vmem:[%s2472_s4 + $0x280] sm:$0xff]  ;;  %v279_v18 = vld [vmem:[%s2472_s4 + $0x288] sm:$0xff]  ;;  %779 = vmatpush1.bf16.msra.mxu0 %v1932_v5  ;;  %820 = vmatpush1.bf16.msra.mxu1 %v1934_v10  ;;  %v1966_v20 = vcombine.low %v231_v12, %v247_v13  ;;  %v1939_v30 = vcombine.high %v201_v25, %v217_v26  ;;  %v232_v31 = vld [vmem:[%s2472_s4 + $0x110] sm:$0xff]  ;;  %v1938_v37 = vcombine.low %v201_v25, %v217_v26  ;;  %p2205_p5 = scmp.ne.s32.totalorder %s2847_s26, %s2204_s5  ;;  %s2298_s17 = smov [#allocation7]  }
  0x60   : > { %780 = vmatprep.subr.bf16.mxu0 %v1965_v11  ;;  %v1997_v21 = vcombine.high %v262_v14, %v278_v16  ;;  %821 = vmatprep.subr.bf16.mxu1 %v1967_v15  ;;  %v1999_v22 = vcombine.high %v263_v17, %v279_v18  ;;  %v1996_v27 = vcombine.low %v262_v14, %v278_v16  ;;  %v248_v32 = vld [vmem:[%s2472_s4 + $0x190] sm:$0xff]  ;;  %v233_v33 = vld [vmem:[%s2472_s4 + $0x118] sm:$0xff]  ;;  %v2504_v35 = vld [vmem:[#allocation5] sm:$0x3]  ;;  %s2208_s30 = sshll.u32 %s2298_s17, 4  ;;  %s2209_s30 = int_to_ptr.vmem [resolvable:$false] %s2208_s30 }
  0x61   : > { %v1998_v28 = vcombine.low %v263_v17, %v279_v18  ;;  %v249_v34 = vld [vmem:[%s2472_s4 + $0x198] sm:$0xff]  ;;  %v1969_v38 = vcombine.high %v232_v31, %v248_v32  ;;  %v264_v40 = vld [vmem:[%s2472_s4 + $0x210] sm:$0xff]  ;;  %v1968_v44 = vcombine.low %v232_v31, %v248_v32  ;;  %v202_v48 = vld [vmem:[%s2472_s4 + $0x20] sm:$0xff]  ;;  %p2206_p11 = pnand %p2205_p5, %p2917_p10  ;;  %s2210_s27 = scalar_lea.vmem %s2209_s30, 2048 }
  0x62   : > { %v1971_v39 = vcombine.high %v233_v33, %v249_v34  ;;  %v280_v41 = vld [vmem:[%s2472_s4 + $0x290] sm:$0xff]  ;;  %v265_v42 = vld [vmem:[%s2472_s4 + $0x218] sm:$0xff]  ;;  %v1970_v45 = vcombine.low %v233_v33, %v249_v34  ;;  %v218_v49 = vld [vmem:[%s2472_s4 + $0xa0] sm:$0xff]  ;;  %p2211_p0 = scmp.lt.s32.totalorder %s2847_s26, %s2209_s30  ;;  %p2212_p9 = scmp.lt.s32.totalorder %s2210_s27, %s2204_s5 }
  0x63   : > { %781 = vmatpush1.bf16.msra.mxu0 %v1964_v19  ;;  %822 = vmatpush1.bf16.msra.mxu1 %v1966_v20  ;;  %v281_v43 = vld [vmem:[%s2472_s4 + $0x298] sm:$0xff]  ;;  %v2001_v46 = vcombine.high %v264_v40, %v280_v41  ;;  %v203_v50 = vld [vmem:[%s2472_s4 + $0x28] sm:$0xff]  ;;  %v2000_v52 = vcombine.low %v264_v40, %v280_v41  ;;  %v1941_v54 = vcombine.high %v202_v48, %v218_v49  ;;  %v234_v56 = vld [vmem:[%s2472_s4 + $0x120] sm:$0xff]  ;;  %p2207_p1 = pneg %p2206_p11 }
  0x64   : > { %782 = vmatprep.subr.bf16.mxu0 %v1997_v21  ;;  %823 = vmatprep.subr.bf16.mxu1 %v1999_v22  ;;  %v2003_v47 = vcombine.high %v265_v42, %v281_v43  ;;  %v219_v51 = vld [vmem:[%s2472_s4 + $0xa8] sm:$0xff]  ;;  %v2002_v53 = vcombine.low %v265_v42, %v281_v43  ;;  %v250_v57 = vld [vmem:[%s2472_s4 + $0x1a0] sm:$0xff]  ;;  %v1940_v60 = vcombine.low %v202_v48, %v218_v49  ;;  %v204_v9 = vld [vmem:[%s2472_s4 + $0x30] sm:$0xff]  ;;  %p2213_p3 = por %p2212_p9, %p2211_p0 }
  0x65   : > { %v1943_v55 = vcombine.high %v203_v50, %v219_v51  ;;  %v235_v58 = vld [vmem:[%s2472_s4 + $0x128] sm:$0xff]  ;;  %v1942_v61 = vcombine.low %v203_v50, %v219_v51  ;;  %v1973_v62 = vcombine.high %v234_v56, %v250_v57  ;;  %v266_v1 = vld [vmem:[%s2472_s4 + $0x220] sm:$0xff]  ;;  %v1972_v5 = vcombine.low %v234_v56, %v250_v57  ;;  %v220_v10 = vld [vmem:[%s2472_s4 + $0xb0] sm:$0xff] }
  0x66   : > { %v251_v59 = vld [vmem:[%s2472_s4 + $0x1a8] sm:$0xff]  ;;  %v282_v2 = vld [vmem:[%s2472_s4 + $0x2a0] sm:$0xff]  ;;  %v205_v11 = vld [vmem:[%s2472_s4 + $0x38] sm:$0xff]  ;;  %v1945_v15 = vcombine.high %v204_v9, %v220_v10  ;;  %v1944_v21 = vcombine.low %v204_v9, %v220_v10  ;;  %p2214_p7 = pnand %p2213_p3, %p2207_p1 }
  0x67   : > { %783 = vmatpush1.bf16.msra.mxu0 %v1996_v27  ;;  %824 = vmatpush1.bf16.msra.mxu1 %v1998_v28  ;;  %v1975_v63 = vcombine.high %v235_v58, %v251_v59  ;;  %v267_v3 = vld [vmem:[%s2472_s4 + $0x228] sm:$0xff]  ;;  %v1974_v6 = vcombine.low %v235_v58, %v251_v59  ;;  %v2005_v7 = vcombine.high %v266_v1, %v282_v2  ;;  %v221_v12 = vld [vmem:[%s2472_s4 + $0xb8] sm:$0xff]  ;;  %v236_v17 = vld [vmem:[%s2472_s4 + $0x130] sm:$0xff] }
  0x68   : > { %860 = vmatprep.subr.bf16.mxu0 %v1937_v29  ;;  %901 = vmatprep.subr.bf16.mxu1 %v1939_v30  ;;  %v283_v4 = vld [vmem:[%s2472_s4 + $0x2a8] sm:$0xff]  ;;  %v2004_v13 = vcombine.low %v266_v1, %v282_v2  ;;  %v1947_v16 = vcombine.high %v205_v11, %v221_v12  ;;  %v252_v18 = vld [vmem:[%s2472_s4 + $0x1b0] sm:$0xff]  ;;  %v237_v19 = vld [vmem:[%s2472_s4 + $0x138] sm:$0xff]  ;;  %v1946_v22 = vcombine.low %v205_v11, %v221_v12 }
  0x69   : > { %v2007_v8 = vcombine.high %v267_v3, %v283_v4  ;;  %v2006_v14 = vcombine.low %v267_v3, %v283_v4  ;;  %v253_v20 = vld [vmem:[%s2472_s4 + $0x1b8] sm:$0xff]  ;;  %v1977_v23 = vcombine.high %v236_v17, %v252_v18  ;;  %v268_v25 = vld [vmem:[%s2472_s4 + $0x230] sm:$0xff]  ;;  %v1976_v29 = vcombine.low %v236_v17, %v252_v18  ;;  %v206_v33 = vld [vmem:[%s2472_s4 + $0x40] sm:$0xff] }
  0x6a   : > { %2028 = vmatmul.mubr.msk.bf16.vlgmr.msra.gmra.mrb[0].mxu0 %vm774_vm0, %v2504_v35  ;;  %2029 = vmatmul.mubr.msk.bf16.vlgmr.msra.gmra.mrb[0].mxu1 %vm774_vm0, %v2504_v35  ;;  %v1979_v24 = vcombine.high %v237_v19, %v253_v20  ;;  %v284_v26 = vld [vmem:[%s2472_s4 + $0x2b0] sm:$0xff]  ;;  %v269_v27 = vld [vmem:[%s2472_s4 + $0x238] sm:$0xff]  ;;  %v1978_v30 = vcombine.low %v237_v19, %v253_v20  ;;  %v222_v34 = vld [vmem:[%s2472_s4 + $0xc0] sm:$0xff] }
  0x6b   : > { %861 = vmatpush1.bf16.msra.mxu0 %v1936_v36  ;;  %902 = vmatpush1.bf16.msra.mxu1 %v1938_v37  ;;  %v285_v28 = vld [vmem:[%s2472_s4 + $0x2b8] sm:$0xff]  ;;  %v2009_v31 = vcombine.high %v268_v25, %v284_v26  ;;  %v207_v36 = vld [vmem:[%s2472_s4 + $0x48] sm:$0xff]  ;;  %v1949_v40 = vcombine.high %v206_v33, %v222_v34  ;;  %v238_v42 = vld [vmem:[%s2472_s4 + $0x140] sm:$0xff] }
  0x6c   : > { %862 = vmatprep.subr.bf16.mxu0 %v1969_v38  ;;  %903 = vmatprep.subr.bf16.mxu1 %v1971_v39  ;;  %v2011_v32 = vcombine.high %v269_v27, %v285_v28  ;;  %v223_v37 = vld [vmem:[%s2472_s4 + $0xc8] sm:$0xff]  ;;  %v2008_v38 = vcombine.low %v268_v25, %v284_v26  ;;  %v2010_v39 = vcombine.low %v269_v27, %v285_v28  ;;  %v254_v43 = vld [vmem:[%s2472_s4 + $0x1c0] sm:$0xff]  ;;  %v208_v58 = vld [vmem:[%s2472_s4 + $0x50] sm:$0xff] }
  0x6d   : > { %892 = vmatprep.mubr.bf16.mxu0 %v2296_v0  ;;  %933 = vmatprep.mubr.bf16.mxu1 %v2296_v0  ;;  %v1951_v41 = vcombine.high %v207_v36, %v223_v37  ;;  %v1981_v48 = vcombine.high %v238_v42, %v254_v43  ;;  %v270_v50 = vld [vmem:[%s2472_s4 + $0x240] sm:$0xff]  ;;  %v224_v59 = vld [vmem:[%s2472_s4 + $0xd0] sm:$0xff] }
  0x6e   : > { %v286_v51 = vld [vmem:[%s2472_s4 + $0x2c0] sm:$0xff]  ;;  %v1953_v1 = vcombine.high %v208_v58, %v224_v59  ;;  %v240_v3 = vld [vmem:[%s2472_s4 + $0x150] sm:$0xff] }
  0x6f   : > { %863 = vmatpush1.bf16.msra.mxu0 %v1968_v44  ;;  %904 = vmatpush1.bf16.msra.mxu1 %v1970_v45  ;;  %v239_v44 = vld [vmem:[%s2472_s4 + $0x148] sm:$0xff]  ;;  %v2013_v56 = vcombine.high %v270_v50, %v286_v51  ;;  %v256_v4 = vld [vmem:[%s2472_s4 + $0x1d0] sm:$0xff]  ;;  %v210_v19 = vld [vmem:[%s2472_s4 + $0x60] sm:$0xff] }
  0x70   : > { %864 = vmatprep.subr.bf16.mxu0 %v2001_v46  ;;  %905 = vmatprep.subr.bf16.mxu1 %v2003_v47  ;;  %v255_v45 = vld [vmem:[%s2472_s4 + $0x1c8] sm:$0xff]  ;;  %v1948_v46 = vcombine.low %v206_v33, %v222_v34  ;;  %v1950_v47 = vcombine.low %v207_v36, %v223_v37  ;;  %v1985_v9 = vcombine.high %v240_v3, %v256_v4  ;;  %v272_v11 = vld [vmem:[%s2472_s4 + $0x250] sm:$0xff]  ;;  %v226_v20 = vld [vmem:[%s2472_s4 + $0xe0] sm:$0xff] }
  0x71   : > { %v1983_v49 = vcombine.high %v239_v44, %v255_v45  ;;  %v288_v12 = vld [vmem:[%s2472_s4 + $0x2d0] sm:$0xff]  ;;  %v1957_v25 = vcombine.high %v210_v19, %v226_v20  ;;  %v242_v27 = vld [vmem:[%s2472_s4 + $0x160] sm:$0xff] }
  0x72   : > { %v2017_v17 = vcombine.high %v272_v11, %v288_v12  ;;  %v258_v28 = vld [vmem:[%s2472_s4 + $0x1e0] sm:$0xff] }
  0x73   : > { %865 = vmatpush1.bf16.msra.mxu0 %v2000_v52  ;;  %906 = vmatpush1.bf16.msra.mxu1 %v2002_v53  ;;  %v271_v52 = vld [vmem:[%s2472_s4 + $0x248] sm:$0xff]  ;;  %v1989_v33 = vcombine.high %v242_v27, %v258_v28  ;;  %v274_v36 = vld [vmem:[%s2472_s4 + $0x260] sm:$0xff] }
  0x74   : > { %942 = vmatprep.subr.bf16.mxu0 %v1941_v54  ;;  %983 = vmatprep.subr.bf16.mxu1 %v1943_v55  ;;  %v287_v53 = vld [vmem:[%s2472_s4 + $0x2c8] sm:$0xff]  ;;  %v1980_v54 = vcombine.low %v238_v42, %v254_v43  ;;  %v1982_v55 = vcombine.low %v239_v44, %v255_v45  ;;  %v290_v37 = vld [vmem:[%s2472_s4 + $0x2e0] sm:$0xff]  ;;  %v212_v44 = vld [vmem:[%s2472_s4 + $0x70] sm:$0xff] }
  0x75   : > { %v2015_v57 = vcombine.high %v271_v52, %v287_v53  ;;  %v2021_v42 = vcombine.high %v274_v36, %v290_v37  ;;  %v228_v45 = vld [vmem:[%s2472_s4 + $0xf0] sm:$0xff] }
  0x76   : > { %2030 = vmatmul.mubr.msk.bf16.vlgmr.msra.gmra.mrb[4].mxu0 %vm774_vm0, %v2504_v35  ;;  %2031 = vmatmul.mubr.msk.bf16.vlgmr.msra.gmra.mrb[4].mxu1 %vm774_vm0, %v2504_v35 }
  0x77   : > { %943 = vmatpush1.bf16.msra.mxu0 %v1940_v60  ;;  %984 = vmatpush1.bf16.msra.mxu1 %v1942_v61  ;;  %v209_v60 = vld [vmem:[%s2472_s4 + $0x58] sm:$0xff] }
  0x78   : > { %944 = vmatprep.subr.bf16.mxu0 %v1973_v62  ;;  %985 = vmatprep.subr.bf16.mxu1 %v1975_v63  ;;  %v225_v61 = vld [vmem:[%s2472_s4 + $0xd8] sm:$0xff]  ;;  %v2012_v62 = vcombine.low %v270_v50, %v286_v51  ;;  %v2014_v63 = vcombine.low %v271_v52, %v287_v53  ;;  %v1961_v50 = vcombine.high %v212_v44, %v228_v45  ;;  %v244_v52 = vld [vmem:[%s2472_s4 + $0x170] sm:$0xff] }
  0x79   : > { %974 = vmatprep.mubr.bf16.mxu0 %v2296_v0  ;;  %1015 = vmatprep.mubr.bf16.mxu1 %v2296_v0  ;;  %v1955_v2 = vcombine.high %v209_v60, %v225_v61  ;;  %v260_v53 = vld [vmem:[%s2472_s4 + $0x1f0] sm:$0xff] }
  0x7b   : > { %945 = vmatpush1.bf16.msra.mxu0 %v1972_v5  ;;  %986 = vmatpush1.bf16.msra.mxu1 %v1974_v6  ;;  %v241_v5 = vld [vmem:[%s2472_s4 + $0x158] sm:$0xff] }
  0x7c   : > { %946 = vmatprep.subr.bf16.mxu0 %v2005_v7  ;;  %987 = vmatprep.subr.bf16.mxu1 %v2007_v8  ;;  %v257_v6 = vld [vmem:[%s2472_s4 + $0x1d8] sm:$0xff]  ;;  %v1952_v7 = vcombine.low %v208_v58, %v224_v59  ;;  %v1954_v8 = vcombine.low %v209_v60, %v225_v61  ;;  %v1993_v58 = vcombine.high %v244_v52, %v260_v53  ;;  %v276_v60 = vld [vmem:[%s2472_s4 + $0x270] sm:$0xff] }
  0x7d   : > { %v1987_v10 = vcombine.high %v241_v5, %v257_v6  ;;  %v292_v61 = vld [vmem:[%s2472_s4 + $0x2f0] sm:$0xff] }
  0x7f   : > { %947 = vmatpush1.bf16.msra.mxu0 %v2004_v13  ;;  %988 = vmatpush1.bf16.msra.mxu1 %v2006_v14  ;;  %v273_v13 = vld [vmem:[%s2472_s4 + $0x258] sm:$0xff] }
  0x80   : > { %1024 = vmatprep.subr.bf16.mxu0 %v1945_v15  ;;  %1065 = vmatprep.subr.bf16.mxu1 %v1947_v16  ;;  %v289_v14 = vld [vmem:[%s2472_s4 + $0x2d8] sm:$0xff]  ;;  %v1984_v15 = vcombine.low %v240_v3, %v256_v4  ;;  %v1986_v16 = vcombine.low %v241_v5, %v257_v6  ;;  %v2025_v3 = vcombine.high %v276_v60, %v292_v61 }
  0x81   : > { %v2019_v18 = vcombine.high %v273_v13, %v289_v14  ;;  %v2024_v5 = vcombine.low %v276_v60, %v292_v61 }
  0x82   : > { %2032 = vmatmul.mubr.msk.bf16.vlgmr.msra.gmra.mrb[8].mxu0 %vm774_vm0, %v2504_v35  ;;  %2033 = vmatmul.mubr.msk.bf16.vlgmr.msra.gmra.mrb[8].mxu1 %vm774_vm0, %v2504_v35 }
  0x83   : > { %1025 = vmatpush1.bf16.msra.mxu0 %v1944_v21  ;;  %1066 = vmatpush1.bf16.msra.mxu1 %v1946_v22  ;;  %v211_v21 = vld [vmem:[%s2472_s4 + $0x68] sm:$0xff] }
  0x84   : > { %1026 = vmatprep.subr.bf16.mxu0 %v1977_v23  ;;  %1067 = vmatprep.subr.bf16.mxu1 %v1979_v24  ;;  %v227_v22 = vld [vmem:[%s2472_s4 + $0xe8] sm:$0xff]  ;;  %v2016_v23 = vcombine.low %v272_v11, %v288_v12  ;;  %v2018_v24 = vcombine.low %v273_v13, %v289_v14 }
  0x85   : > { %1056 = vmatprep.mubr.bf16.mxu0 %v2296_v0  ;;  %1097 = vmatprep.mubr.bf16.mxu1 %v2296_v0  ;;  %v1959_v26 = vcombine.high %v211_v21, %v227_v22 }
  0x87   : > { %1027 = vmatpush1.bf16.msra.mxu0 %v1976_v29  ;;  %1068 = vmatpush1.bf16.msra.mxu1 %v1978_v30  ;;  %v243_v29 = vld [vmem:[%s2472_s4 + $0x168] sm:$0xff] }
  0x88   : > { %1028 = vmatprep.subr.bf16.mxu0 %v2009_v31  ;;  %1069 = vmatprep.subr.bf16.mxu1 %v2011_v32  ;;  %v259_v30 = vld [vmem:[%s2472_s4 + $0x1e8] sm:$0xff]  ;;  %v1956_v31 = vcombine.low %v210_v19, %v226_v20  ;;  %v1958_v32 = vcombine.low %v211_v21, %v227_v22 }
  0x89   : > { %v1991_v34 = vcombine.high %v243_v29, %v259_v30 }
  0x8b   : > { %1029 = vmatpush1.bf16.msra.mxu0 %v2008_v38  ;;  %1070 = vmatpush1.bf16.msra.mxu1 %v2010_v39  ;;  %v275_v38 = vld [vmem:[%s2472_s4 + $0x268] sm:$0xff] }
  0x8c   : > { %1106 = vmatprep.subr.bf16.mxu0 %v1949_v40  ;;  %1147 = vmatprep.subr.bf16.mxu1 %v1951_v41  ;;  %v291_v39 = vld [vmem:[%s2472_s4 + $0x2e8] sm:$0xff]  ;;  %v1988_v40 = vcombine.low %v242_v27, %v258_v28  ;;  %v1990_v41 = vcombine.low %v243_v29, %v259_v30 }
  0x8d   : > { %v2023_v43 = vcombine.high %v275_v38, %v291_v39 }
  0x8e   : > { %2034 = vmatmul.mubr.msk.bf16.vlgmr.msra.gmra.mrb[12].mxu0 %vm774_vm0, %v2504_v35  ;;  %2035 = vmatmul.mubr.msk.bf16.vlgmr.msra.gmra.mrb[12].mxu1 %vm774_vm0, %v2504_v35 }
  0x8f   : > { %1107 = vmatpush1.bf16.msra.mxu0 %v1948_v46  ;;  %1148 = vmatpush1.bf16.msra.mxu1 %v1950_v47  ;;  %v213_v46 = vld [vmem:[%s2472_s4 + $0x78] sm:$0xff] }
  0x90   : > { %1108 = vmatprep.subr.bf16.mxu0 %v1981_v48  ;;  %1149 = vmatprep.subr.bf16.mxu1 %v1983_v49  ;;  %v229_v47 = vld [vmem:[%s2472_s4 + $0xf8] sm:$0xff]  ;;  %v2020_v48 = vcombine.low %v274_v36, %v290_v37  ;;  %v2022_v49 = vcombine.low %v275_v38, %v291_v39 }
  0x91   : > { %1138 = vmatprep.mubr.bf16.mxu0 %v2296_v0  ;;  %1179 = vmatprep.mubr.bf16.mxu1 %v2296_v0  ;;  %v1963_v51 = vcombine.high %v213_v46, %v229_v47 }
  0x93   : > { %1109 = vmatpush1.bf16.msra.mxu0 %v1980_v54  ;;  %1150 = vmatpush1.bf16.msra.mxu1 %v1982_v55  ;;  %v245_v54 = vld [vmem:[%s2472_s4 + $0x178] sm:$0xff] }
  0x94   : > { %1110 = vmatprep.subr.bf16.mxu0 %v2013_v56  ;;  %1151 = vmatprep.subr.bf16.mxu1 %v2015_v57  ;;  %v261_v55 = vld [vmem:[%s2472_s4 + $0x1f8] sm:$0xff]  ;;  %v1960_v56 = vcombine.low %v212_v44, %v228_v45  ;;  %v1962_v57 = vcombine.low %v213_v46, %v229_v47 }
  0x95   : > { %v1995_v59 = vcombine.high %v245_v54, %v261_v55 }
  0x97   : > { %1111 = vmatpush1.bf16.msra.mxu0 %v2012_v62  ;;  %1152 = vmatpush1.bf16.msra.mxu1 %v2014_v63  ;;  %v277_v62 = vld [vmem:[%s2472_s4 + $0x278] sm:$0xff] }
  0x98   : > { %1188 = vmatprep.subr.bf16.mxu0 %v1953_v1  ;;  %1229 = vmatprep.subr.bf16.mxu1 %v1955_v2  ;;  %v293_v63 = vld [vmem:[%s2472_s4 + $0x2f8] sm:$0xff]  ;;  %v1992_v1 = vcombine.low %v244_v52, %v260_v53  ;;  %v1994_v2 = vcombine.low %v245_v54, %v261_v55 }
  0x99   : > { %v2027_v4 = vcombine.high %v277_v62, %v293_v63  ;;  %v2026_v6 = vcombine.low %v277_v62, %v293_v63 }
  0x9a   : > { %2036 = vmatmul.mubr.msk.bf16.vlgmr.msra.gmra.mrb[16].mxu0 %vm774_vm0, %v2504_v35  ;;  %2037 = vmatmul.mubr.msk.bf16.vlgmr.msra.gmra.mrb[16].mxu1 %vm774_vm0, %v2504_v35 }
  0x9b   : > { %1189 = vmatpush1.bf16.msra.mxu0 %v1952_v7  ;;  %1230 = vmatpush1.bf16.msra.mxu1 %v1954_v8 }
  0x9c   : > { %1190 = vmatprep.subr.bf16.mxu0 %v1985_v9  ;;  %1231 = vmatprep.subr.bf16.mxu1 %v1987_v10 }
  0x9d   : > { %1220 = vmatprep.mubr.bf16.mxu0 %v2296_v0  ;;  %1261 = vmatprep.mubr.bf16.mxu1 %v2296_v0 }
  0x9f   : > { %1191 = vmatpush1.bf16.msra.mxu0 %v1984_v15  ;;  %1232 = vmatpush1.bf16.msra.mxu1 %v1986_v16 }
  0xa0   : > { %1192 = vmatprep.subr.bf16.mxu0 %v2017_v17  ;;  %1233 = vmatprep.subr.bf16.mxu1 %v2019_v18 }
  0xa3   : > { %1193 = vmatpush1.bf16.msra.mxu0 %v2016_v23  ;;  %1234 = vmatpush1.bf16.msra.mxu1 %v2018_v24 }
  0xa4   : > { %1270 = vmatprep.subr.bf16.mxu0 %v1957_v25  ;;  %1311 = vmatprep.subr.bf16.mxu1 %v1959_v26 }
  0xa6   : > { %2038 = vmatmul.mubr.msk.bf16.vlgmr.msra.gmra.mrb[20].mxu0 %vm774_vm0, %v2504_v35  ;;  %2039 = vmatmul.mubr.msk.bf16.vlgmr.msra.gmra.mrb[20].mxu1 %vm774_vm0, %v2504_v35 }
  0xa7   : > { %1271 = vmatpush1.bf16.msra.mxu0 %v1956_v31  ;;  %1312 = vmatpush1.bf16.msra.mxu1 %v1958_v32 }
  0xa8   : > { %1272 = vmatprep.subr.bf16.mxu0 %v1989_v33  ;;  %1313 = vmatprep.subr.bf16.mxu1 %v1991_v34 }
  0xa9   : > { %1302 = vmatprep.mubr.bf16.mxu0 %v2296_v0  ;;  %1343 = vmatprep.mubr.bf16.mxu1 %v2296_v0 }
  0xab   : > { %1273 = vmatpush1.bf16.msra.mxu0 %v1988_v40  ;;  %1314 = vmatpush1.bf16.msra.mxu1 %v1990_v41 }
  0xac   : > { %1274 = vmatprep.subr.bf16.mxu0 %v2021_v42  ;;  %1315 = vmatprep.subr.bf16.mxu1 %v2023_v43 }
  0xaf   : > { %1275 = vmatpush1.bf16.msra.mxu0 %v2020_v48  ;;  %1316 = vmatpush1.bf16.msra.mxu1 %v2022_v49 }
  0xb0   : > { %1352 = vmatprep.subr.bf16.mxu0 %v1961_v50  ;;  %1393 = vmatprep.subr.bf16.mxu1 %v1963_v51 }
  0xb2   : > { %2040 = vmatmul.mubr.msk.bf16.vlgmr.msra.gmra.mrb[24].mxu0 %vm774_vm0, %v2504_v35  ;;  %2041 = vmatmul.mubr.msk.bf16.vlgmr.msra.gmra.mrb[24].mxu1 %vm774_vm0, %v2504_v35 }
  0xb3   : > { %1353 = vmatpush1.bf16.msra.mxu0 %v1960_v56  ;;  %1394 = vmatpush1.bf16.msra.mxu1 %v1962_v57 }
  0xb4   : > { %1354 = vmatprep.subr.bf16.mxu0 %v1993_v58  ;;  %1395 = vmatprep.subr.bf16.mxu1 %v1995_v59 }
  0xb5   : > { %1384 = vmatprep.mubr.bf16.mxu0 %v2296_v0  ;;  %1425 = vmatprep.mubr.bf16.mxu1 %v2296_v0 }
  0xb7   : > { %1355 = vmatpush1.bf16.msra.mxu0 %v1992_v1  ;;  %1396 = vmatpush1.bf16.msra.mxu1 %v1994_v2 }
  0xb8   : > { %1356 = vmatprep.subr.bf16.mxu0 %v2025_v3  ;;  %1397 = vmatprep.subr.bf16.mxu1 %v2027_v4 }
  0xbb   : > { %1357 = vmatpush1.bf16.msra.mxu0 %v2024_v5  ;;  %1398 = vmatpush1.bf16.msra.mxu1 %v2026_v6 }
  0xbe   : > { %2042 = vmatmul.mubr.msk.bf16.vlgmr.msra.gmra.mrb[28].mxu0 %vm774_vm0, %v2504_v35  ;;  %2043 = vmatmul.mubr.msk.bf16.vlgmr.msra.gmra.mrb[28].mxu1 %vm774_vm0, %v2504_v35 }
 0x13d   : > { %v812_v7 = vpop.f32.mrb[0].mxu0  ;;  %v853_v10 = vpop.f32.mrb[0].mxu1 }
 0x13e   : > { %v1434_v8 = vmax.f32 %v812_v7, 0.0  ;;  %v814_v9 = vpop.f32.mrb[1].mxu0  ;;  %v1436_v12 = vmax.f32 %v853_v10, 0.0  ;;  %v855_v13 = vpop.f32.mrb[1].mxu1 }
 0x13f   : > { %v1435_v0 = vmax.f32 %v814_v9, 0.0  ;;  %v816_v11 = vpop.f32.mrb[2].mxu0  ;;  %v857_v16 = vpop.f32.mrb[2].mxu1  ;;  %v1437_v20 = vmax.f32 %v855_v13, 0.0 }
 0x140   : > { %v2628_v14 = vmin.f32 %v1434_v8, 6.0  ;;  %v817_v15 = vpop.f32.mrb[3].mxu0  ;;  %v858_v18 = vpop.f32.mrb[3].mxu1  ;;  %v2634_v35 = vmin.f32 %v1436_v12, 6.0 }
 0x141   : > { %v2630_v17 = vmin.f32 %v1435_v0, 6.0  ;;  %v2640_v24 = vmin.f32 %v1437_v20, 6.0 }
 0x142   : > { %v1499_v19 = vsel %vm1498_vm1, %v2628_v14, 0.0  ;;  %v1502_v23 = vsel %vm1498_vm1, %v2634_v35, 0.0 }
 0x143   : > { %v1500_v21 = vsel %vm1498_vm1, %v2630_v17, 0.0  ;;  %v1504_v27 = vsel %vm1498_vm1, %v2640_v24, 0.0 }
 0x144   : > { %v1501_v22 = vadd.f32 %v1500_v21, %v1499_v19 }
 0x146   : > { %v1503_v25 = vadd.f32 %v1502_v23, %v1501_v22 }
 0x148   : > { %v1505_v39 = vadd.f32 %v1504_v27, %v1503_v25 }
 0x149   : > { %v894_v26 = vpop.f32.mrb[4].mxu0  ;;  %v935_v30 = vpop.f32.mrb[4].mxu1 }
 0x14a   : > { %v1438_v28 = vmax.f32 %v894_v26, 0.0  ;;  %v896_v29 = vpop.f32.mrb[5].mxu0  ;;  %v1440_v33 = vmax.f32 %v935_v30, 0.0  ;;  %v937_v34 = vpop.f32.mrb[5].mxu1 }
 0x14b   : > { %v1439_v31 = vmax.f32 %v896_v29, 0.0  ;;  %v898_v32 = vpop.f32.mrb[6].mxu0  ;;  %v939_v38 = vpop.f32.mrb[6].mxu1  ;;  %v1441_v44 = vmax.f32 %v937_v34, 0.0 }
 0x14c   : > { %v2644_v36 = vmin.f32 %v1438_v28, 6.0  ;;  %v899_v37 = vpop.f32.mrb[7].mxu0  ;;  %v940_v41 = vpop.f32.mrb[7].mxu1  ;;  %v2650_v43 = vmin.f32 %v1440_v33, 6.0 }
 0x14d   : > { %v2646_v40 = vmin.f32 %v1439_v31, 6.0  ;;  %v2656_v49 = vmin.f32 %v1441_v44, 6.0 }
 0x14e   : > { %v1506_v42 = vsel %vm1498_vm1, %v2644_v36, 0.0  ;;  %v1510_v48 = vsel %vm1498_vm1, %v2650_v43, 0.0 }
 0x14f   : > { %v1507_v45 = vadd.f32 %v1506_v42, %v1505_v39  ;;  %v1508_v46 = vsel %vm1498_vm1, %v2646_v40, 0.0  ;;  %v1512_v52 = vsel %vm1498_vm1, %v2656_v49, 0.0 }
 0x151   : > { %v1509_v47 = vadd.f32 %v1508_v46, %v1507_v45 }
 0x153   : > { %v1511_v50 = vadd.f32 %v1510_v48, %v1509_v47 }
 0x155   : > { %v976_v51 = vpop.f32.mrb[8].mxu0  ;;  %v1017_v55 = vpop.f32.mrb[8].mxu1  ;;  %v1513_v63 = vadd.f32 %v1512_v52, %v1511_v50 }
 0x156   : > { %v1442_v53 = vmax.f32 %v976_v51, 0.0  ;;  %v978_v54 = vpop.f32.mrb[9].mxu0  ;;  %v1444_v58 = vmax.f32 %v1017_v55, 0.0  ;;  %v1019_v59 = vpop.f32.mrb[9].mxu1 }
 0x157   : > { %v1443_v56 = vmax.f32 %v978_v54, 0.0  ;;  %v980_v57 = vpop.f32.mrb[10].mxu0  ;;  %v1021_v62 = vpop.f32.mrb[10].mxu1  ;;  %v1445_v5 = vmax.f32 %v1019_v59, 0.0 }
 0x158   : > { %v2660_v60 = vmin.f32 %v1442_v53, 6.0  ;;  %v981_v61 = vpop.f32.mrb[11].mxu0  ;;  %v1022_v2 = vpop.f32.mrb[11].mxu1  ;;  %v2666_v4 = vmin.f32 %v1444_v58, 6.0 }
 0x159   : > { %v2662_v1 = vmin.f32 %v1443_v56, 6.0  ;;  %v2672_v10 = vmin.f32 %v1445_v5, 6.0 }
 0x15a   : > { %v1514_v3 = vsel %vm1498_vm1, %v2660_v60, 0.0  ;;  %v1518_v9 = vsel %vm1498_vm1, %v2666_v4, 0.0 }
 0x15b   : > { %v1515_v6 = vadd.f32 %v1514_v3, %v1513_v63  ;;  %v1516_v7 = vsel %vm1498_vm1, %v2662_v1, 0.0  ;;  %v1520_v12 = vsel %vm1498_vm1, %v2672_v10, 0.0 }
 0x15d   : > { %v1517_v8 = vadd.f32 %v1516_v7, %v1515_v6 }
 0x15f   : > { %v1519_v0 = vadd.f32 %v1518_v9, %v1517_v8 }
 0x161   : > { %v1058_v11 = vpop.f32.mrb[12].mxu0  ;;  %v1099_v16 = vpop.f32.mrb[12].mxu1  ;;  %v1521_v26 = vadd.f32 %v1520_v12, %v1519_v0 }
 0x162   : > { %v1446_v13 = vmax.f32 %v1058_v11, 0.0  ;;  %v1060_v15 = vpop.f32.mrb[13].mxu0  ;;  %v1448_v20 = vmax.f32 %v1099_v16, 0.0  ;;  %v1101_v21 = vpop.f32.mrb[13].mxu1 }
 0x163   : > { %v1447_v18 = vmax.f32 %v1060_v15, 0.0  ;;  %v1062_v19 = vpop.f32.mrb[14].mxu0  ;;  %v1103_v25 = vpop.f32.mrb[14].mxu1  ;;  %v1449_v31 = vmax.f32 %v1101_v21, 0.0 }
 0x164   : > { %v2676_v22 = vmin.f32 %v1446_v13, 6.0  ;;  %v1063_v23 = vpop.f32.mrb[15].mxu0  ;;  %v1104_v28 = vpop.f32.mrb[15].mxu1  ;;  %v2682_v30 = vmin.f32 %v1448_v20, 6.0 }
 0x165   : > { %v2678_v27 = vmin.f32 %v1447_v18, 6.0  ;;  %v2688_v38 = vmin.f32 %v1449_v31, 6.0 }
 0x166   : > { %v1522_v29 = vsel %vm1498_vm1, %v2676_v22, 0.0  ;;  %v1526_v37 = vsel %vm1498_vm1, %v2682_v30, 0.0 }
 0x167   : > { %v1523_v32 = vadd.f32 %v1522_v29, %v1521_v26  ;;  %v1524_v33 = vsel %vm1498_vm1, %v2678_v27, 0.0  ;;  %v1528_v42 = vsel %vm1498_vm1, %v2688_v38, 0.0 }
 0x169   : > { %v1525_v34 = vadd.f32 %v1524_v33, %v1523_v32 }
 0x16b   : > { %v1527_v39 = vadd.f32 %v1526_v37, %v1525_v34 }
 0x16d   : > { %v1140_v41 = vpop.f32.mrb[16].mxu0  ;;  %v1181_v46 = vpop.f32.mrb[16].mxu1  ;;  %v1529_v55 = vadd.f32 %v1528_v42, %v1527_v39 }
 0x16e   : > { %v1450_v44 = vmax.f32 %v1140_v41, 0.0  ;;  %v1142_v45 = vpop.f32.mrb[17].mxu0  ;;  %v1452_v50 = vmax.f32 %v1181_v46, 0.0  ;;  %v1183_v51 = vpop.f32.mrb[17].mxu1 }
 0x16f   : > { %v1451_v47 = vmax.f32 %v1142_v45, 0.0  ;;  %v1144_v48 = vpop.f32.mrb[18].mxu0  ;;  %v1185_v54 = vpop.f32.mrb[18].mxu1  ;;  %v1453_v61 = vmax.f32 %v1183_v51, 0.0 }
 0x170   : > { %v2692_v52 = vmin.f32 %v1450_v44, 6.0  ;;  %v1145_v53 = vpop.f32.mrb[19].mxu0  ;;  %v1186_v57 = vpop.f32.mrb[19].mxu1  ;;  %v2698_v59 = vmin.f32 %v1452_v50, 6.0 }
 0x171   : > { %v2694_v56 = vmin.f32 %v1451_v47, 6.0  ;;  %v2704_v5 = vmin.f32 %v1453_v61, 6.0 }
 0x172   : > { %v1530_v58 = vsel %vm1498_vm1, %v2692_v52, 0.0  ;;  %v1534_v3 = vsel %vm1498_vm1, %v2698_v59, 0.0 }
 0x173   : > { %v1531_v62 = vadd.f32 %v1530_v58, %v1529_v55  ;;  %v1532_v63 = vsel %vm1498_vm1, %v2694_v56, 0.0  ;;  %v1536_v8 = vsel %vm1498_vm1, %v2704_v5, 0.0 }
 0x175   : > { %v1533_v2 = vadd.f32 %v1532_v63, %v1531_v62 }
 0x177   : > { %v1535_v6 = vadd.f32 %v1534_v3, %v1533_v2 }
 0x179   : > { %v1222_v7 = vpop.f32.mrb[20].mxu0  ;;  %v1263_v11 = vpop.f32.mrb[20].mxu1  ;;  %v1537_v21 = vadd.f32 %v1536_v8, %v1535_v6 }
 0x17a   : > { %v1454_v9 = vmax.f32 %v1222_v7, 0.0  ;;  %v1224_v0 = vpop.f32.mrb[21].mxu0  ;;  %v1456_v15 = vmax.f32 %v1263_v11, 0.0  ;;  %v1265_v16 = vpop.f32.mrb[21].mxu1 }
 0x17b   : > { %v1455_v12 = vmax.f32 %v1224_v0, 0.0  ;;  %v1226_v13 = vpop.f32.mrb[22].mxu0  ;;  %v1267_v20 = vpop.f32.mrb[22].mxu1  ;;  %v1457_v29 = vmax.f32 %v1265_v16, 0.0 }
 0x17c   : > { %v2708_v18 = vmin.f32 %v1454_v9, 6.0  ;;  %v1227_v19 = vpop.f32.mrb[23].mxu0  ;;  %v1268_v25 = vpop.f32.mrb[23].mxu1  ;;  %v2714_v28 = vmin.f32 %v1456_v15, 6.0 }
 0x17d   : > { %v2710_v23 = vmin.f32 %v1455_v12, 6.0  ;;  %v2720_v37 = vmin.f32 %v1457_v29, 6.0 }
 0x17e   : > { %v1538_v26 = vsel %vm1498_vm1, %v2708_v18, 0.0  ;;  %v1542_v34 = vsel %vm1498_vm1, %v2714_v28, 0.0 }
 0x17f   : > { %v1539_v31 = vadd.f32 %v1538_v26, %v1537_v21  ;;  %v1540_v32 = vsel %vm1498_vm1, %v2710_v23, 0.0  ;;  %v1544_v42 = vsel %vm1498_vm1, %v2720_v37, 0.0 }
 0x181   : > { %v1541_v33 = vadd.f32 %v1540_v32, %v1539_v31 }
 0x183   : > { %v1543_v39 = vadd.f32 %v1542_v34, %v1541_v33 }
 0x185   : > { %v1304_v41 = vpop.f32.mrb[24].mxu0  ;;  %v1345_v46 = vpop.f32.mrb[24].mxu1  ;;  %v1545_v57 = vadd.f32 %v1544_v42, %v1543_v39 }
 0x186   : > { %v1458_v44 = vmax.f32 %v1304_v41, 0.0  ;;  %v1306_v45 = vpop.f32.mrb[25].mxu0  ;;  %v1460_v50 = vmax.f32 %v1345_v46, 0.0  ;;  %v1347_v51 = vpop.f32.mrb[25].mxu1 }
 0x187   : > { %v1459_v47 = vmax.f32 %v1306_v45, 0.0  ;;  %v1308_v48 = vpop.f32.mrb[26].mxu0  ;;  %v1349_v55 = vpop.f32.mrb[26].mxu1  ;;  %v1461_v2 = vmax.f32 %v1347_v51, 0.0 }
 0x188   : > { %v2724_v53 = vmin.f32 %v1458_v44, 6.0  ;;  %v1309_v54 = vpop.f32.mrb[27].mxu0  ;;  %v1350_v61 = vpop.f32.mrb[27].mxu1  ;;  %v2730_v63 = vmin.f32 %v1460_v50, 6.0  ;;  %v2297_v55 = vmov 1983009808  }
 0x189   : > { %v2726_v58 = vmin.f32 %v1459_v47, 6.0  ;;  %v2736_v9 = vmin.f32 %v1461_v2, 6.0  ;;  %v1666_v61 = vlaneseq }
 0x18a   : > { %v1546_v62 = vsel %vm1498_vm1, %v2724_v53, 0.0  ;;  %v1550_v8 = vsel %vm1498_vm1, %v2730_v63, 0.0 }
 0x18b   : > { %v1547_v3 = vadd.f32 %v1546_v62, %v1545_v57  ;;  %v1548_v6 = vsel %vm1498_vm1, %v2726_v58, 0.0  ;;  %v1552_v12 = vsel %vm1498_vm1, %v2736_v9, 0.0  ;;  %v1664_v57 = vunpack.c.l.s4 %v2297_v55 }
 0x18c   : > { %v1667_v2 = vshrl.u32 %v1666_v61, 7 }
 0x18d   : > { %v1549_v7 = vadd.f32 %v1548_v6, %v1547_v3  ;;  %v1665_v62 = vunpack.c.0.s8 %v1664_v57 }
 0x18f   : > { %v1551_v0 = vadd.f32 %v1550_v8, %v1549_v7  ;;  %v2758_v7 = vsub.s32 %v1665_v62, %v1667_v2 }
 0x191   : > { %v1386_v11 = vpop.f32.mrb[28].mxu0  ;;  %v1427_v16 = vpop.f32.mrb[28].mxu1  ;;  %v1553_v33 = vadd.f32 %v1552_v12, %v1551_v0 }
 0x192   : > { %v1462_v13 = vmax.f32 %v1386_v11, 0.0  ;;  %v1388_v15 = vpop.f32.mrb[29].mxu0  ;;  %v1464_v20 = vmax.f32 %v1427_v16, 0.0  ;;  %v1429_v25 = vpop.f32.mrb[29].mxu1 }
 0x193   : > { %v1463_v19 = vmax.f32 %v1388_v15, 0.0  ;;  %v1390_v21 = vpop.f32.mrb[30].mxu0  ;;  %v1465_v29 = vmax.f32 %v1429_v25, 0.0  ;;  %v1431_v32 = vpop.f32.mrb[30].mxu1 }
 0x194   : > { %v2740_v26 = vmin.f32 %v1462_v13, 6.0  ;;  %v1391_v31 = vpop.f32.mrb[31].mxu0  ;;  %v2744_v39 = vmin.f32 %v1464_v20, 6.0  ;;  %v1432_v41 = vpop.f32.mrb[31].mxu1 }
 0x195   : > { %v2742_v34 = vmin.f32 %v1463_v19, 6.0  ;;  %v2750_v46 = vmin.f32 %v1465_v29, 6.0 }
 0x196   : > { %v1554_v42 = vsel %vm1498_vm1, %v2740_v26, 0.0  ;;  %v1558_v47 = vsel %vm1498_vm1, %v2744_v39, 0.0 }
 0x197   : > { %v1555_v44 = vadd.f32 %v1554_v42, %v1553_v33  ;;  %v1556_v45 = vsel %vm1498_vm1, %v2742_v34, 0.0  ;;  %v1560_v51 = vsel %vm1498_vm1, %v2750_v46, 0.0 }
 0x199   : > { %v1557_v48 = vadd.f32 %v1556_v45, %v1555_v44 }
 0x19b   : > { %v1559_v50 = vadd.f32 %v1558_v47, %v1557_v48 }
 0x19d   : > { %v1561_v54 = vadd.f32 %v1560_v51, %v1559_v50 }
 0x19f   : > { %1562 = vadd.xlane.f32.xlu0 %v1561_v54 }
 0x22c   : > { %v1563_v3 = vpop.xlane.xlu0 %1562 }
 0x22d   : > { %v2756_v6 = vmul.f32 0.00024414063, %v1563_v3 }
 0x22f   : > { %v1565_v8 = vsub.f32 %v2628_v14, %v2756_v6  ;;  %v1566_v0 = vsub.f32 %v2630_v17, %v2756_v6  ;;  %v1567_v11 = vsub.f32 %v2634_v35, %v2756_v6  ;;  %v1568_v12 = vsub.f32 %v2640_v24, %v2756_v6 }
 0x230   : > { %v1569_v13 = vsub.f32 %v2644_v36, %v2756_v6  ;;  %v1570_v15 = vsub.f32 %v2646_v40, %v2756_v6  ;;  %v1571_v16 = vsub.f32 %v2650_v43, %v2756_v6  ;;  %v1572_v14 = vsub.f32 %v2656_v49, %v2756_v6 }
 0x231   : > { %v1573_v17 = vsub.f32 %v2660_v60, %v2756_v6  ;;  %v1574_v35 = vsub.f32 %v2662_v1, %v2756_v6  ;;  %v1575_v24 = vsub.f32 %v2666_v4, %v2756_v6  ;;  %v1576_v36 = vsub.f32 %v2672_v10, %v2756_v6 }
 0x232   : > { %v1577_v40 = vsub.f32 %v2676_v22, %v2756_v6  ;;  %v1578_v43 = vsub.f32 %v2678_v27, %v2756_v6  ;;  %v1579_v49 = vsub.f32 %v2682_v30, %v2756_v6  ;;  %v1580_v60 = vsub.f32 %v2688_v38, %v2756_v6 }
 0x233   : > { %v1581_v1 = vsub.f32 %v2692_v52, %v2756_v6  ;;  %v1582_v4 = vsub.f32 %v2694_v56, %v2756_v6  ;;  %v1583_v10 = vsub.f32 %v2698_v59, %v2756_v6  ;;  %v1584_v22 = vsub.f32 %v2704_v5, %v2756_v6 }
 0x234   : > { %v1585_v27 = vsub.f32 %v2708_v18, %v2756_v6  ;;  %v1586_v30 = vsub.f32 %v2710_v23, %v2756_v6  ;;  %v1587_v38 = vsub.f32 %v2714_v28, %v2756_v6  ;;  %v1588_v52 = vsub.f32 %v2720_v37, %v2756_v6 }
 0x235   : > { %v1589_v56 = vsub.f32 %v2724_v53, %v2756_v6  ;;  %v1590_v59 = vsub.f32 %v2726_v58, %v2756_v6  ;;  %v1591_v5 = vsub.f32 %v2730_v63, %v2756_v6  ;;  %v1592_v18 = vsub.f32 %v2736_v9, %v2756_v6 }
 0x236   : > { %v1593_v23 = vsub.f32 %v2740_v26, %v2756_v6  ;;  %v1594_v28 = vsub.f32 %v2742_v34, %v2756_v6  ;;  %v1595_v37 = vsub.f32 %v2744_v39, %v2756_v6  ;;  %v1596_v53 = vsub.f32 %v2750_v46, %v2756_v6 }
 0x237   : > { %v2044_v58 = vpack.c.bf16 %v1566_v0, %v1565_v8  ;;  %v2045_v19 = vpack.c.bf16 %v1568_v12, %v1567_v11  ;;  %v2046_v20 = vpack.c.bf16 %v1570_v15, %v1569_v13  ;;  %v2047_v63 = vpack.c.bf16 %v1572_v14, %v1571_v16 }
 0x238   : > { %v2048_v21 = vpack.c.bf16 %v1574_v35, %v1573_v17  ;;  %v2049_v25 = vpack.c.bf16 %v1576_v36, %v1575_v24  ;;  %v2050_v9 = vpack.c.bf16 %v1578_v43, %v1577_v40  ;;  %v2051_v29 = vpack.c.bf16 %v1580_v60, %v1579_v49 }
 0x239   : > { %v1669_v26 = vrot.slane %v2044_v58, %v2758_v7  ;;  %v1676_v31 = vrot.slane %v2045_v19, %v2758_v7  ;;  %v1686_v32 = vrot.slane %v2046_v20, %v2758_v7  ;;  %v1693_v33 = vrot.slane %v2047_v63, %v2758_v7 }
 0x23a   : > { %v1703_v34 = vrot.slane %v2048_v21, %v2758_v7  ;;  %v1710_v39 = vrot.slane %v2049_v25, %v2758_v7  ;;  %v1720_v41 = vrot.slane %v2050_v9, %v2758_v7  ;;  %v1727_v42 = vrot.slane %v2051_v29, %v2758_v7 }
 0x23b   : > { %v1677_v44 = vcombine.low %v1669_v26, %v1676_v31  ;;  %v1694_v45 = vcombine.low %v1686_v32, %v1693_v33  ;;  %v2052_v46 = vpack.c.bf16 %v1582_v4, %v1581_v1  ;;  %v2053_v47 = vpack.c.bf16 %v1584_v22, %v1583_v10 }
 0x23c   : > { %v1711_v48 = vcombine.low %v1703_v34, %v1710_v39  ;;  %v1728_v50 = vcombine.low %v1720_v41, %v1727_v42  ;;  %v2054_v51 = vpack.c.bf16 %v1586_v30, %v1585_v27  ;;  %v2055_v54 = vpack.c.bf16 %v1588_v52, %v1587_v38 }
 0x23d   : > { %v1737_v55 = vrot.slane %v2052_v46, %v2758_v7  ;;  %v1744_v57 = vrot.slane %v2053_v47, %v2758_v7  ;;  %v2056_v61 = vpack.c.bf16 %v1590_v59, %v1589_v56  ;;  %v2057_v62 = vpack.c.bf16 %v1592_v18, %v1591_v5  ;;  %1805 = vst [vmem:[%s195_s20] sm:$0xff] %v1677_v44 }
 0x23e   : > { %1806 = vst [vmem:[%s195_s20 + $0x8] sm:$0xff] %v1694_v45  ;;  %v1754_v2 = vrot.slane %v2054_v51, %v2758_v7  ;;  %v1761_v3 = vrot.slane %v2055_v54, %v2758_v7  ;;  %v2058_v6 = vpack.c.bf16 %v1594_v28, %v1593_v23  ;;  %v2059_v8 = vpack.c.bf16 %v1596_v53, %v1595_v37 }
 0x23f   : > { %1807 = vst [vmem:[%s195_s20 + $0x10] sm:$0xff] %v1711_v48  ;;  %1808 = vst [vmem:[%s195_s20 + $0x18] sm:$0xff] %v1728_v50  ;;  %v1745_v0 = vcombine.low %v1737_v55, %v1744_v57  ;;  %v1771_v11 = vrot.slane %v2056_v61, %v2758_v7  ;;  %v1778_v12 = vrot.slane %v2057_v62, %v2758_v7 }
 0x240   : > { %v1762_v13 = vcombine.low %v1754_v2, %v1761_v3  ;;  %v1788_v15 = vrot.slane %v2058_v6, %v2758_v7  ;;  %v1795_v16 = vrot.slane %v2059_v8, %v2758_v7 }
 0x241   : > { %v1779_v14 = vcombine.low %v1771_v11, %v1778_v12  ;;  %1809 = vst [vmem:[%s195_s20 + $0x20] sm:$0xff] %v1745_v0 }
 0x242   : > { %v1796_v17 = vcombine.low %v1788_v15, %v1795_v16  ;;  %1810 = vst [vmem:[%s195_s20 + $0x28] sm:$0xff] %v1762_v13 }
 0x243   : > { %1811 = vst [vmem:[%s195_s20 + $0x30] sm:$0xff] %v1779_v14 }
 0x244   : > { %1812 = vst [vmem:[%s195_s20 + $0x38] sm:$0xff] %v1796_v17 }
 0x245   : > { %2217 = shalt.err (!%p2214_p7)
}
 0x246   : > { %s2218_s6 = scalar_lea.hbm %s2845_s29, 1024  ;;  %s2222_s19 = scalar_lea.hbm %s2896_s2, 2048 }
 0x247   : > { %p2219_p13 = scmp.ne.s32.totalorder %s2845_s29, %s2218_s6  ;;  %p2223_p12 = scmp.lt.u32.totalorder %s2845_s29, %s2896_s2 }
 0x248   : > { %p2224_p4 = scmp.lt.u32.totalorder %s2222_s19, %s2218_s6  ;;  %p2226_p5 = scmp.lt.u32.totalorder %s2218_s6, %s2845_s29 }
 0x249   : > { %p2220_p2 = pnand %p2219_p13, %p2917_p10 }
 0x24a   : > { %p2225_p8 = por %p2224_p4, %p2223_p12 }
 0x24b   : > { %p2221_p6 = pneg %p2220_p2 }
 0x24c   : > { %p2227_p11 = por %p2226_p5, %p2225_p8 }
 0x24e   : > { %p2228_p1 = pnand %p2227_p11, %p2221_p6 }
 0x250   : > { %2231 = shalt.err (!%p2228_p1)
}
 0x251   : > { %2075 = dma.vmem_to_hbm [thread:$0]  (%p2917_p10), %s2847_s26, 1024, %s2845_s29, %s1814_s12  }
 0x252 PF: > { %s1842_s4 = sand.u32 1, %s2270_s9   ;;  %p2918_p0 = scmp.ne.s32.totalorder %s2907_s22, 0 }
 0x253   : > { %p2919_p9 = scmp.ge.s32.totalorder %s2290_s14, 2  ;;  %s1843_s18 = scalar_lea.sflag [#allocation4], %s1842_s4 }
 0x255   : > { %p2086_p3 = pnand %p2919_p9, %p2918_p0 }
 0x257   : > { %2265 = dma.done.wait (!%p2086_p3), %s1843_s18, 1024  }
 0x258   : > { %2267 = vsyncadd (!%p2086_p3), %s1843_s18, 4294966272  ;;  %s19_s14 = sadd.s32 1, %s2290_s14   ;;  %s2920_s9 = smov %s2274_s10 }
 0x259   : > { %p16_p7 = scmp.ge.s32.totalorder %s19_s14, 4   ;;  %s2921_s10 = smov %s2278_s11 }
 0x25a   : > { %s2922_s11 = smov %s2433_s25  ;;  %s2923_s12 = smov %s2286_s13 }
 0x25b   : > { %s2924_s13 = smov %s2926_s28  ;;  %18 = sbr.rel (!%p16_p7) target bundleno = 7 (0x7), region = 78 }
 0x262   :  { %1848 = vsyncpa [#allocation3], 1 }
 0x263   :  { %1850 = vsyncpa [#allocation3 + $0x1], 1 }
 0x264   :  { %1851 = vsyncpa [#allocation6], 1 }
 0x265   :  { %1852 = vsyncpa [#allocation4], 1 }
 0x266   :  { %1854 = vsyncpa [#allocation4 + $0x1], 1 }

// kernel: gnet_forward.7
= control target key start
LH: loop header
LB: loop body
LE: loop exit
PB: predicated region body
PF: predicated region fallthrough
CT: control target
= control target key end

     0   :  { %7 = vsyncpa [#allocation3], 0  ;;  %s1306_s0 = inlined_call_operand.hbm [shape: bf16[2,64,1024], index: 0, kind: input, shape index: {}]   ;;  %s1307_s1 = inlined_call_operand.hbm [shape: bf16[8,64], index: 1, kind: input, shape index: {}]   ;;  %s1308_s2 = inlined_call_operand.hbm [shape: bf16[2,8,1024], index: 2, kind: output, shape index: {}]  }
   0x1   :  { %9 = vsyncpa [#allocation3 + $0x1], 0 }
   0x2   :  { %10 = vsyncpa [#allocation6], 0 }
   0x3   :  { %11 = vsyncpa [#allocation4], 0 }
   0x4   :  { %13 = vsyncpa [#allocation4 + $0x1], 0  ;;  %s1044_s9 = smov 0   ;;  %s1046_s10 = smov 0  }
   0x5   :  { %s1048_s11 = smov 0   ;;  %s1050_s12 = smov 0  }
   0x6   :  { %s1052_s13 = smov 0   ;;  %s1054_s14 = smov 0  }
   0x7 LB: > { %s738_s15 = sadd.s32 4294967295, %s1021_s14   ;;  %s739_s16 = sadd.s32 4294967294, %s1021_s14   ;;  %s1021_s14 = sphi %s1054_s14, %s19_s14   ;;  %s1017_s13 = sphi %s1052_s13, %s1336_s13   ;;  %s1013_s12 = sphi %s1050_s12, %s1335_s12   ;;  %s1009_s11 = sphi %s1048_s11, %s1334_s11   ;;  %s1005_s10 = sphi %s1046_s10, %s1333_s10   ;;  %s1001_s9 = sphi %s1044_s9, %s1332_s9  }
   0x8   : > { %s38_s17 = sadd.s32 1, %s1009_s11  ;;  %p45_p0 = scmp.ne.s32.totalorder %s1009_s11, %s1005_s10 }
   0x9   : > { %p46_p1 = scmp.eq.s32.totalorder %s1021_s14, 0  ;;  %p51_p2 = scmp.ne.s32.totalorder %s1005_s10, %s1001_s9 }
   0xa   : > { %p1082_p3 = scmp.eq.s32.totalorder %s738_s15, 0  ;;  %p103_p4 = scmp.eq.s32.totalorder %s738_s15, 1 }
   0xb   : > { %p1086_p5 = por %p46_p1, %p45_p0  ;;  %p109_p6 = scmp.eq.s32.totalorder %s739_s16, 1 }
   0xc   : > { %s1315_s18 = scalar_select %p1082_p3, 1, 0 }
   0xd   : > { %p1092_p7 = por %p1082_p3, %p51_p2  ;;  %p1096_p8 = por %p103_p4, %p45_p0 }
   0xe   : > { %p1100_p9 = por %p109_p6, %p51_p2  ;;  %p740_p10 = scmp.ge.s32.totalorder %s1021_s14, 1 }
   0xf   : > { %s1317_s20 = scalar_select %p1092_p7, 1, 0 }
  0x10   : > { %s1318_s21 = scalar_select %p1096_p8, 1, 0 }
  0x11   : > { %s1319_s22 = scalar_select %p1100_p9, 1, 0 }
  0x12   : > { %p116_p11 = scmp.lt.s32.totalorder %s1021_s14, 3  ;;  %s1023_s24 = smov [#allocation5]  }
  0x13   : > { %s131_s25 = sshll.u32 %s1023_s24, 4  ;;  %p822_p1 = scmp.lt.s32.totalorder %s1021_s14, 2  ;;  %s132_s25 = int_to_ptr.vmem [resolvable:$true] %s131_s25 }
  0x14   : > { %p1107_p13 = pnand %p740_p10, %p116_p11  ;;  %s31_s28 = sadd.s32 1, %s1017_s13 }
  0x15   : > { %p1116_p4 = pnand %p822_p1, %p1086_p5  ;;  %p1127_p6 = scmp.ge.s32.totalorder %s31_s28, 2 }
  0x16   : > { %s1320_s23 = scalar_select %p1107_p13, 1, 0 }
  0x17   : > { %p809_p0 = pneg %p1107_p13  ;;  %s142_s30 = sand.u32 1, %s1009_s11  }
  0x18   : > { %s1321_s26 = scalar_select %p1116_p4, 1, 0 }
  0x19   : > { %p1122_p2 = pnand %p809_p0, %p1082_p3  ;;  %s877_s5 = scalar_lea.hbm %s1307_s1, 64 }
  0x1a   : > { %s1323_s29 = scalar_select %p1127_p6, 1, 0 }
  0x1b   : > { %p878_p5 = scmp.ne.s32.totalorder %s1307_s1, %s877_s5  ;;  %p879_p10 = pneg %p1122_p2 }
  0x1c   : > { %p884_p0 = scmp.lt.u32.totalorder %s877_s5, %s1307_s1 }
  0x1d   : > { %p880_p11 = pnand %p879_p10, %p878_p5 }
  0x1f   : > { %p881_p1 = pneg %p880_p11 }
  0x21   : > { %p886_p12 = pnand %p884_p0, %p881_p1 }
  0x23   : > { %889 = shalt.err (!%p886_p12)
}
  0x24   : > { %s890_s16 = scalar_lea.vmem %s132_s25, 64  ;;  %p898_p7 = scmp.lt.s32.totalorder %s132_s25, %s132_s25 }
  0x25   : > { %p891_p9 = scmp.ne.s32.totalorder %s132_s25, %s890_s16  ;;  %p899_p13 = scmp.lt.s32.totalorder %s890_s16, %s890_s16 }
  0x27   : > { %p893_p8 = pnand %p891_p9, %p879_p10  ;;  %p900_p4 = por %p899_p13, %p898_p7 }
  0x29   : > { %p894_p3 = pneg %p893_p8 }
  0x2b   : > { %p901_p6 = pnand %p900_p4, %p894_p3 }
  0x2d   : > { %904 = shalt.err (!%p901_p6)
}
  0x2e   : > { %812 = dma.hbm_to_vmem [thread:$0]  (!%p1122_p2), %s1307_s1, 64, %s132_s25, [#allocation6]  }
  0x2f   : > { %p1324_p9 = scmp.ne.s32.totalorder %s1323_s29, 0  ;;  %s743_s3 = sshll.u32 %s142_s30, 8 }
  0x30   : > { %s795_s5 = sshll.u32 %s1017_s13, 12  ;;  %s146_s8 = scalar_lea.vmem [#allocation2], %s743_s3 }
  0x31   : > { %s1338_s28 = smov (%p1324_p9, %s31_s28), 0  ;;  %s1158_s7 = scalar_lea.hbm %s1306_s0, %s795_s5 }
  0x32   : > { %s35_s4 = ssub.s32 %s1017_s13, %s1338_s28  ;;  %s153_s15 = sshll.u32 %s146_s8, 4  ;;  %s1165_s15 = int_to_ptr.vmem [resolvable:$true] %s153_s15 }
  0x33   : > { %p36_p3 = scmp.eq.s32.totalorder %s35_s4, 0  ;;  %s1167_s29 = scalar_lea.sflag [#allocation3], %s142_s30 }
  0x34   : > { %s905_s16 = scalar_lea.hbm %s1158_s7, 4096  ;;  %p1325_p8 = scmp.ne.s32.totalorder %s1321_s26, 0 }
  0x35   : > { %s1163_s25 = scalar_select %p36_p3, %s1009_s11, %s38_s17  }
  0x36   : > { %p906_p7 = scmp.ne.s32.totalorder %s1158_s7, %s905_s16  ;;  %p907_p12 = pneg %p1325_p8 }
  0x37   : > { %s910_s3 = scalar_lea.hbm %s1306_s0, 8192  ;;  %p911_p2 = scmp.lt.u32.totalorder %s1158_s7, %s1306_s0 }
  0x38   : > { %p908_p13 = pnand %p907_p12, %p906_p7  ;;  %p912_p6 = scmp.lt.u32.totalorder %s910_s3, %s905_s16 }
  0x39   : > { %p914_p10 = scmp.lt.u32.totalorder %s905_s16, %s1158_s7 }
  0x3a   : > { %p909_p4 = pneg %p908_p13  ;;  %p913_p5 = por %p912_p6, %p911_p2 }
  0x3c   : > { %p915_p11 = por %p914_p10, %p913_p5 }
  0x3e   : > { %p916_p1 = pnand %p915_p11, %p909_p4 }
  0x40   : > { %919 = shalt.err (!%p916_p1)
}
  0x41   : > { %s920_s17 = scalar_lea.vmem %s1165_s15, 4096  ;;  %s1024_s30 = smov [#allocation2]  }
  0x42   : > { %p921_p0 = scmp.ne.s32.totalorder %s1165_s15, %s920_s17  ;;  %s925_s27 = sshll.u32 %s1024_s30, 4  ;;  %s926_s27 = int_to_ptr.vmem [resolvable:$false] %s925_s27 }
  0x43   : > { %s927_s6 = scalar_lea.vmem %s926_s27, 8192  ;;  %p928_p7 = scmp.lt.s32.totalorder %s1165_s15, %s926_s27 }
  0x44   : > { %p923_p9 = pnand %p921_p0, %p907_p12  ;;  %p929_p13 = scmp.lt.s32.totalorder %s927_s6, %s920_s17 }
  0x46   : > { %p924_p3 = pneg %p923_p9  ;;  %p930_p2 = por %p929_p13, %p928_p7 }
  0x48   : > { %p931_p6 = pnand %p930_p2, %p924_p3 }
  0x4a   : > { %934 = shalt.err (!%p931_p6)
}
  0x4b   : > { %s1025_s8 = smov 512   ;;  %s1026_s16 = smov 32  }
  0x4c   : > { %816 = dma.hbm_to_vmem [thread:$0]  (!%p1325_p8), %s1158_s7, 4096, %s1165_s15, %s1167_s29, %s1025_s8, %s1025_s8, %s1026_s16  }
  0x4d   : > { %p1326_p12 = scmp.ne.s32.totalorder %s1320_s23, 0 }
  0x4e   : > { %s1198_s19 = sand.u32 (!%p1326_p12), 1, %s1005_s10   ;;  %p1327_p4 = scmp.ne.s32.totalorder (!%p1326_p12), %s1317_s20, 0 }
  0x4f   : > { %165 = sbr.rel (%p1326_p12) target bundleno = 513 (0x201), region = 28  ;;  %s747_s24 = sshll.u32 (!%p1326_p12), %s1198_s19, 8 }
  0x50   : > { %s168_s3 = scalar_lea.sflag (!%p1326_p12), [#allocation3], %s1198_s19  ;;  %s1202_s4 = scalar_lea.vmem (!%p1326_p12), [#allocation2], %s747_s24 }
  0x56   : > { %988 = dma.done.wait (%p1327_p4), %s168_s3, 4096  }
  0x57   : > { %990 = vsyncadd (%p1327_p4), %s168_s3, 4294963200  ;;  %p1328_p8 = scmp.ne.s32.totalorder %s1315_s18, 0 }
  0x59   : > { %992 = dma.done.wait (%p1328_p8), [#allocation6], 64  }
  0x5a   : > { %994 = vsyncadd (%p1328_p8), [#allocation6], 4294967232  ;;  %v1027_v0 = vmov 0   ;;  %v198_v1 = vld [vmem:[%s1202_s4] sm:$0xff]  ;;  %v199_v3 = vld [vmem:[%s1202_s4 + $0x8] sm:$0xff]  ;;  %vm390_vm0 = vcmask 523264  }
  0x5b   : > { %426 = vmatprep.mubr.bf16.mxu0 %v1027_v0  ;;  %467 = vmatprep.mubr.bf16.mxu1 %v1027_v0  ;;  %v202_v2 = vld [vmem:[%s1202_s4 + $0x20] sm:$0xff]  ;;  %v203_v6 = vld [vmem:[%s1202_s4 + $0x28] sm:$0xff]  ;;  %v200_v31 = vld [vmem:[%s1202_s4 + $0x10] sm:$0xff]  ;;  %s749_s18 = sshll.u32 %s1198_s19, 5  ;;  %s800_s20 = sshll.u32 %s1013_s12, 9 }
  0x5c   : > { %v751_v4 = vcombine.high %v198_v1, %v202_v2  ;;  %v750_v5 = vcombine.low %v198_v1, %v202_v2  ;;  %v206_v7 = vld [vmem:[%s1202_s4 + $0x40] sm:$0xff]  ;;  %v753_v9 = vcombine.high %v199_v3, %v203_v6  ;;  %v752_v10 = vcombine.low %v199_v3, %v203_v6  ;;  %v207_v12 = vld [vmem:[%s1202_s4 + $0x48] sm:$0xff]  ;;  %v204_v32 = vld [vmem:[%s1202_s4 + $0x30] sm:$0xff]  ;;  %s195_s23 = scalar_lea.vmem [#allocation7], %s749_s18  ;;  %s1257_s29 = scalar_lea.hbm %s1308_s2, %s800_s20 }
  0x5d   : > { %v210_v8 = vld [vmem:[%s1202_s4 + $0x60] sm:$0xff]  ;;  %v211_v13 = vld [vmem:[%s1202_s4 + $0x68] sm:$0xff]  ;;  %v201_v33 = vld [vmem:[%s1202_s4 + $0x18] sm:$0xff]  ;;  %v755_v37 = vcombine.high %v200_v31, %v204_v32  ;;  %v754_v44 = vcombine.low %v200_v31, %v204_v32  ;;  %s645_s26 = sshll.u32 %s195_s23, 4  ;;  %s629_s12 = scalar_lea.sflag [#allocation4], %s1198_s19  ;;  %s1259_s26 = int_to_ptr.vmem [resolvable:$true] %s645_s26 }
  0x5e   : > { %v759_v11 = vcombine.high %v206_v7, %v210_v8  ;;  %v214_v14 = vld [vmem:[%s1202_s4 + $0x80] sm:$0xff]  ;;  %394 = vmatprep.subr.bf16.mxu0 %v751_v4  ;;  %v761_v15 = vcombine.high %v207_v12, %v211_v13  ;;  %v215_v17 = vld [vmem:[%s1202_s4 + $0x88] sm:$0xff]  ;;  %435 = vmatprep.subr.bf16.mxu1 %v753_v9  ;;  %v758_v19 = vcombine.low %v206_v7, %v210_v8  ;;  %v205_v34 = vld [vmem:[%s1202_s4 + $0x38] sm:$0xff]  ;;  %s935_s5 = scalar_lea.vmem %s1259_s26, 512  ;;  %p1329_p10 = scmp.ne.s32.totalorder %s1318_s21, 0 }
  0x5f   : > { %v218_v16 = vld [vmem:[%s1202_s4 + $0xa0] sm:$0xff]  ;;  %v219_v18 = vld [vmem:[%s1202_s4 + $0xa8] sm:$0xff]  ;;  %395 = vmatpush1.bf16.msra.mxu0 %v750_v5  ;;  %436 = vmatpush1.bf16.msra.mxu1 %v752_v10  ;;  %v760_v20 = vcombine.low %v207_v12, %v211_v13  ;;  %v757_v38 = vcombine.high %v201_v33, %v205_v34  ;;  %v208_v39 = vld [vmem:[%s1202_s4 + $0x50] sm:$0xff]  ;;  %v756_v45 = vcombine.low %v201_v33, %v205_v34  ;;  %p936_p5 = scmp.ne.s32.totalorder %s1259_s26, %s935_s5  ;;  %s1028_s17 = smov [#allocation7]  }
  0x60   : > { %396 = vmatprep.subr.bf16.mxu0 %v759_v11  ;;  %v767_v21 = vcombine.high %v214_v14, %v218_v16  ;;  %437 = vmatprep.subr.bf16.mxu1 %v761_v15  ;;  %v769_v22 = vcombine.high %v215_v17, %v219_v18  ;;  %v222_v23 = vld [vmem:[%s1202_s4 + $0xc0] sm:$0xff]  ;;  %v223_v25 = vld [vmem:[%s1202_s4 + $0xc8] sm:$0xff]  ;;  %v766_v27 = vcombine.low %v214_v14, %v218_v16  ;;  %v212_v40 = vld [vmem:[%s1202_s4 + $0x70] sm:$0xff]  ;;  %s939_s30 = sshll.u32 %s1028_s17, 4  ;;  %s940_s30 = int_to_ptr.vmem [resolvable:$false] %s939_s30 }
  0x61   : > { %v226_v24 = vld [vmem:[%s1202_s4 + $0xe0] sm:$0xff]  ;;  %v227_v26 = vld [vmem:[%s1202_s4 + $0xe8] sm:$0xff]  ;;  %v768_v28 = vcombine.low %v215_v17, %v219_v18  ;;  %v209_v41 = vld [vmem:[%s1202_s4 + $0x58] sm:$0xff]  ;;  %v763_v46 = vcombine.high %v208_v39, %v212_v40  ;;  %v762_v52 = vcombine.low %v208_v39, %v212_v40  ;;  %p937_p11 = pnand %p936_p5, %p1329_p10  ;;  %s941_s27 = scalar_lea.vmem %s940_s30, 1024 }
  0x62   : > { %v775_v29 = vcombine.high %v222_v23, %v226_v24  ;;  %v777_v30 = vcombine.high %v223_v25, %v227_v26  ;;  %v774_v35 = vcombine.low %v222_v23, %v226_v24  ;;  %v776_v36 = vcombine.low %v223_v25, %v227_v26  ;;  %v213_v42 = vld [vmem:[%s1202_s4 + $0x78] sm:$0xff]  ;;  %v197_v43 = vld [vmem:[#allocation5] sm:$0xf]  ;;  %v216_v48 = vld [vmem:[%s1202_s4 + $0x90] sm:$0xff]  ;;  %p942_p0 = scmp.lt.s32.totalorder %s1259_s26, %s940_s30  ;;  %p943_p9 = scmp.lt.s32.totalorder %s941_s27, %s935_s5 }
  0x63   : > { %397 = vmatpush1.bf16.msra.mxu0 %v758_v19  ;;  %438 = vmatpush1.bf16.msra.mxu1 %v760_v20  ;;  %v765_v47 = vcombine.high %v209_v41, %v213_v42  ;;  %v220_v49 = vld [vmem:[%s1202_s4 + $0xb0] sm:$0xff]  ;;  %v217_v50 = vld [vmem:[%s1202_s4 + $0x98] sm:$0xff]  ;;  %v764_v53 = vcombine.low %v209_v41, %v213_v42  ;;  %p938_p1 = pneg %p937_p11 }
  0x64   : > { %398 = vmatprep.subr.bf16.mxu0 %v767_v21  ;;  %439 = vmatprep.subr.bf16.mxu1 %v769_v22  ;;  %v221_v51 = vld [vmem:[%s1202_s4 + $0xb8] sm:$0xff]  ;;  %v771_v54 = vcombine.high %v216_v48, %v220_v49  ;;  %v224_v56 = vld [vmem:[%s1202_s4 + $0xd0] sm:$0xff]  ;;  %v770_v60 = vcombine.low %v216_v48, %v220_v49  ;;  %p944_p3 = por %p943_p9, %p942_p0 }
  0x65   : > { %v773_v55 = vcombine.high %v217_v50, %v221_v51  ;;  %v228_v57 = vld [vmem:[%s1202_s4 + $0xf0] sm:$0xff]  ;;  %v225_v58 = vld [vmem:[%s1202_s4 + $0xd8] sm:$0xff]  ;;  %v772_v61 = vcombine.low %v217_v50, %v221_v51 }
  0x66   : > { %v229_v59 = vld [vmem:[%s1202_s4 + $0xf8] sm:$0xff]  ;;  %v779_v62 = vcombine.high %v224_v56, %v228_v57  ;;  %v778_v1 = vcombine.low %v224_v56, %v228_v57  ;;  %p945_p7 = pnand %p944_p3, %p938_p1 }
  0x67   : > { %399 = vmatpush1.bf16.msra.mxu0 %v766_v27  ;;  %440 = vmatpush1.bf16.msra.mxu1 %v768_v28  ;;  %v781_v63 = vcombine.high %v225_v58, %v229_v59  ;;  %v780_v2 = vcombine.low %v225_v58, %v229_v59 }
  0x68   : > { %400 = vmatprep.subr.bf16.mxu0 %v775_v29  ;;  %441 = vmatprep.subr.bf16.mxu1 %v777_v30 }
  0x6b   : > { %401 = vmatpush1.bf16.msra.mxu0 %v774_v35  ;;  %442 = vmatpush1.bf16.msra.mxu1 %v776_v36 }
  0x6c   : > { %476 = vmatprep.subr.bf16.mxu0 %v755_v37  ;;  %517 = vmatprep.subr.bf16.mxu1 %v757_v38 }
  0x6e   : > { %782 = vmatmul.mubr.msk.bf16.vlgmr.msra.gmra.mrb[0].mxu0 %vm390_vm0, %v197_v43  ;;  %783 = vmatmul.mubr.msk.bf16.vlgmr.msra.gmra.mrb[0].mxu1 %vm390_vm0, %v197_v43 }
  0x6f   : > { %477 = vmatpush1.bf16.msra.mxu0 %v754_v44  ;;  %518 = vmatpush1.bf16.msra.mxu1 %v756_v45 }
  0x70   : > { %478 = vmatprep.subr.bf16.mxu0 %v763_v46  ;;  %519 = vmatprep.subr.bf16.mxu1 %v765_v47 }
  0x71   : > { %508 = vmatprep.mubr.bf16.mxu0 %v1027_v0  ;;  %549 = vmatprep.mubr.bf16.mxu1 %v1027_v0 }
  0x73   : > { %479 = vmatpush1.bf16.msra.mxu0 %v762_v52  ;;  %520 = vmatpush1.bf16.msra.mxu1 %v764_v53 }
  0x74   : > { %480 = vmatprep.subr.bf16.mxu0 %v771_v54  ;;  %521 = vmatprep.subr.bf16.mxu1 %v773_v55 }
  0x77   : > { %481 = vmatpush1.bf16.msra.mxu0 %v770_v60  ;;  %522 = vmatpush1.bf16.msra.mxu1 %v772_v61 }
  0x78   : > { %482 = vmatprep.subr.bf16.mxu0 %v779_v62  ;;  %523 = vmatprep.subr.bf16.mxu1 %v781_v63 }
  0x7b   : > { %483 = vmatpush1.bf16.msra.mxu0 %v778_v1  ;;  %524 = vmatpush1.bf16.msra.mxu1 %v780_v2 }
  0x7e   : > { %784 = vmatmul.mubr.msk.bf16.vlgmr.msra.gmra.mrb[4].mxu0 %vm390_vm0, %v197_v43  ;;  %785 = vmatmul.mubr.msk.bf16.vlgmr.msra.gmra.mrb[4].mxu1 %vm390_vm0, %v197_v43 }
 0x141   : > { %v428_v0 = vpop.f32.mrb[0].mxu0  ;;  %v469_v4 = vpop.f32.mrb[0].mxu1 }
 0x142   : > { %v430_v3 = vpop.f32.mrb[1].mxu0  ;;  %v471_v6 = vpop.f32.mrb[1].mxu1  ;;  %v558_v7 = vmax.f32 %v428_v0, 0.0  ;;  %v560_v14 = vmax.f32 %v469_v4, 0.0 }
 0x143   : > { %v432_v5 = vpop.f32.mrb[2].mxu0  ;;  %v559_v8 = vmax.f32 %v430_v3, 0.0  ;;  %v473_v10 = vpop.f32.mrb[2].mxu1  ;;  %v561_v17 = vmax.f32 %v471_v6, 0.0 }
 0x144   : > { %v433_v9 = vpop.f32.mrb[3].mxu0  ;;  %v474_v11 = vpop.f32.mrb[3].mxu1  ;;  %v566_v12 = vmin.f32 %v558_v7, 6.0  ;;  %v568_v16 = vmin.f32 %v560_v14, 6.0 }
 0x145   : > { %v567_v13 = vmin.f32 %v559_v8, 6.0  ;;  %v569_v19 = vmin.f32 %v561_v17, 6.0 }
 0x147   : > { %v574_v15 = vadd.f32 %v567_v13, %v566_v12 }
 0x149   : > { %v575_v18 = vadd.f32 %v574_v15, %v568_v16 }
 0x14b   : > { %v576_v28 = vadd.f32 %v575_v18, %v569_v19 }
 0x151   : > { %v510_v20 = vpop.f32.mrb[4].mxu0  ;;  %v551_v23 = vpop.f32.mrb[4].mxu1 }
 0x152   : > { %v562_v21 = vmax.f32 %v510_v20, 0.0  ;;  %v512_v22 = vpop.f32.mrb[5].mxu0  ;;  %v564_v25 = vmax.f32 %v551_v23, 0.0  ;;  %v553_v27 = vpop.f32.mrb[5].mxu1 }
 0x153   : > { %v563_v24 = vmax.f32 %v512_v22, 0.0  ;;  %v514_v26 = vpop.f32.mrb[6].mxu0  ;;  %v555_v31 = vpop.f32.mrb[6].mxu1  ;;  %v565_v36 = vmax.f32 %v553_v27, 0.0 }
 0x154   : > { %v570_v29 = vmin.f32 %v562_v21, 6.0  ;;  %v515_v30 = vpop.f32.mrb[7].mxu0  ;;  %v556_v33 = vpop.f32.mrb[7].mxu1  ;;  %v572_v35 = vmin.f32 %v564_v25, 6.0 }
 0x155   : > { %v571_v32 = vmin.f32 %v563_v24, 6.0  ;;  %v573_v38 = vmin.f32 %v565_v36, 6.0 }
 0x156   : > { %v577_v34 = vadd.f32 %v576_v28, %v570_v29 }
 0x158   : > { %v578_v37 = vadd.f32 %v577_v34, %v571_v32 }
 0x15a   : > { %v579_v39 = vadd.f32 %v578_v37, %v572_v35 }
 0x15c   : > { %v580_v40 = vadd.f32 %v579_v39, %v573_v38 }
 0x15e   : > { %581 = vadd.xlane.f32.xlu0 %v580_v40 }
 0x1eb   : > { %v582_v41 = vpop.xlane.xlu0 %581 }
 0x1ec   : > { %v583_v42 = vmul.f32 0.0009765625, %v582_v41 }
 0x1ee   : > { %v584_v43 = vsub.f32 %v566_v12, %v583_v42  ;;  %v585_v44 = vsub.f32 %v567_v13, %v583_v42  ;;  %v586_v45 = vsub.f32 %v568_v16, %v583_v42  ;;  %v587_v46 = vsub.f32 %v569_v19, %v583_v42 }
 0x1ef   : > { %v588_v47 = vsub.f32 %v570_v29, %v583_v42  ;;  %v589_v48 = vsub.f32 %v571_v32, %v583_v42  ;;  %v590_v49 = vsub.f32 %v572_v35, %v583_v42  ;;  %v591_v50 = vsub.f32 %v573_v38, %v583_v42 }
 0x1f0   : > { %v796_v51 = vpack.c.bf16 %v585_v44, %v584_v43  ;;  %v797_v52 = vpack.c.bf16 %v587_v46, %v586_v45 }
 0x1f1   : > { %v798_v53 = vpack.c.bf16 %v589_v48, %v588_v47  ;;  %v799_v54 = vpack.c.bf16 %v591_v50, %v590_v49 }
 0x1f2   : > { %624 = vst [vmem:[%s195_s23] sm:$0xff] %v796_v51  ;;  %625 = vst [vmem:[%s195_s23 + $0x8] sm:$0xff] %v797_v52 }
 0x1f3   : > { %626 = vst [vmem:[%s195_s23 + $0x10] sm:$0xff] %v798_v53  ;;  %627 = vst [vmem:[%s195_s23 + $0x18] sm:$0xff] %v799_v54 }
 0x1f4   : > { %948 = shalt.err (!%p945_p7)
}
 0x1f5   : > { %s949_s6 = scalar_lea.hbm %s1257_s29, 512  ;;  %s953_s19 = scalar_lea.hbm %s1308_s2, 1024 }
 0x1f6   : > { %p950_p13 = scmp.ne.s32.totalorder %s1257_s29, %s949_s6  ;;  %p954_p12 = scmp.lt.u32.totalorder %s1257_s29, %s1308_s2 }
 0x1f7   : > { %p955_p4 = scmp.lt.u32.totalorder %s953_s19, %s949_s6  ;;  %p957_p5 = scmp.lt.u32.totalorder %s949_s6, %s1257_s29 }
 0x1f8   : > { %p951_p2 = pnand %p950_p13, %p1329_p10 }
 0x1f9   : > { %p956_p8 = por %p955_p4, %p954_p12 }
 0x1fa   : > { %p952_p6 = pneg %p951_p2 }
 0x1fb   : > { %p958_p11 = por %p957_p5, %p956_p8 }
 0x1fd   : > { %p959_p1 = pnand %p958_p11, %p952_p6 }
 0x1ff   : > { %962 = shalt.err (!%p959_p1)
}
 0x200   : > { %807 = dma.vmem_to_hbm [thread:$0]  (%p1329_p10), %s1259_s26, 512, %s1257_s29, %s629_s12  }
 0x201 PF: > { %s657_s4 = sand.u32 1, %s1001_s9   ;;  %p1330_p0 = scmp.ne.s32.totalorder %s1319_s22, 0 }
 0x202   : > { %p1331_p9 = scmp.ge.s32.totalorder %s1021_s14, 2  ;;  %s658_s18 = scalar_lea.sflag [#allocation4], %s657_s4 }
 0x204   : > { %p818_p3 = pnand %p1331_p9, %p1330_p0 }
 0x206   : > { %996 = dma.done.wait (!%p818_p3), %s658_s18, 512  }
 0x207   : > { %998 = vsyncadd (!%p818_p3), %s658_s18, 4294966784  ;;  %s19_s14 = sadd.s32 1, %s1021_s14   ;;  %s1332_s9 = smov %s1005_s10 }
 0x208   : > { %p16_p7 = scmp.ge.s32.totalorder %s19_s14, 4   ;;  %s1333_s10 = smov %s1009_s11 }
 0x209   : > { %s1334_s11 = smov %s1163_s25  ;;  %s1335_s12 = smov %s1017_s13 }
 0x20a   : > { %s1336_s13 = smov %s1338_s28  ;;  %18 = sbr.rel (!%p16_p7) target bundleno = 7 (0x7), region = 78 }
 0x211   :  { %663 = vsyncpa [#allocation3], 1 }
 0x212   :  { %665 = vsyncpa [#allocation3 + $0x1], 1 }
 0x213   :  { %666 = vsyncpa [#allocation6], 1 }
 0x214   :  { %667 = vsyncpa [#allocation4], 1 }
 0x215   :  { %669 = vsyncpa [#allocation4 + $0x1], 1 }

// kernel: gnet_forward.8
= control target key start
LH: loop header
LB: loop body
LE: loop exit
PB: predicated region body
PF: predicated region fallthrough
CT: control target
= control target key end

     0   :  { %7 = vsyncpa [#allocation3], 0  ;;  %s1050_s0 = inlined_call_operand.hbm [shape: bf16[2,128,256], index: 0, kind: input, shape index: {}]   ;;  %s1051_s1 = inlined_call_operand.hbm [shape: bf16[16,128], index: 1, kind: input, shape index: {}]   ;;  %s1052_s2 = inlined_call_operand.hbm [shape: bf16[2,16,256], index: 2, kind: output, shape index: {}]  }
   0x1   :  { %9 = vsyncpa [#allocation3 + $0x1], 0 }
   0x2   :  { %10 = vsyncpa [#allocation6], 0 }
   0x3   :  { %11 = vsyncpa [#allocation4], 0 }
   0x4   :  { %13 = vsyncpa [#allocation4 + $0x1], 0  ;;  %s812_s9 = smov 0   ;;  %s814_s10 = smov 0  }
   0x5   :  { %s816_s11 = smov 0   ;;  %s818_s12 = smov 0  }
   0x6   :  { %s820_s13 = smov 0   ;;  %s822_s14 = smov 0  }
   0x7 LB: > { %s496_s15 = sadd.s32 4294967295, %s785_s14   ;;  %s497_s16 = sadd.s32 4294967294, %s785_s14   ;;  %s785_s14 = sphi %s822_s14, %s19_s14   ;;  %s781_s13 = sphi %s820_s13, %s1076_s13   ;;  %s777_s12 = sphi %s818_s12, %s1075_s12   ;;  %s773_s11 = sphi %s816_s11, %s1074_s11   ;;  %s769_s10 = sphi %s814_s10, %s1073_s10   ;;  %s765_s9 = sphi %s812_s9, %s1072_s9  }
   0x8   : > { %p51_p0 = scmp.ne.s32.totalorder %s769_s10, %s765_s9  ;;  %p846_p1 = scmp.eq.s32.totalorder %s496_s15, 0 }
   0x9   : > { %p850_p2 = scmp.eq.s32.totalorder %s496_s15, 1  ;;  %p109_p3 = scmp.eq.s32.totalorder %s497_s16, 1 }
   0xa   : > { %s1057_s17 = scalar_select %p846_p1, 1, 0 }
   0xb   : > { %s1058_s18 = scalar_select %p850_p2, 1, 0 }
   0xc   : > { %p856_p4 = por %p846_p1, %p51_p0  ;;  %p498_p5 = scmp.ge.s32.totalorder %s785_s14, 1 }
   0xd   : > { %p861_p6 = por %p109_p3, %p51_p0  ;;  %p116_p7 = scmp.lt.s32.totalorder %s785_s14, 3 }
   0xe   : > { %s1059_s19 = scalar_select %p856_p4, 1, 0 }
   0xf   : > { %s1060_s20 = scalar_select %p861_p6, 1, 0 }
  0x10   : > { %p866_p8 = pnand %p498_p5, %p116_p7  ;;  %s787_s22 = smov [#allocation5]  }
  0x11   : > { %s131_s23 = sshll.u32 %s787_s22, 4  ;;  %s31_s25 = sadd.s32 1, %s781_s13  ;;  %s132_s23 = int_to_ptr.vmem [resolvable:$true] %s131_s23 }
  0x12   : > { %s1061_s21 = scalar_select %p866_p8, 1, 0 }
  0x13   : > { %p544_p9 = pneg %p866_p8  ;;  %s641_s28 = scalar_lea.hbm %s1051_s1, 128 }
  0x14   : > { %p642_p12 = scmp.ne.s32.totalorder %s1051_s1, %s641_s28  ;;  %p648_p5 = scmp.lt.u32.totalorder %s641_s28, %s1051_s1 }
  0x15   : > { %p875_p11 = pnand %p544_p9, %p846_p1 }
  0x17   : > { %p643_p13 = pneg %p875_p11 }
  0x19   : > { %p644_p0 = pnand %p643_p13, %p642_p12 }
  0x1b   : > { %p645_p3 = pneg %p644_p0 }
  0x1d   : > { %p650_p7 = pnand %p648_p5, %p645_p3 }
  0x1f   : > { %653 = shalt.err (!%p650_p7)
}
  0x20   : > { %s654_s5 = scalar_lea.vmem %s132_s23, 128  ;;  %p662_p1 = scmp.lt.s32.totalorder %s132_s23, %s132_s23 }
  0x21   : > { %p655_p9 = scmp.ne.s32.totalorder %s132_s23, %s654_s5  ;;  %p663_p4 = scmp.lt.s32.totalorder %s654_s5, %s654_s5 }
  0x23   : > { %p657_p10 = pnand %p655_p9, %p643_p13  ;;  %p664_p8 = por %p663_p4, %p662_p1 }
  0x25   : > { %p658_p6 = pneg %p657_p10 }
  0x27   : > { %p665_p2 = pnand %p664_p8, %p658_p6 }
  0x29   : > { %668 = shalt.err (!%p665_p2)
}
  0x2a   : > { %s788_s6 = smov 64   ;;  %s789_s7 = smov 4  }
  0x2b   : > { %547 = dma.hbm_to_vmem [thread:$0]  (!%p875_p11), %s1051_s1, 128, %s132_s23, [#allocation6], %s788_s6, %s788_s6, %s789_s7  }
  0x2c   : > { %p33_p1 = scmp.ge.s32.totalorder %s31_s25, 2  ;;  %s38_s16 = sadd.s32 1, %s773_s11 }
  0x2d   : > { %p45_p2 = scmp.ne.s32.totalorder %s773_s11, %s769_s10  ;;  %p46_p4 = scmp.eq.s32.totalorder %s785_s14, 0 }
  0x2e   : > { %s1078_s25 = smov (%p33_p1, %s31_s25), 0  ;;  %p1064_p8 = scmp.ne.s32.totalorder %s1058_s18, 0 }
  0x2f   : > { %p902_p6 = por %p46_p4, %p45_p2  ;;  %s35_s24 = ssub.s32 %s781_s13, %s1078_s25 }
  0x30   : > { %p908_p10 = por %p1064_p8, %p45_p2  ;;  %p557_p12 = scmp.lt.s32.totalorder %s785_s14, 2 }
  0x31   : > { %p36_p11 = scmp.eq.s32.totalorder %s35_s24, 0  ;;  %s145_s23 = sand.u32 1, %s773_s11  }
  0x32   : > { %s501_s27 = sshll.u32 %s145_s23, 7  ;;  %s532_s29 = sshll.u32 %s781_s13, 11 }
  0x33   : > { %s917_s28 = scalar_select %p36_p11, %s773_s11, %s38_s16  }
  0x34   : > { %s923_s4 = scalar_lea.hbm %s1050_s0, %s532_s29  ;;  %s149_s18 = scalar_lea.vmem [#allocation2], %s501_s27 }
  0x35   : > { %s156_s5 = sshll.u32 %s149_s18, 4  ;;  %p929_p13 = pnand %p557_p12, %p902_p6  ;;  %s925_s5 = int_to_ptr.vmem [resolvable:$true] %s156_s5 }
  0x36   : > { %s933_s7 = scalar_lea.sflag [#allocation3], %s145_s23  ;;  %s669_s8 = scalar_lea.hbm %s923_s4, 2048 }
  0x37   : > { %p670_p0 = scmp.ne.s32.totalorder %s923_s4, %s669_s8  ;;  %p671_p3 = pneg %p929_p13 }
  0x38   : > { %s674_s22 = scalar_lea.hbm %s1050_s0, 4096  ;;  %p675_p9 = scmp.lt.u32.totalorder %s923_s4, %s1050_s0 }
  0x39   : > { %p672_p5 = pnand %p671_p3, %p670_p0  ;;  %p676_p1 = scmp.lt.u32.totalorder %s674_s22, %s669_s8 }
  0x3a   : > { %p678_p4 = scmp.lt.u32.totalorder %s669_s8, %s923_s4 }
  0x3b   : > { %p673_p7 = pneg %p672_p5  ;;  %p677_p2 = por %p676_p1, %p675_p9 }
  0x3d   : > { %p679_p6 = por %p678_p4, %p677_p2 }
  0x3f   : > { %p680_p8 = pnand %p679_p6, %p673_p7 }
  0x41   : > { %683 = shalt.err (!%p680_p8)
}
  0x42   : > { %s684_s23 = scalar_lea.vmem %s925_s5, 2048  ;;  %s790_s29 = smov [#allocation2]  }
  0x43   : > { %p685_p12 = scmp.ne.s32.totalorder %s925_s5, %s684_s23  ;;  %s689_s30 = sshll.u32 %s790_s29, 4  ;;  %s690_s30 = int_to_ptr.vmem [resolvable:$false] %s689_s30 }
  0x44   : > { %s691_s3 = scalar_lea.vmem %s690_s30, 4096  ;;  %p692_p5 = scmp.lt.s32.totalorder %s925_s5, %s690_s30 }
  0x45   : > { %p687_p11 = pnand %p685_p12, %p671_p3  ;;  %p693_p9 = scmp.lt.s32.totalorder %s691_s3, %s684_s23 }
  0x47   : > { %p688_p0 = pneg %p687_p11  ;;  %p694_p1 = por %p693_p9, %p692_p5 }
  0x49   : > { %p695_p2 = pnand %p694_p1, %p688_p0 }
  0x4b   : > { %698 = shalt.err (!%p695_p2)
}
  0x4c   : > { %s791_s18 = smov 128   ;;  %s792_s8 = smov 8  }
  0x4d   : > { %551 = dma.hbm_to_vmem [thread:$0]  (!%p929_p13), %s923_s4, 2048, %s925_s5, %s933_s7, %s791_s18, %s791_s18, %s792_s8  }
  0x4e   : > { %p1067_p3 = scmp.ne.s32.totalorder %s1061_s21, 0 }
  0x4f   : > { %s964_s15 = sand.u32 (!%p1067_p3), 1, %s769_s10   ;;  %p1068_p7 = scmp.ne.s32.totalorder (!%p1067_p3), %s1059_s19, 0 }
  0x50   : > { %168 = sbr.rel (%p1067_p3) target bundleno = 510 (0x1fe), region = 28  ;;  %s505_s16 = sshll.u32 (!%p1067_p3), %s964_s15, 7 }
  0x51   : > { %s171_s22 = scalar_lea.sflag (!%p1067_p3), [#allocation3], %s964_s15  ;;  %s968_s24 = scalar_lea.vmem (!%p1067_p3), [#allocation2], %s505_s16 }
  0x57   : > { %752 = dma.done.wait (%p1068_p7), %s171_s22, 2048  }
  0x58   : > { %754 = vsyncadd (%p1068_p7), %s171_s22, 4294965248  ;;  %p1069_p13 = scmp.ne.s32.totalorder %s1057_s17, 0 }
  0x5a   : > { %756 = dma.done.wait (%p1069_p13), [#allocation6], 128  }
  0x5b   : > { %758 = vsyncadd (%p1069_p13), [#allocation6], 4294967168  ;;  %v793_v0 = vmov 0   ;;  %v616_v1 = vld [vmem:[%s968_s24 + $0x4] ss:$8 sps:$4 sm:$0xff]   ;;  %s507_s17 = sshll.u32 %s964_s15, 4 }
  0x5c   : > { %338 = vmatprep.mubr.bf16.mxu0 %v793_v0  ;;  %v618_v2 = vld [vmem:[%s968_s24] ss:$8 sps:$4 sm:$0xff]   ;;  %306 = vmatprep.subr.bf16.mxu0 %v616_v1  ;;  %v619_v3 = vld [vmem:[%s968_s24 + $0x14] ss:$8 sps:$4 sm:$0xff]   ;;  %v621_v4 = vld [vmem:[%s968_s24 + $0x10] ss:$8 sps:$4 sm:$0xff]  }
  0x5d   : > { %307 = vmatpush1.bf16.msra.mxu0 %v618_v2  ;;  %v622_v5 = vld [vmem:[%s968_s24 + $0x24] ss:$8 sps:$4 sm:$0xff]   ;;  %v624_v6 = vld [vmem:[%s968_s24 + $0x20] ss:$8 sps:$4 sm:$0xff]   ;;  %v625_v7 = vld [vmem:[%s968_s24 + $0x34] ss:$8 sps:$4 sm:$0xff]  }
  0x5e   : > { %308 = vmatprep.subr.bf16.mxu0 %v619_v3  ;;  %v627_v8 = vld [vmem:[%s968_s24 + $0x30] ss:$8 sps:$4 sm:$0xff]   ;;  %v628_v9 = vld [vmem:[%s968_s24 + $0x44] ss:$8 sps:$4 sm:$0xff]   ;;  %v630_v10 = vld [vmem:[%s968_s24 + $0x40] ss:$8 sps:$4 sm:$0xff]  }
  0x5f   : > { %v631_v11 = vld [vmem:[%s968_s24 + $0x54] ss:$8 sps:$4 sm:$0xff]   ;;  %v633_v12 = vld [vmem:[%s968_s24 + $0x50] ss:$8 sps:$4 sm:$0xff]   ;;  %v634_v13 = vld [vmem:[%s968_s24 + $0x64] ss:$8 sps:$4 sm:$0xff]  }
  0x60   : > { %v636_v14 = vld [vmem:[%s968_s24 + $0x60] ss:$8 sps:$4 sm:$0xff]   ;;  %v637_v15 = vld [vmem:[%s968_s24 + $0x74] ss:$8 sps:$4 sm:$0xff]   ;;  %v639_v16 = vld [vmem:[%s968_s24 + $0x70] ss:$8 sps:$4 sm:$0xff]  }
  0x61   : > { %309 = vmatpush1.bf16.msra.mxu0 %v621_v4  ;;  %v640_v17 = vld [vmem:[#allocation5] sm:$0xff]   ;;  %s198_s19 = scalar_lea.vmem [#allocation7], %s507_s17  ;;  %s535_s4 = sshll.u32 %s777_s12, 8 }
  0x62   : > { %310 = vmatprep.subr.bf16.mxu0 %v622_v5  ;;  %s400_s21 = sshll.u32 %s198_s19, 4  ;;  %s1001_s7 = scalar_lea.hbm %s1052_s2, %s535_s4  ;;  %s996_s21 = int_to_ptr.vmem [resolvable:$true] %s400_s21 }
  0x63   : > { %s384_s27 = scalar_lea.sflag [#allocation4], %s964_s15  ;;  %s699_s23 = scalar_lea.vmem %s996_s21, 256 }
  0x64   : > { %p700_p4 = scmp.ne.s32.totalorder %s996_s21, %s699_s23  ;;  %s794_s12 = smov [#allocation7]  }
  0x65   : > { %311 = vmatpush1.bf16.msra.mxu0 %v624_v6  ;;  %s703_s29 = sshll.u32 %s794_s12, 4  ;;  %s704_s29 = int_to_ptr.vmem [resolvable:$false] %s703_s29 }
  0x66   : > { %312 = vmatprep.subr.bf16.mxu0 %v625_v7  ;;  %p701_p6 = pnand %p700_p4, %p908_p10  ;;  %s705_s30 = scalar_lea.vmem %s704_s29, 512 }
  0x67   : > { %p706_p12 = scmp.lt.s32.totalorder %s996_s21, %s704_s29  ;;  %p707_p11 = scmp.lt.s32.totalorder %s705_s30, %s699_s23 }
  0x68   : > { %p702_p8 = pneg %p701_p6 }
  0x69   : > { %313 = vmatpush1.bf16.msra.mxu0 %v627_v8  ;;  %p708_p0 = por %p707_p11, %p706_p12 }
  0x6a   : > { %314 = vmatprep.subr.bf16.mxu0 %v628_v9 }
  0x6b   : > { %p709_p5 = pnand %p708_p0, %p702_p8 }
  0x6d   : > { %315 = vmatpush1.bf16.msra.mxu0 %v630_v10 }
  0x6e   : > { %316 = vmatprep.subr.bf16.mxu0 %v631_v11 }
  0x71   : > { %317 = vmatpush1.bf16.msra.mxu0 %v633_v12 }
  0x72   : > { %318 = vmatprep.subr.bf16.mxu0 %v634_v13 }
  0x75   : > { %319 = vmatpush1.bf16.msra.mxu0 %v636_v14 }
  0x76   : > { %320 = vmatprep.subr.bf16.mxu0 %v637_v15 }
  0x79   : > { %321 = vmatpush1.bf16.msra.mxu0 %v639_v16 }
  0x7c   : > { %339 = vmatmul.mubr.bf16.vlgmr.msra.gmra.mrb[0].mxu0 %v640_v17 }
 0x14f   : > { %v340_v18 = vpop.f32.mrb[0].mxu0 }
 0x150   : > { %v349_v19 = vmax.f32 %v340_v18, 0.0  ;;  %v342_v20 = vpop.f32.mrb[1].mxu0 }
 0x151   : > { %v350_v21 = vmax.f32 %v342_v20, 0.0  ;;  %v344_v22 = vpop.f32.mrb[2].mxu0 }
 0x152   : > { %v353_v23 = vmin.f32 %v349_v19, 6.0  ;;  %v351_v24 = vmax.f32 %v344_v22, 0.0  ;;  %v346_v25 = vpop.f32.mrb[3].mxu0 }
 0x153   : > { %v354_v26 = vmin.f32 %v350_v21, 6.0  ;;  %v352_v27 = vmax.f32 %v346_v25, 0.0 }
 0x154   : > { %v355_v28 = vmin.f32 %v351_v24, 6.0 }
 0x155   : > { %v356_v29 = vmin.f32 %v352_v27, 6.0  ;;  %v357_v30 = vadd.f32 %v354_v26, %v353_v23 }
 0x157   : > { %358 = vadd.xlane.f32.xlu0 %v357_v30  ;;  %v360_v31 = vadd.f32 %v356_v29, %v355_v28 }
 0x15b   : > { %361 = vadd.xlane.f32.xlu0 %v360_v31 }
 0x1e4   : > { %v359_v32 = vpop.xlane.xlu0 %358 }
 0x1e5   : > { %v363_v33 = vmul.f32 0.00390625, %v359_v32 }
 0x1e7   : > { %v365_v34 = vsub.f32 %v353_v23, %v363_v33  ;;  %v366_v35 = vsub.f32 %v354_v26, %v363_v33 }
 0x1e8   : > { %v362_v36 = vpop.xlane.xlu0 %361 }
 0x1e9   : > { %v533_v37 = vpack.c.bf16 %v366_v35, %v365_v34  ;;  %v364_v38 = vmul.f32 0.00390625, %v362_v36 }
 0x1eb   : > { %381 = vst [vmem:[%s198_s19] sm:$0xff] %v533_v37  ;;  %v367_v39 = vsub.f32 %v355_v28, %v364_v38  ;;  %v368_v40 = vsub.f32 %v356_v29, %v364_v38 }
 0x1ed   : > { %v534_v41 = vpack.c.bf16 %v368_v40, %v367_v39 }
 0x1ef   : > { %382 = vst [vmem:[%s198_s19 + $0x8] sm:$0xff] %v534_v41 }
 0x1f0   : > { %712 = shalt.err (!%p709_p5)
}
 0x1f1   : > { %s713_s3 = scalar_lea.hbm %s1001_s7, 256  ;;  %s717_s16 = scalar_lea.hbm %s1052_s2, 512 }
 0x1f2   : > { %p714_p9 = scmp.ne.s32.totalorder %s1001_s7, %s713_s3  ;;  %p718_p3 = scmp.lt.u32.totalorder %s1001_s7, %s1052_s2 }
 0x1f3   : > { %p719_p7 = scmp.lt.u32.totalorder %s717_s16, %s713_s3  ;;  %p721_p4 = scmp.lt.u32.totalorder %s713_s3, %s1001_s7 }
 0x1f4   : > { %p715_p1 = pnand %p714_p9, %p908_p10 }
 0x1f5   : > { %p720_p13 = por %p719_p7, %p718_p3 }
 0x1f6   : > { %p716_p2 = pneg %p715_p1 }
 0x1f7   : > { %p722_p6 = por %p721_p4, %p720_p13 }
 0x1f9   : > { %p723_p8 = pnand %p722_p6, %p716_p2 }
 0x1fb   : > { %726 = shalt.err (!%p723_p8)
}
 0x1fc   : > { %s795_s17 = smov 128   ;;  %s796_s19 = smov 8  }
 0x1fd   : > { %542 = dma.vmem_to_hbm [thread:$0]  (%p908_p10), %s996_s21, 256, %s1001_s7, %s384_s27, %s795_s17, %s795_s17, %s796_s19  }
 0x1fe PF: > { %s415_s4 = sand.u32 1, %s765_s9   ;;  %p1070_p12 = scmp.ne.s32.totalorder %s1060_s20, 0 }
 0x1ff   : > { %p1071_p11 = scmp.ge.s32.totalorder %s785_s14, 2  ;;  %s416_s5 = scalar_lea.sflag [#allocation4], %s415_s4 }
 0x201   : > { %p553_p0 = pnand %p1071_p11, %p1070_p12 }
 0x203   : > { %760 = dma.done.wait (!%p553_p0), %s416_s5, 256  }
 0x204   : > { %762 = vsyncadd (!%p553_p0), %s416_s5, 4294967040  ;;  %s19_s14 = sadd.s32 1, %s785_s14   ;;  %s1072_s9 = smov %s769_s10 }
 0x205   : > { %p16_p5 = scmp.ge.s32.totalorder %s19_s14, 4   ;;  %s1073_s10 = smov %s773_s11 }
 0x206   : > { %s1074_s11 = smov %s917_s28  ;;  %s1075_s12 = smov %s781_s13 }
 0x207   : > { %s1076_s13 = smov %s1078_s25  ;;  %18 = sbr.rel (!%p16_p5) target bundleno = 7 (0x7), region = 78 }
 0x20e   :  { %421 = vsyncpa [#allocation3], 1 }
 0x20f   :  { %423 = vsyncpa [#allocation3 + $0x1], 1 }
 0x210   :  { %424 = vsyncpa [#allocation6], 1 }
 0x211   :  { %425 = vsyncpa [#allocation4], 1 }
 0x212   :  { %427 = vsyncpa [#allocation4 + $0x1], 1 }

// kernel: gnet_forward.9
= control target key start
LH: loop header
LB: loop body
LE: loop exit
PB: predicated region body
PF: predicated region fallthrough
CT: control target
= control target key end

     0   :  { %7 = vsyncpa [#allocation3], 0  ;;  %s1170_s0 = inlined_call_operand.hbm [shape: bf16[2,256,64], index: 0, kind: input, shape index: {}]   ;;  %s1171_s1 = inlined_call_operand.hbm [shape: bf16[32,256], index: 1, kind: input, shape index: {}]   ;;  %s1172_s2 = inlined_call_operand.hbm [shape: bf16[2,32,64], index: 2, kind: output, shape index: {}]  }
   0x1   :  { %9 = vsyncpa [#allocation3 + $0x1], 0 }
   0x2   :  { %10 = vsyncpa [#allocation6], 0 }
   0x3   :  { %11 = vsyncpa [#allocation4], 0 }
   0x4   :  { %13 = vsyncpa [#allocation4 + $0x1], 0  ;;  %s928_s9 = smov 0   ;;  %s930_s10 = smov 0  }
   0x5   :  { %s932_s11 = smov 0   ;;  %s934_s12 = smov 0  }
   0x6   :  { %s936_s13 = smov 0   ;;  %s938_s14 = smov 0  }
   0x7 LB: > { %s566_s15 = sadd.s32 4294967295, %s902_s14   ;;  %s567_s16 = sadd.s32 4294967294, %s902_s14   ;;  %s902_s14 = sphi %s938_s14, %s19_s14   ;;  %s898_s13 = sphi %s936_s13, %s1196_s13   ;;  %s894_s12 = sphi %s934_s12, %s1195_s12   ;;  %s890_s11 = sphi %s932_s11, %s1194_s11   ;;  %s886_s10 = sphi %s930_s10, %s1193_s10   ;;  %s882_s9 = sphi %s928_s9, %s1192_s9  }
   0x8   : > { %p51_p0 = scmp.ne.s32.totalorder %s886_s10, %s882_s9  ;;  %p962_p1 = scmp.eq.s32.totalorder %s566_s15, 0 }
   0x9   : > { %p966_p2 = scmp.eq.s32.totalorder %s566_s15, 1  ;;  %p109_p3 = scmp.eq.s32.totalorder %s567_s16, 1 }
   0xa   : > { %s1177_s17 = scalar_select %p962_p1, 1, 0 }
   0xb   : > { %s1178_s18 = scalar_select %p966_p2, 1, 0 }
   0xc   : > { %p972_p4 = por %p962_p1, %p51_p0  ;;  %p568_p5 = scmp.ge.s32.totalorder %s902_s14, 1 }
   0xd   : > { %p977_p6 = por %p109_p3, %p51_p0  ;;  %p116_p7 = scmp.lt.s32.totalorder %s902_s14, 3 }
   0xe   : > { %s1179_s19 = scalar_select %p972_p4, 1, 0 }
   0xf   : > { %s1180_s20 = scalar_select %p977_p6, 1, 0 }
  0x10   : > { %p982_p8 = pnand %p568_p5, %p116_p7  ;;  %s904_s22 = smov [#allocation5]  }
  0x11   : > { %s132_s23 = sshll.u32 %s904_s22, 4  ;;  %s31_s25 = sadd.s32 1, %s898_s13  ;;  %s133_s23 = int_to_ptr.vmem [resolvable:$true] %s132_s23 }
  0x12   : > { %s1181_s21 = scalar_select %p982_p8, 1, 0 }
  0x13   : > { %p665_p9 = pneg %p982_p8  ;;  %s758_s28 = scalar_lea.hbm %s1171_s1, 512 }
  0x14   : > { %p759_p12 = scmp.ne.s32.totalorder %s1171_s1, %s758_s28  ;;  %p765_p5 = scmp.lt.u32.totalorder %s758_s28, %s1171_s1 }
  0x15   : > { %p991_p11 = pnand %p665_p9, %p962_p1 }
  0x17   : > { %p760_p13 = pneg %p991_p11 }
  0x19   : > { %p761_p0 = pnand %p760_p13, %p759_p12 }
  0x1b   : > { %p762_p3 = pneg %p761_p0 }
  0x1d   : > { %p767_p7 = pnand %p765_p5, %p762_p3 }
  0x1f   : > { %770 = shalt.err (!%p767_p7)
}
  0x20   : > { %s771_s5 = scalar_lea.vmem %s133_s23, 512  ;;  %p779_p1 = scmp.lt.s32.totalorder %s133_s23, %s133_s23 }
  0x21   : > { %p772_p9 = scmp.ne.s32.totalorder %s133_s23, %s771_s5  ;;  %p780_p4 = scmp.lt.s32.totalorder %s771_s5, %s771_s5 }
  0x23   : > { %p774_p10 = pnand %p772_p9, %p760_p13  ;;  %p781_p8 = por %p780_p4, %p779_p1 }
  0x25   : > { %p775_p6 = pneg %p774_p10 }
  0x27   : > { %p782_p2 = pnand %p781_p8, %p775_p6 }
  0x29   : > { %785 = shalt.err (!%p782_p2)
}
  0x2a   : > { %s905_s6 = smov 128   ;;  %s906_s7 = smov 8  }
  0x2b   : > { %668 = dma.hbm_to_vmem [thread:$0]  (!%p991_p11), %s1171_s1, 512, %s133_s23, [#allocation6], %s905_s6, %s905_s6, %s906_s7  }
  0x2c   : > { %p33_p1 = scmp.ge.s32.totalorder %s31_s25, 2  ;;  %s38_s16 = sadd.s32 1, %s890_s11 }
  0x2d   : > { %p45_p2 = scmp.ne.s32.totalorder %s890_s11, %s886_s10  ;;  %p46_p4 = scmp.eq.s32.totalorder %s902_s14, 0 }
  0x2e   : > { %s1198_s25 = smov (%p33_p1, %s31_s25), 0  ;;  %p1184_p8 = scmp.ne.s32.totalorder %s1178_s18, 0 }
  0x2f   : > { %p1018_p6 = por %p46_p4, %p45_p2  ;;  %s35_s24 = ssub.s32 %s898_s13, %s1198_s25 }
  0x30   : > { %p1024_p10 = por %p1184_p8, %p45_p2  ;;  %p678_p12 = scmp.lt.s32.totalorder %s902_s14, 2 }
  0x31   : > { %p36_p11 = scmp.eq.s32.totalorder %s35_s24, 0  ;;  %s146_s23 = sand.u32 1, %s890_s11  }
  0x32   : > { %s571_s27 = sshll.u32 %s146_s23, 7  ;;  %s607_s29 = sshll.u32 %s898_s13, 11 }
  0x33   : > { %s1033_s28 = scalar_select %p36_p11, %s890_s11, %s38_s16  }
  0x34   : > { %s1039_s4 = scalar_lea.hbm %s1170_s0, %s607_s29  ;;  %s150_s18 = scalar_lea.vmem [#allocation2], %s571_s27 }
  0x35   : > { %s157_s5 = sshll.u32 %s150_s18, 4  ;;  %p1045_p13 = pnand %p678_p12, %p1018_p6  ;;  %s1041_s5 = int_to_ptr.vmem [resolvable:$true] %s157_s5 }
  0x36   : > { %s1049_s7 = scalar_lea.sflag [#allocation3], %s146_s23  ;;  %s786_s8 = scalar_lea.hbm %s1039_s4, 2048 }
  0x37   : > { %p787_p0 = scmp.ne.s32.totalorder %s1039_s4, %s786_s8  ;;  %p788_p3 = pneg %p1045_p13 }
  0x38   : > { %s791_s22 = scalar_lea.hbm %s1170_s0, 4096  ;;  %p792_p9 = scmp.lt.u32.totalorder %s1039_s4, %s1170_s0 }
  0x39   : > { %p789_p5 = pnand %p788_p3, %p787_p0  ;;  %p793_p1 = scmp.lt.u32.totalorder %s791_s22, %s786_s8 }
  0x3a   : > { %p795_p4 = scmp.lt.u32.totalorder %s786_s8, %s1039_s4 }
  0x3b   : > { %p790_p7 = pneg %p789_p5  ;;  %p794_p2 = por %p793_p1, %p792_p9 }
  0x3d   : > { %p796_p6 = por %p795_p4, %p794_p2 }
  0x3f   : > { %p797_p8 = pnand %p796_p6, %p790_p7 }
  0x41   : > { %800 = shalt.err (!%p797_p8)
}
  0x42   : > { %s801_s23 = scalar_lea.vmem %s1041_s5, 2048  ;;  %s907_s29 = smov [#allocation2]  }
  0x43   : > { %p802_p12 = scmp.ne.s32.totalorder %s1041_s5, %s801_s23  ;;  %s806_s30 = sshll.u32 %s907_s29, 4  ;;  %s807_s30 = int_to_ptr.vmem [resolvable:$false] %s806_s30 }
  0x44   : > { %s808_s3 = scalar_lea.vmem %s807_s30, 4096  ;;  %p809_p5 = scmp.lt.s32.totalorder %s1041_s5, %s807_s30 }
  0x45   : > { %p804_p11 = pnand %p802_p12, %p788_p3  ;;  %p810_p9 = scmp.lt.s32.totalorder %s808_s3, %s801_s23 }
  0x47   : > { %p805_p0 = pneg %p804_p11  ;;  %p811_p1 = por %p810_p9, %p809_p5 }
  0x49   : > { %p812_p2 = pnand %p811_p1, %p805_p0 }
  0x4b   : > { %815 = shalt.err (!%p812_p2)
}
  0x4c   : > { %s908_s18 = smov 64   ;;  %s909_s8 = smov 4  }
  0x4d   : > { %672 = dma.hbm_to_vmem [thread:$0]  (!%p1045_p13), %s1039_s4, 2048, %s1041_s5, %s1049_s7, %s908_s18, %s908_s18, %s909_s8  }
  0x4e   : > { %p1187_p3 = scmp.ne.s32.totalorder %s1181_s21, 0 }
  0x4f   : > { %s1080_s15 = sand.u32 (!%p1187_p3), 1, %s886_s10   ;;  %p1188_p7 = scmp.ne.s32.totalorder (!%p1187_p3), %s1179_s19, 0 }
  0x50   : > { %169 = sbr.rel (%p1187_p3) target bundleno = 511 (0x1ff), region = 28  ;;  %s575_s16 = sshll.u32 (!%p1187_p3), %s1080_s15, 7 }
  0x51   : > { %s172_s22 = scalar_lea.sflag (!%p1187_p3), [#allocation3], %s1080_s15  ;;  %s1084_s24 = scalar_lea.vmem (!%p1187_p3), [#allocation2], %s575_s16 }
  0x57   : > { %869 = dma.done.wait (%p1188_p7), %s172_s22, 2048  }
  0x58   : > { %871 = vsyncadd (%p1188_p7), %s172_s22, 4294965248  ;;  %p1189_p13 = scmp.ne.s32.totalorder %s1177_s17, 0 }
  0x5a   : > { %873 = dma.done.wait (%p1189_p13), [#allocation6], 512  }
  0x5b   : > { %875 = vsyncadd (%p1189_p13), [#allocation6], 4294966784  ;;  %v736_v0 = vld [vmem:[%s1084_s24 + $0x40] sm:$0xff]   ;;  %v738_v2 = vld [vmem:[%s1084_s24 + $0x48] sm:$0xff]   ;;  %vm412_vm0 = vcmask 523264   ;;  %s577_s17 = sshll.u32 %s1080_s15, 4 }
  0x5c   : > { %v737_v1 = vld [vmem:[%s1084_s24] sm:$0xff]   ;;  %613 = vmatprep.subr.bf16.mxu0 %v736_v0  ;;  %641 = vmatprep.subr.bf16.mxu1 %v736_v0  ;;  %v739_v3 = vld [vmem:[%s1084_s24 + $0x8] sm:$0xff]   ;;  %v740_v4 = vld [vmem:[%s1084_s24 + $0x50] sm:$0xff]   ;;  %vm449_vm1 = vcmask 519168   ;;  %s199_s19 = scalar_lea.vmem [#allocation7], %s577_s17  ;;  %s612_s4 = sshll.u32 %s894_s12, 8 }
  0x5d   : > { %614 = vmatpush3.bf16.msra.mxu0 %v737_v1  ;;  %649 = vmatpush3.bf16.msra.mxu1 %v737_v1  ;;  %v741_v5 = vld [vmem:[%s1084_s24 + $0x10] sm:$0xff]   ;;  %v742_v6 = vld [vmem:[%s1084_s24 + $0x58] sm:$0xff]   ;;  %v744_v8 = vld [vmem:[%s1084_s24 + $0x60] sm:$0xff]   ;;  %s470_s21 = sshll.u32 %s199_s19, 4  ;;  %s1119_s7 = scalar_lea.hbm %s1172_s2, %s612_s4  ;;  %s1112_s21 = int_to_ptr.vmem [resolvable:$true] %s470_s21 }
  0x5e   : > { %615 = vmatprep.subr.bf16.mxu0 %v738_v2  ;;  %642 = vmatprep.subr.bf16.mxu1 %v738_v2  ;;  %v743_v7 = vld [vmem:[%s1084_s24 + $0x18] sm:$0xff]   ;;  %v745_v9 = vld [vmem:[%s1084_s24 + $0x20] sm:$0xff]   ;;  %v746_v10 = vld [vmem:[%s1084_s24 + $0x68] sm:$0xff]   ;;  %s455_s12 = scalar_lea.sflag [#allocation4], %s1080_s15  ;;  %s816_s27 = scalar_lea.vmem %s1112_s21, 256 }
  0x5f   : > { %v754_v11 = vld [vmem:[#allocation5 + $0x4] ss:$8 sps:$4 sm:$0xff]   ;;  %v757_v12 = vld [vmem:[#allocation5 + $0x14] ss:$8 sps:$4 sm:$0xff]   ;;  %v752_v18 = vld [vmem:[#allocation5] ss:$8 sps:$4 sm:$0xff]   ;;  %p817_p4 = scmp.ne.s32.totalorder %s1112_s21, %s816_s27 }
  0x60   : > { %v747_v13 = vld [vmem:[%s1084_s24 + $0x28] sm:$0xff]   ;;  %v748_v14 = vld [vmem:[%s1084_s24 + $0x70] sm:$0xff]   ;;  %387 = vmatprep.mubr.bf16.mxu0 %v754_v11  ;;  %395 = vmatprep.mubr.bf16.mxu1 %v757_v12  ;;  %v750_v16 = vld [vmem:[%s1084_s24 + $0x78] sm:$0xff]   ;;  %s910_s23 = smov [#allocation7]  }
  0x61   : > { %616 = vmatpush3.bf16.msra.mxu0 %v739_v3  ;;  %650 = vmatpush3.bf16.msra.mxu1 %v739_v3  ;;  %v749_v15 = vld [vmem:[%s1084_s24 + $0x30] sm:$0xff]   ;;  %v751_v17 = vld [vmem:[%s1084_s24 + $0x38] sm:$0xff]   ;;  %p818_p6 = pnand %p817_p4, %p1024_p10  ;;  %s820_s29 = sshll.u32 %s910_s23, 4  ;;  %s821_s29 = int_to_ptr.vmem [resolvable:$false] %s820_s29 }
  0x62   : > { %617 = vmatprep.subr.bf16.mxu0 %v740_v4  ;;  %643 = vmatprep.subr.bf16.mxu1 %v740_v4  ;;  %v755_v19 = vld [vmem:[#allocation5 + $0x10] ss:$8 sps:$4 sm:$0xff]   ;;  %s822_s30 = scalar_lea.vmem %s821_s29, 512  ;;  %p823_p12 = scmp.lt.s32.totalorder %s1112_s21, %s821_s29 }
  0x63   : > { %p819_p8 = pneg %p818_p6  ;;  %p824_p11 = scmp.lt.s32.totalorder %s822_s30, %s816_s27 }
  0x65   : > { %618 = vmatpush3.bf16.msra.mxu0 %v741_v5  ;;  %651 = vmatpush3.bf16.msra.mxu1 %v741_v5  ;;  %p825_p0 = por %p824_p11, %p823_p12 }
  0x66   : > { %619 = vmatprep.subr.bf16.mxu0 %v742_v6  ;;  %644 = vmatprep.subr.bf16.mxu1 %v742_v6 }
  0x67   : > { %p826_p5 = pnand %p825_p0, %p819_p8 }
  0x69   : > { %620 = vmatpush3.bf16.msra.mxu0 %v743_v7  ;;  %652 = vmatpush3.bf16.msra.mxu1 %v743_v7 }
  0x6a   : > { %621 = vmatprep.subr.bf16.mxu0 %v744_v8  ;;  %645 = vmatprep.subr.bf16.mxu1 %v744_v8 }
  0x6d   : > { %622 = vmatpush3.bf16.msra.mxu0 %v745_v9  ;;  %653 = vmatpush3.bf16.msra.mxu1 %v745_v9 }
  0x6e   : > { %623 = vmatprep.subr.bf16.mxu0 %v746_v10  ;;  %646 = vmatprep.subr.bf16.mxu1 %v746_v10 }
  0x71   : > { %624 = vmatpush3.bf16.msra.mxu0 %v747_v13  ;;  %654 = vmatpush3.bf16.msra.mxu1 %v747_v13 }
  0x72   : > { %625 = vmatprep.subr.bf16.mxu0 %v748_v14  ;;  %647 = vmatprep.subr.bf16.mxu1 %v748_v14 }
  0x75   : > { %626 = vmatpush3.bf16.msra.mxu0 %v749_v15  ;;  %655 = vmatpush3.bf16.msra.mxu1 %v749_v15 }
  0x76   : > { %627 = vmatprep.subr.bf16.mxu0 %v750_v16  ;;  %648 = vmatprep.subr.bf16.mxu1 %v750_v16 }
  0x79   : > { %628 = vmatpush3.bf16.msra.mxu0 %v751_v17  ;;  %656 = vmatpush3.bf16.msra.mxu1 %v751_v17 }
  0x7c   : > { %388 = vmatmul.mubr.bf16.vlgmr.msra.gmra.mrb[0].mxu0 %v752_v18  ;;  %396 = vmatmul.mubr.bf16.vlgmr.msra.gmra.mrb[0].mxu1 %v755_v19 }
 0x14f   : > { %v629_v20 = vpop.f32.mrb[0].mxu0  ;;  %v635_v21 = vpop.f32.mrb[0].mxu1 }
 0x150   : > { %v630_v22 = vpop.f32.mrb[1].mxu0  ;;  %v636_v23 = vpop.f32.mrb[1].mxu1 }
 0x151   : > { %v631_v24 = vadd.f32 %v630_v22, %v629_v20  ;;  %v637_v25 = vadd.f32 %v636_v23, %v635_v21  ;;  %v632_v26 = vpop.f32.mrb[2].mxu0  ;;  %v638_v27 = vpop.f32.mrb[2].mxu1 }
 0x152   : > { %v633_v28 = vpop.f32.mrb[3].mxu0  ;;  %v639_v29 = vpop.f32.mrb[3].mxu1 }
 0x153   : > { %v404_v30 = vmax.f32 %v631_v24, 0.0  ;;  %v406_v31 = vmax.f32 %v637_v25, 0.0  ;;  %v634_v32 = vadd.f32 %v633_v28, %v632_v26  ;;  %v640_v33 = vadd.f32 %v639_v29, %v638_v27 }
 0x155   : > { %v408_v34 = vmin.f32 %v404_v30, 6.0  ;;  %v410_v35 = vmin.f32 %v406_v31, 6.0  ;;  %v405_v36 = vmax.f32 %v634_v32, 0.0  ;;  %v407_v37 = vmax.f32 %v640_v33, 0.0 }
 0x157   : > { %v409_v38 = vmin.f32 %v405_v36, 6.0  ;;  %v411_v39 = vmin.f32 %v407_v37, 6.0  ;;  %v419_v40 = vsel %vm412_vm0, %v410_v35, 0.0  ;;  %v413_v41 = vsel %vm412_vm0, %v408_v34, 0.0 }
 0x158   : > { %420 = vadd.xlane.f32.xlu1 %v419_v40  ;;  %414 = vadd.xlane.f32.xlu0 %v413_v41 }
 0x159   : > { %v422_v42 = vsel %vm412_vm0, %v411_v39, 0.0  ;;  %v416_v43 = vsel %vm412_vm0, %v409_v38, 0.0 }
 0x15c   : > { %423 = vadd.xlane.f32.xlu1 %v422_v42  ;;  %417 = vadd.xlane.f32.xlu0 %v416_v43 }
 0x1e5   : > { %v421_v44 = vpop.xlane.xlu1 %420  ;;  %v415_v45 = vpop.xlane.xlu0 %414 }
 0x1e6   : > { %v427_v46 = vmul.f32 0.015625, %v421_v44  ;;  %v425_v47 = vmul.f32 0.015625, %v415_v45 }
 0x1e8   : > { %v431_v48 = vsub.f32 %v410_v35, %v427_v46  ;;  %v429_v49 = vsub.f32 %v408_v34, %v425_v47 }
 0x1e9   : > { %v424_v50 = vpop.xlane.xlu1 %423  ;;  %v418_v51 = vpop.xlane.xlu0 %417 }
 0x1ea   : > { %v610_v52 = vpack.c.bf16 %v431_v48, %v431_v48  ;;  %v608_v53 = vpack.c.bf16 %v429_v49, %v429_v49  ;;  %v428_v54 = vmul.f32 0.015625, %v424_v50  ;;  %v426_v55 = vmul.f32 0.015625, %v418_v51 }
 0x1ec   : > { %452 = vst.msk [vmem:[%s199_s19 + $0x8] sm:$0xf] %vm449_vm1, %v610_v52  ;;  %450 = vst.msk [vmem:[%s199_s19] sm:$0xf] %vm449_vm1, %v608_v53  ;;  %v432_v56 = vsub.f32 %v411_v39, %v428_v54  ;;  %v430_v57 = vsub.f32 %v409_v38, %v426_v55 }
 0x1ee   : > { %v611_v58 = vpack.c.bf16 %v432_v56, %v432_v56  ;;  %v609_v59 = vpack.c.bf16 %v430_v57, %v430_v57 }
 0x1f0   : > { %453 = vst.msk [vmem:[%s199_s19 + $0xc] sm:$0xf] %vm449_vm1, %v611_v58  ;;  %451 = vst.msk [vmem:[%s199_s19 + $0x4] sm:$0xf] %vm449_vm1, %v609_v59 }
 0x1f1   : > { %829 = shalt.err (!%p826_p5)
}
 0x1f2   : > { %s830_s3 = scalar_lea.hbm %s1119_s7, 256  ;;  %s834_s16 = scalar_lea.hbm %s1172_s2, 512 }
 0x1f3   : > { %p831_p9 = scmp.ne.s32.totalorder %s1119_s7, %s830_s3  ;;  %p835_p3 = scmp.lt.u32.totalorder %s1119_s7, %s1172_s2 }
 0x1f4   : > { %p836_p7 = scmp.lt.u32.totalorder %s834_s16, %s830_s3  ;;  %p838_p4 = scmp.lt.u32.totalorder %s830_s3, %s1119_s7 }
 0x1f5   : > { %p832_p1 = pnand %p831_p9, %p1024_p10 }
 0x1f6   : > { %p837_p13 = por %p836_p7, %p835_p3 }
 0x1f7   : > { %p833_p2 = pneg %p832_p1 }
 0x1f8   : > { %p839_p6 = por %p838_p4, %p837_p13 }
 0x1fa   : > { %p840_p8 = pnand %p839_p6, %p833_p2 }
 0x1fc   : > { %843 = shalt.err (!%p840_p8)
}
 0x1fd   : > { %s911_s17 = smov 64   ;;  %s912_s19 = smov 4  }
 0x1fe   : > { %663 = dma.vmem_to_hbm [thread:$0]  (%p1024_p10), %s1112_s21, 256, %s1119_s7, %s455_s12, %s911_s17, %s911_s17, %s912_s19  }
 0x1ff PF: > { %s485_s4 = sand.u32 1, %s882_s9   ;;  %p1190_p12 = scmp.ne.s32.totalorder %s1180_s20, 0 }
 0x200   : > { %p1191_p11 = scmp.ge.s32.totalorder %s902_s14, 2  ;;  %s486_s5 = scalar_lea.sflag [#allocation4], %s485_s4 }
 0x202   : > { %p674_p0 = pnand %p1191_p11, %p1190_p12 }
 0x204   : > { %877 = dma.done.wait (!%p674_p0), %s486_s5, 256  }
 0x205   : > { %879 = vsyncadd (!%p674_p0), %s486_s5, 4294967040  ;;  %s19_s14 = sadd.s32 1, %s902_s14   ;;  %s1192_s9 = smov %s886_s10 }
 0x206   : > { %p16_p5 = scmp.ge.s32.totalorder %s19_s14, 4   ;;  %s1193_s10 = smov %s890_s11 }
 0x207   : > { %s1194_s11 = smov %s1033_s28  ;;  %s1195_s12 = smov %s898_s13 }
 0x208   : > { %s1196_s13 = smov %s1198_s25  ;;  %18 = sbr.rel (!%p16_p5) target bundleno = 7 (0x7), region = 78 }
 0x20f   :  { %491 = vsyncpa [#allocation3], 1 }
 0x210   :  { %493 = vsyncpa [#allocation3 + $0x1], 1 }
 0x211   :  { %494 = vsyncpa [#allocation6], 1 }
 0x212   :  { %495 = vsyncpa [#allocation4], 1 }
 0x213   :  { %497 = vsyncpa [#allocation4 + $0x1], 1 }

// kernel: gnet_forward.10
= control target key start
LH: loop header
LB: loop body
LE: loop exit
PB: predicated region body
PF: predicated region fallthrough
CT: control target
= control target key end

     0   :  { %7 = vsyncpa [#allocation3], 0  ;;  %s1656_s0 = inlined_call_operand.hbm [shape: bf16[2,512,16], index: 0, kind: input, shape index: {}]   ;;  %s1657_s1 = inlined_call_operand.hbm [shape: bf16[64,512], index: 1, kind: input, shape index: {}]   ;;  %s1658_s2 = inlined_call_operand.hbm [shape: bf16[2,64,16], index: 2, kind: output, shape index: {}]  }
   0x1   :  { %9 = vsyncpa [#allocation3 + $0x1], 0 }
   0x2   :  { %10 = vsyncpa [#allocation6], 0 }
   0x3   :  { %11 = vsyncpa [#allocation4], 0 }
   0x4   :  { %13 = vsyncpa [#allocation4 + $0x1], 0  ;;  %s1363_s9 = smov 0   ;;  %s1365_s10 = smov 0  }
   0x5   :  { %s1367_s11 = smov 0   ;;  %s1369_s12 = smov 0  }
   0x6   :  { %s1371_s13 = smov 0   ;;  %s1373_s14 = smov 0  }
   0x7 LB: > { %s895_s15 = sadd.s32 4294967295, %s1337_s14   ;;  %s896_s16 = sadd.s32 4294967294, %s1337_s14   ;;  %s1337_s14 = sphi %s1373_s14, %s19_s14   ;;  %s1333_s13 = sphi %s1371_s13, %s1682_s13   ;;  %s1329_s12 = sphi %s1369_s12, %s1681_s12   ;;  %s1325_s11 = sphi %s1367_s11, %s1680_s11   ;;  %s1321_s10 = sphi %s1365_s10, %s1679_s10   ;;  %s1317_s9 = sphi %s1363_s9, %s1678_s9  }
   0x8   : > { %p51_p0 = scmp.ne.s32.totalorder %s1321_s10, %s1317_s9  ;;  %p1397_p1 = scmp.eq.s32.totalorder %s895_s15, 0 }
   0x9   : > { %p1401_p2 = scmp.eq.s32.totalorder %s895_s15, 1  ;;  %p109_p3 = scmp.eq.s32.totalorder %s896_s16, 1 }
   0xa   : > { %s1663_s17 = scalar_select %p1397_p1, 1, 0 }
   0xb   : > { %s1664_s18 = scalar_select %p1401_p2, 1, 0 }
   0xc   : > { %p1407_p4 = por %p1397_p1, %p51_p0  ;;  %p897_p5 = scmp.ge.s32.totalorder %s1337_s14, 1 }
   0xd   : > { %p1412_p6 = por %p109_p3, %p51_p0  ;;  %p116_p7 = scmp.lt.s32.totalorder %s1337_s14, 3 }
   0xe   : > { %s1665_s19 = scalar_select %p1407_p4, 1, 0 }
   0xf   : > { %s1666_s20 = scalar_select %p1412_p6, 1, 0 }
  0x10   : > { %p1417_p8 = pnand %p897_p5, %p116_p7  ;;  %s1339_s22 = smov [#allocation5]  }
  0x11   : > { %s132_s23 = sshll.u32 %s1339_s22, 4  ;;  %s31_s25 = sadd.s32 1, %s1333_s13  ;;  %s133_s23 = int_to_ptr.vmem [resolvable:$true] %s132_s23 }
  0x12   : > { %s1667_s21 = scalar_select %p1417_p8, 1, 0 }
  0x13   : > { %p1066_p9 = pneg %p1417_p8  ;;  %s1193_s28 = scalar_lea.hbm %s1657_s1, 2048 }
  0x14   : > { %p1194_p12 = scmp.ne.s32.totalorder %s1657_s1, %s1193_s28  ;;  %p1200_p5 = scmp.lt.u32.totalorder %s1193_s28, %s1657_s1 }
  0x15   : > { %p1426_p11 = pnand %p1066_p9, %p1397_p1 }
  0x17   : > { %p1195_p13 = pneg %p1426_p11 }
  0x19   : > { %p1196_p0 = pnand %p1195_p13, %p1194_p12 }
  0x1b   : > { %p1197_p3 = pneg %p1196_p0 }
  0x1d   : > { %p1202_p7 = pnand %p1200_p5, %p1197_p3 }
  0x1f   : > { %1205 = shalt.err (!%p1202_p7)
}
  0x20   : > { %s1206_s5 = scalar_lea.vmem %s133_s23, 2048  ;;  %p1214_p1 = scmp.lt.s32.totalorder %s133_s23, %s133_s23 }
  0x21   : > { %p1207_p9 = scmp.ne.s32.totalorder %s133_s23, %s1206_s5  ;;  %p1215_p4 = scmp.lt.s32.totalorder %s1206_s5, %s1206_s5 }
  0x23   : > { %p1209_p10 = pnand %p1207_p9, %p1195_p13  ;;  %p1216_p8 = por %p1215_p4, %p1214_p1 }
  0x25   : > { %p1210_p6 = pneg %p1209_p10 }
  0x27   : > { %p1217_p2 = pnand %p1216_p8, %p1210_p6 }
  0x29   : > { %1220 = shalt.err (!%p1217_p2)
}
  0x2a   : > { %s1340_s6 = smov 256   ;;  %s1341_s7 = smov 16  }
  0x2b   : > { %1069 = dma.hbm_to_vmem [thread:$0]  (!%p1426_p11), %s1657_s1, 2048, %s133_s23, [#allocation6], %s1340_s6, %s1340_s6, %s1341_s7  }
  0x2c   : > { %p33_p1 = scmp.ge.s32.totalorder %s31_s25, 2  ;;  %s38_s16 = sadd.s32 1, %s1325_s11 }
  0x2d   : > { %p45_p2 = scmp.ne.s32.totalorder %s1325_s11, %s1321_s10  ;;  %p46_p4 = scmp.eq.s32.totalorder %s1337_s14, 0 }
  0x2e   : > { %s1684_s25 = smov (%p33_p1, %s31_s25), 0  ;;  %p1670_p8 = scmp.ne.s32.totalorder %s1664_s18, 0 }
  0x2f   : > { %p1453_p6 = por %p46_p4, %p45_p2  ;;  %s35_s24 = ssub.s32 %s1333_s13, %s1684_s25 }
  0x30   : > { %p1459_p10 = por %p1670_p8, %p45_p2  ;;  %p1079_p12 = scmp.lt.s32.totalorder %s1337_s14, 2 }
  0x31   : > { %p36_p11 = scmp.eq.s32.totalorder %s35_s24, 0  ;;  %s146_s23 = sand.u32 1, %s1325_s11  }
  0x32   : > { %s900_s27 = sshll.u32 %s146_s23, 8  ;;  %s968_s29 = sshll.u32 %s1333_s13, 12 }
  0x33   : > { %s1468_s28 = scalar_select %p36_p11, %s1325_s11, %s38_s16  }
  0x34   : > { %s1474_s4 = scalar_lea.hbm %s1656_s0, %s968_s29  ;;  %s150_s18 = scalar_lea.vmem [#allocation2], %s900_s27 }
  0x35   : > { %s157_s5 = sshll.u32 %s150_s18, 4  ;;  %p1480_p13 = pnand %p1079_p12, %p1453_p6  ;;  %s1476_s5 = int_to_ptr.vmem [resolvable:$true] %s157_s5 }
  0x36   : > { %s1484_s7 = scalar_lea.sflag [#allocation3], %s146_s23  ;;  %s1221_s8 = scalar_lea.hbm %s1474_s4, 4096 }
  0x37   : > { %p1222_p0 = scmp.ne.s32.totalorder %s1474_s4, %s1221_s8  ;;  %p1223_p3 = pneg %p1480_p13 }
  0x38   : > { %s1226_s22 = scalar_lea.hbm %s1656_s0, 8192  ;;  %p1227_p9 = scmp.lt.u32.totalorder %s1474_s4, %s1656_s0 }
  0x39   : > { %p1224_p5 = pnand %p1223_p3, %p1222_p0  ;;  %p1228_p1 = scmp.lt.u32.totalorder %s1226_s22, %s1221_s8 }
  0x3a   : > { %p1230_p4 = scmp.lt.u32.totalorder %s1221_s8, %s1474_s4 }
  0x3b   : > { %p1225_p7 = pneg %p1224_p5  ;;  %p1229_p2 = por %p1228_p1, %p1227_p9 }
  0x3d   : > { %p1231_p6 = por %p1230_p4, %p1229_p2 }
  0x3f   : > { %p1232_p8 = pnand %p1231_p6, %p1225_p7 }
  0x41   : > { %1235 = shalt.err (!%p1232_p8)
}
  0x42   : > { %s1236_s23 = scalar_lea.vmem %s1476_s5, 4096  ;;  %s1342_s29 = smov [#allocation2]  }
  0x43   : > { %p1237_p12 = scmp.ne.s32.totalorder %s1476_s5, %s1236_s23  ;;  %s1241_s30 = sshll.u32 %s1342_s29, 4  ;;  %s1242_s30 = int_to_ptr.vmem [resolvable:$false] %s1241_s30 }
  0x44   : > { %s1243_s3 = scalar_lea.vmem %s1242_s30, 8192  ;;  %p1244_p5 = scmp.lt.s32.totalorder %s1476_s5, %s1242_s30 }
  0x45   : > { %p1239_p11 = pnand %p1237_p12, %p1223_p3  ;;  %p1245_p9 = scmp.lt.s32.totalorder %s1243_s3, %s1236_s23 }
  0x47   : > { %p1240_p0 = pneg %p1239_p11  ;;  %p1246_p1 = por %p1245_p9, %p1244_p5 }
  0x49   : > { %p1247_p2 = pnand %p1246_p1, %p1240_p0 }
  0x4b   : > { %1250 = shalt.err (!%p1247_p2)
}
  0x4c   : > { %s1343_s18 = smov 64   ;;  %s1344_s8 = smov 4  }
  0x4d   : > { %1073 = dma.hbm_to_vmem [thread:$0]  (!%p1480_p13), %s1474_s4, 4096, %s1476_s5, %s1484_s7, %s1343_s18, %s1343_s18, %s1344_s8  }
  0x4e   : > { %p1673_p3 = scmp.ne.s32.totalorder %s1667_s21, 0 }
  0x4f   : > { %s1515_s15 = sand.u32 (!%p1673_p3), 1, %s1321_s10   ;;  %p1674_p7 = scmp.ne.s32.totalorder (!%p1673_p3), %s1665_s19, 0 }
  0x50   : > { %169 = sbr.rel (%p1673_p3) target bundleno = 537 (0x219), region = 28  ;;  %s904_s16 = sshll.u32 (!%p1673_p3), %s1515_s15, 8 }
  0x51   : > { %s172_s22 = scalar_lea.sflag (!%p1673_p3), [#allocation3], %s1515_s15  ;;  %s1519_s24 = scalar_lea.vmem (!%p1673_p3), [#allocation2], %s904_s16 }
  0x57   : > { %1304 = dma.done.wait (%p1674_p7), %s172_s22, 4096  }
  0x58   : > { %1306 = vsyncadd (%p1674_p7), %s172_s22, 4294963200  ;;  %p1675_p13 = scmp.ne.s32.totalorder %s1663_s17, 0 }
  0x5a   : > { %1308 = dma.done.wait (%p1675_p13), [#allocation6], 2048  }
  0x5b   : > { %1310 = vsyncadd (%p1675_p13), [#allocation6], 4294965248  ;;  %v1137_v0 = vld [vmem:[%s1519_s24 + $0x40] sm:$0xff]   ;;  %v1141_v4 = vld [vmem:[%s1519_s24 + $0x48] sm:$0xff]   ;;  %vm701_vm0 = vcmask 130048   ;;  %s906_s17 = sshll.u32 %s1515_s15, 5 }
  0x5c   : > { %v1138_v1 = vld [vmem:[%s1519_s24 + $0xc0] sm:$0xff]   ;;  %978 = vmatprep.subr.bf16.mxu0 %v1137_v0  ;;  %v1142_v5 = vld [vmem:[%s1519_s24 + $0xc8] sm:$0xff]   ;;  %v1145_v8 = vld [vmem:[%s1519_s24 + $0x50] sm:$0xff]   ;;  %vm774_vm1 = vcmask 125952   ;;  %s1580_s19 = scalar_lea.vmem [#allocation7], %s906_s17  ;;  %s977_s21 = sshll.u32 %s1329_s12, 9 }
  0x5d   : > { %v1139_v2 = vld [vmem:[%s1519_s24] sm:$0xff]   ;;  %1018 = vmatprep.subr.bf16.mxu1 %v1138_v1  ;;  %v1143_v6 = vld [vmem:[%s1519_s24 + $0x8] sm:$0xff]   ;;  %v1146_v9 = vld [vmem:[%s1519_s24 + $0xd0] sm:$0xff]   ;;  %s799_s4 = sshll.u32 %s1580_s19, 4  ;;  %s1601_s7 = scalar_lea.hbm %s1658_s2, %s977_s21  ;;  %s1603_s4 = int_to_ptr.vmem [resolvable:$true] %s799_s4 }
  0x5e   : > { %v1140_v3 = vld [vmem:[%s1519_s24 + $0x80] sm:$0xff]   ;;  %979 = vmatpush3.bf16.msra.mxu0 %v1139_v2  ;;  %v1144_v7 = vld [vmem:[%s1519_s24 + $0x88] sm:$0xff]   ;;  %v1147_v10 = vld [vmem:[%s1519_s24 + $0x10] sm:$0xff]   ;;  %s784_s27 = scalar_lea.sflag [#allocation4], %s1515_s15  ;;  %s1251_s12 = scalar_lea.vmem %s1603_s4, 512 }
  0x5f   : > { %1019 = vmatpush3.bf16.msra.mxu1 %v1140_v3  ;;  %980 = vmatprep.subr.bf16.mxu0 %v1141_v4  ;;  %v1148_v11 = vld [vmem:[%s1519_s24 + $0x90] sm:$0xff]   ;;  %v1149_v12 = vld [vmem:[%s1519_s24 + $0x58] sm:$0xff]   ;;  %v1153_v16 = vld [vmem:[%s1519_s24 + $0x60] sm:$0xff]   ;;  %p1252_p4 = scmp.ne.s32.totalorder %s1603_s4, %s1251_s12  ;;  %s1345_s23 = smov [#allocation7]  }
  0x60   : > { %1020 = vmatprep.subr.bf16.mxu1 %v1142_v5  ;;  %v1150_v13 = vld [vmem:[%s1519_s24 + $0xd8] sm:$0xff]   ;;  %v1154_v17 = vld [vmem:[%s1519_s24 + $0xe0] sm:$0xff]   ;;  %v1157_v20 = vld [vmem:[%s1519_s24 + $0x68] sm:$0xff]   ;;  %s1255_s29 = sshll.u32 %s1345_s23, 4  ;;  %s1256_s29 = int_to_ptr.vmem [resolvable:$false] %s1255_s29 }
  0x61   : > { %v1151_v14 = vld [vmem:[%s1519_s24 + $0x18] sm:$0xff]   ;;  %v1155_v18 = vld [vmem:[%s1519_s24 + $0x20] sm:$0xff]   ;;  %v1158_v21 = vld [vmem:[%s1519_s24 + $0xe8] sm:$0xff]   ;;  %p1253_p6 = pnand %p1252_p4, %p1459_p10  ;;  %s1257_s30 = scalar_lea.vmem %s1256_s29, 1024 }
  0x62   : > { %981 = vmatpush3.bf16.msra.mxu0 %v1143_v6  ;;  %v1152_v15 = vld [vmem:[%s1519_s24 + $0x98] sm:$0xff]   ;;  %v1156_v19 = vld [vmem:[%s1519_s24 + $0xa0] sm:$0xff]   ;;  %v1159_v22 = vld [vmem:[%s1519_s24 + $0x28] sm:$0xff]   ;;  %p1258_p12 = scmp.lt.s32.totalorder %s1603_s4, %s1256_s29  ;;  %p1259_p11 = scmp.lt.s32.totalorder %s1257_s30, %s1251_s12 }
  0x63   : > { %1021 = vmatpush3.bf16.msra.mxu1 %v1144_v7  ;;  %982 = vmatprep.subr.bf16.mxu0 %v1145_v8  ;;  %v1160_v23 = vld [vmem:[%s1519_s24 + $0xa8] sm:$0xff]   ;;  %v1161_v24 = vld [vmem:[%s1519_s24 + $0x70] sm:$0xff]   ;;  %v1165_v28 = vld [vmem:[%s1519_s24 + $0x78] sm:$0xff]   ;;  %p1254_p8 = pneg %p1253_p6 }
  0x64   : > { %1022 = vmatprep.subr.bf16.mxu1 %v1146_v9  ;;  %v1162_v25 = vld [vmem:[%s1519_s24 + $0xf0] sm:$0xff]   ;;  %v1166_v29 = vld [vmem:[%s1519_s24 + $0xf8] sm:$0xff]   ;;  %p1260_p0 = por %p1259_p11, %p1258_p12 }
  0x65   : > { %v1163_v26 = vld [vmem:[%s1519_s24 + $0x30] sm:$0xff]   ;;  %v1167_v30 = vld [vmem:[%s1519_s24 + $0x38] sm:$0xff]  }
  0x66   : > { %983 = vmatpush3.bf16.msra.mxu0 %v1147_v10  ;;  %v1164_v27 = vld [vmem:[%s1519_s24 + $0xb0] sm:$0xff]   ;;  %v1168_v31 = vld [vmem:[%s1519_s24 + $0xb8] sm:$0xff]   ;;  %p1261_p5 = pnand %p1260_p0, %p1254_p8 }
  0x67   : > { %1023 = vmatpush3.bf16.msra.mxu1 %v1148_v11  ;;  %984 = vmatprep.subr.bf16.mxu0 %v1149_v12  ;;  %v1169_v32 = vld [vmem:[#allocation5] ss:$16 sps:$4 sm:$0xff]   ;;  %v1171_v33 = vld [vmem:[#allocation5 + $0x4] ss:$16 sps:$4 sm:$0xff]   ;;  %v1172_v34 = vld [vmem:[#allocation5 + $0x8] ss:$16 sps:$4 sm:$0xff]  }
  0x68   : > { %1024 = vmatprep.subr.bf16.mxu1 %v1150_v13  ;;  %v1174_v35 = vld [vmem:[#allocation5 + $0xc] ss:$16 sps:$4 sm:$0xff]   ;;  %587 = vmatprep.mubr.bf16.mxu0 %v1171_v33  ;;  %v1175_v36 = vld [vmem:[#allocation5 + $0x24] ss:$16 sps:$4 sm:$0xff]   ;;  %v1179_v38 = vld [vmem:[#allocation5 + $0x20] ss:$16 sps:$4 sm:$0xff]  }
  0x69   : > { %652 = vmatprep.mubr.bf16.mxu1 %v1174_v35  ;;  %v1177_v37 = vld [vmem:[#allocation5 + $0x2c] ss:$16 sps:$4 sm:$0xff]   ;;  %v1180_v39 = vld [vmem:[#allocation5 + $0x28] ss:$16 sps:$4 sm:$0xff]   ;;  %v1181_v40 = vld [vmem:[#allocation5 + $0x44] ss:$16 sps:$4 sm:$0xff]  }
  0x6a   : > { %985 = vmatpush3.bf16.msra.mxu0 %v1151_v14  ;;  %v1183_v41 = vld [vmem:[#allocation5 + $0x4c] ss:$16 sps:$4 sm:$0xff]   ;;  %v1185_v42 = vld [vmem:[#allocation5 + $0x40] ss:$16 sps:$4 sm:$0xff]   ;;  %v1186_v43 = vld [vmem:[#allocation5 + $0x48] ss:$16 sps:$4 sm:$0xff]  }
  0x6b   : > { %1025 = vmatpush3.bf16.msra.mxu1 %v1152_v15  ;;  %986 = vmatprep.subr.bf16.mxu0 %v1153_v16  ;;  %v1187_v44 = vld [vmem:[#allocation5 + $0x64] ss:$16 sps:$4 sm:$0xff]   ;;  %v1189_v45 = vld [vmem:[#allocation5 + $0x6c] ss:$16 sps:$4 sm:$0xff]   ;;  %v1191_v46 = vld [vmem:[#allocation5 + $0x60] ss:$16 sps:$4 sm:$0xff]  }
  0x6c   : > { %1026 = vmatprep.subr.bf16.mxu1 %v1154_v17  ;;  %v1192_v47 = vld [vmem:[#allocation5 + $0x68] ss:$16 sps:$4 sm:$0xff]  }
  0x6e   : > { %987 = vmatpush3.bf16.msra.mxu0 %v1155_v18 }
  0x6f   : > { %1027 = vmatpush3.bf16.msra.mxu1 %v1156_v19  ;;  %988 = vmatprep.subr.bf16.mxu0 %v1157_v20 }
  0x70   : > { %1028 = vmatprep.subr.bf16.mxu1 %v1158_v21 }
  0x72   : > { %989 = vmatpush3.bf16.msra.mxu0 %v1159_v22 }
  0x73   : > { %1029 = vmatpush3.bf16.msra.mxu1 %v1160_v23  ;;  %990 = vmatprep.subr.bf16.mxu0 %v1161_v24 }
  0x74   : > { %1030 = vmatprep.subr.bf16.mxu1 %v1162_v25 }
  0x76   : > { %991 = vmatpush3.bf16.msra.mxu0 %v1163_v26 }
  0x77   : > { %1031 = vmatpush3.bf16.msra.mxu1 %v1164_v27  ;;  %992 = vmatprep.subr.bf16.mxu0 %v1165_v28 }
  0x78   : > { %1032 = vmatprep.subr.bf16.mxu1 %v1166_v29 }
  0x7a   : > { %993 = vmatpush3.bf16.msra.mxu0 %v1167_v30 }
  0x7b   : > { %1033 = vmatpush3.bf16.msra.mxu1 %v1168_v31 }
  0x7d   : > { %588 = vmatmul.mubr.bf16.vlgmr.msra.gmra.mrb[0].mxu0 %v1169_v32 }
  0x7e   : > { %653 = vmatmul.mubr.bf16.vlgmr.msra.gmra.mrb[0].mxu1 %v1172_v34  ;;  %595 = vmatprep.mubr.bf16.mxu0 %v1175_v36 }
  0x7f   : > { %660 = vmatprep.mubr.bf16.mxu1 %v1177_v37 }
  0x85   : > { %596 = vmatmul.mubr.bf16.gmra.mrb[4].mxu0 %v1179_v38 }
  0x86   : > { %661 = vmatmul.mubr.bf16.gmra.mrb[4].mxu1 %v1180_v39  ;;  %603 = vmatprep.mubr.bf16.mxu0 %v1181_v40 }
  0x87   : > { %668 = vmatprep.mubr.bf16.mxu1 %v1183_v41 }
  0x8d   : > { %604 = vmatmul.mubr.bf16.gmra.mrb[8].mxu0 %v1185_v42 }
  0x8e   : > { %669 = vmatmul.mubr.bf16.gmra.mrb[8].mxu1 %v1186_v43  ;;  %611 = vmatprep.mubr.bf16.mxu0 %v1187_v44 }
  0x8f   : > { %676 = vmatprep.mubr.bf16.mxu1 %v1189_v45 }
  0x95   : > { %612 = vmatmul.mubr.bf16.gmra.mrb[12].mxu0 %v1191_v46 }
  0x96   : > { %677 = vmatmul.mubr.bf16.gmra.mrb[12].mxu1 %v1192_v47 }
 0x150   : > { %v994_v48 = vpop.f32.mrb[0].mxu0 }
 0x151   : > { %v1034_v49 = vpop.f32.mrb[0].mxu1  ;;  %v995_v50 = vpop.f32.mrb[1].mxu0 }
 0x152   : > { %v996_v51 = vadd.f32 %v995_v50, %v994_v48  ;;  %v1035_v52 = vpop.f32.mrb[1].mxu1  ;;  %v997_v53 = vpop.f32.mrb[2].mxu0 }
 0x153   : > { %v1036_v54 = vadd.f32 %v1035_v52, %v1034_v49  ;;  %v1037_v55 = vpop.f32.mrb[2].mxu1  ;;  %v998_v56 = vpop.f32.mrb[3].mxu0 }
 0x154   : > { %v999_v57 = vadd.f32 %v998_v56, %v997_v53  ;;  %v1038_v58 = vpop.f32.mrb[3].mxu1 }
 0x155   : > { %v655_v59 = vadd.f32 %v1036_v54, %v996_v51  ;;  %v1039_v60 = vadd.f32 %v1038_v58, %v1037_v55 }
 0x157   : > { %v658_v61 = vadd.f32 %v1039_v60, %v999_v57  ;;  %v685_v62 = vmax.f32 %v655_v59, 0.0 }
 0x158   : > { %v1000_v63 = vpop.f32.mrb[4].mxu0 }
 0x159   : > { %v1040_v0 = vpop.f32.mrb[4].mxu1  ;;  %v1001_v1 = vpop.f32.mrb[5].mxu0  ;;  %v1561_v2 = vmin.f32 %v685_v62, 6.0  ;;  %v686_v3 = vmax.f32 %v658_v61, 0.0 }
 0x15a   : > { %v1002_v4 = vadd.f32 %v1001_v1, %v1000_v63  ;;  %v1041_v5 = vpop.f32.mrb[5].mxu1  ;;  %v1003_v6 = vpop.f32.mrb[6].mxu0 }
 0x15b   : > { %v1042_v7 = vadd.f32 %v1041_v5, %v1040_v0  ;;  %v1043_v8 = vpop.f32.mrb[6].mxu1  ;;  %v1004_v9 = vpop.f32.mrb[7].mxu0  ;;  %v702_v10 = vsel %vm701_vm0, %v1561_v2, 0.0  ;;  %v1565_v11 = vmin.f32 %v686_v3, 6.0 }
 0x15c   : > { %v1005_v12 = vadd.f32 %v1004_v9, %v1003_v6  ;;  %v1044_v13 = vpop.f32.mrb[7].mxu1  ;;  %703 = vadd.xlane.f32.xlu0 %v702_v10 }
 0x15d   : > { %v663_v14 = vadd.f32 %v1042_v7, %v1002_v4  ;;  %v1045_v15 = vadd.f32 %v1044_v13, %v1043_v8  ;;  %v705_v17 = vsel %vm701_vm0, %v1565_v11, 0.0 }
 0x15f   : > { %v666_v16 = vadd.f32 %v1045_v15, %v1005_v12  ;;  %v687_v18 = vmax.f32 %v663_v14, 0.0 }
 0x160   : > { %706 = vadd.xlane.f32.xlu0 %v705_v17  ;;  %v1006_v19 = vpop.f32.mrb[8].mxu0 }
 0x161   : > { %v1046_v20 = vpop.f32.mrb[8].mxu1  ;;  %v1007_v21 = vpop.f32.mrb[9].mxu0  ;;  %v1569_v22 = vmin.f32 %v687_v18, 6.0  ;;  %v688_v23 = vmax.f32 %v666_v16, 0.0 }
 0x162   : > { %v1008_v24 = vadd.f32 %v1007_v21, %v1006_v19  ;;  %v1047_v25 = vpop.f32.mrb[9].mxu1  ;;  %v1009_v26 = vpop.f32.mrb[10].mxu0 }
 0x163   : > { %v1048_v27 = vadd.f32 %v1047_v25, %v1046_v20  ;;  %v1049_v28 = vpop.f32.mrb[10].mxu1  ;;  %v1010_v29 = vpop.f32.mrb[11].mxu0  ;;  %v708_v30 = vsel %vm701_vm0, %v1569_v22, 0.0  ;;  %v696_v31 = vmin.f32 %v688_v23, 6.0 }
 0x164   : > { %v1011_v32 = vadd.f32 %v1010_v29, %v1009_v26  ;;  %v1050_v33 = vpop.f32.mrb[11].mxu1  ;;  %709 = vadd.xlane.f32.xlu1 %v708_v30 }
 0x165   : > { %v671_v34 = vadd.f32 %v1048_v27, %v1008_v24  ;;  %v1051_v35 = vadd.f32 %v1050_v33, %v1049_v28  ;;  %v711_v37 = vsel %vm701_vm0, %v696_v31, 0.0 }
 0x167   : > { %v674_v36 = vadd.f32 %v1051_v35, %v1011_v32  ;;  %v689_v38 = vmax.f32 %v671_v34, 0.0 }
 0x168   : > { %712 = vadd.xlane.f32.xlu1 %v711_v37  ;;  %v1012_v39 = vpop.f32.mrb[12].mxu0 }
 0x169   : > { %v1052_v40 = vpop.f32.mrb[12].mxu1  ;;  %v1013_v41 = vpop.f32.mrb[13].mxu0  ;;  %v697_v42 = vmin.f32 %v689_v38, 6.0  ;;  %v690_v43 = vmax.f32 %v674_v36, 0.0 }
 0x16a   : > { %v1014_v44 = vadd.f32 %v1013_v41, %v1012_v39  ;;  %v1053_v45 = vpop.f32.mrb[13].mxu1  ;;  %v1015_v46 = vpop.f32.mrb[14].mxu0 }
 0x16b   : > { %v1054_v47 = vadd.f32 %v1053_v45, %v1052_v40  ;;  %v1055_v48 = vpop.f32.mrb[14].mxu1  ;;  %v1016_v49 = vpop.f32.mrb[15].mxu0  ;;  %v714_v50 = vsel %vm701_vm0, %v697_v42, 0.0  ;;  %v698_v51 = vmin.f32 %v690_v43, 6.0 }
 0x16c   : > { %v1017_v52 = vadd.f32 %v1016_v49, %v1015_v46  ;;  %v1056_v53 = vpop.f32.mrb[15].mxu1  ;;  %715 = vadd.xlane.f32.xlu0 %v714_v50 }
 0x16d   : > { %v679_v54 = vadd.f32 %v1054_v47, %v1014_v44  ;;  %v1057_v55 = vadd.f32 %v1056_v53, %v1055_v48  ;;  %v717_v56 = vsel %vm701_vm0, %v698_v51, 0.0 }
 0x16e   : > { %718 = vadd.xlane.f32.xlu1 %v717_v56 }
 0x16f   : > { %v682_v57 = vadd.f32 %v1057_v55, %v1017_v52  ;;  %v691_v58 = vmax.f32 %v679_v54, 0.0 }
 0x171   : > { %v699_v59 = vmin.f32 %v691_v58, 6.0  ;;  %v692_v60 = vmax.f32 %v682_v57, 0.0 }
 0x173   : > { %v720_v61 = vsel %vm701_vm0, %v699_v59, 0.0  ;;  %v700_v62 = vmin.f32 %v692_v60, 6.0 }
 0x174   : > { %721 = vadd.xlane.f32.xlu0 %v720_v61 }
 0x175   : > { %v723_v63 = vsel %vm701_vm0, %v700_v62, 0.0 }
 0x176   : > { %724 = vadd.xlane.f32.xlu1 %v723_v63 }
 0x1e9   : > { %v704_v0 = vpop.xlane.xlu0 %703 }
 0x1ea   : > { %v726_v1 = vmul.f32 0.0625, %v704_v0 }
 0x1ec   : > { %v734_v3 = vsub.f32 %v1561_v2, %v726_v1 }
 0x1ed   : > { %v707_v4 = vpop.xlane.xlu0 %706 }
 0x1ee   : > { %v969_v5 = vpack.c.bf16 %v734_v3, %v734_v3  ;;  %v727_v6 = vmul.f32 0.0625, %v707_v4 }
 0x1f0   : > { %775 = vst.msk [vmem:[%s1580_s19] sm:$0xf] %vm774_vm1, %v969_v5  ;;  %v735_v7 = vsub.f32 %v1565_v11, %v727_v6 }
 0x1f1   : > { %v710_v8 = vpop.xlane.xlu1 %709 }
 0x1f2   : > { %v970_v9 = vpack.c.bf16 %v735_v7, %v735_v7  ;;  %v728_v10 = vmul.f32 0.0625, %v710_v8 }
 0x1f4   : > { %776 = vst.msk [vmem:[%s1580_s19 + $0x4] sm:$0xf] %vm774_vm1, %v970_v9  ;;  %v736_v2 = vsub.f32 %v1569_v22, %v728_v10 }
 0x1f5   : > { %v713_v12 = vpop.xlane.xlu1 %712 }
 0x1f6   : > { %v971_v13 = vpack.c.bf16 %v736_v2, %v736_v2  ;;  %v729_v14 = vmul.f32 0.0625, %v713_v12 }
 0x1f8   : > { %777 = vst.msk [vmem:[%s1580_s19 + $0x8] sm:$0xf] %vm774_vm1, %v971_v13  ;;  %v737_v15 = vsub.f32 %v696_v31, %v729_v14 }
 0x1f9   : > { %v716_v16 = vpop.xlane.xlu0 %715 }
 0x1fa   : > { %v972_v17 = vpack.c.bf16 %v737_v15, %v737_v15  ;;  %v730_v18 = vmul.f32 0.0625, %v716_v16 }
 0x1fb   : > { %v719_v11 = vpop.xlane.xlu1 %718 }
 0x1fc   : > { %778 = vst.msk [vmem:[%s1580_s19 + $0xc] sm:$0xf] %vm774_vm1, %v972_v17  ;;  %v738_v19 = vsub.f32 %v697_v42, %v730_v18  ;;  %v731_v20 = vmul.f32 0.0625, %v719_v11 }
 0x1fe   : > { %v973_v21 = vpack.c.bf16 %v738_v19, %v738_v19  ;;  %v739_v22 = vsub.f32 %v698_v51, %v731_v20 }
 0x200   : > { %779 = vst.msk [vmem:[%s1580_s19 + $0x10] sm:$0xf] %vm774_vm1, %v973_v21  ;;  %v974_v23 = vpack.c.bf16 %v739_v22, %v739_v22 }
 0x201   : > { %v722_v24 = vpop.xlane.xlu0 %721 }
 0x202   : > { %780 = vst.msk [vmem:[%s1580_s19 + $0x14] sm:$0xf] %vm774_vm1, %v974_v23  ;;  %v732_v25 = vmul.f32 0.0625, %v722_v24 }
 0x203   : > { %v725_v26 = vpop.xlane.xlu1 %724 }
 0x204   : > { %v740_v27 = vsub.f32 %v699_v59, %v732_v25  ;;  %v733_v28 = vmul.f32 0.0625, %v725_v26 }
 0x206   : > { %v975_v29 = vpack.c.bf16 %v740_v27, %v740_v27  ;;  %v741_v30 = vsub.f32 %v700_v62, %v733_v28 }
 0x208   : > { %781 = vst.msk [vmem:[%s1580_s19 + $0x18] sm:$0xf] %vm774_vm1, %v975_v29  ;;  %v976_v31 = vpack.c.bf16 %v741_v30, %v741_v30 }
 0x20a   : > { %782 = vst.msk [vmem:[%s1580_s19 + $0x1c] sm:$0xf] %vm774_vm1, %v976_v31 }
 0x20b   : > { %1264 = shalt.err (!%p1261_p5)
}
 0x20c   : > { %s1265_s3 = scalar_lea.hbm %s1601_s7, 512  ;;  %s1269_s16 = scalar_lea.hbm %s1658_s2, 1024 }
 0x20d   : > { %p1266_p9 = scmp.ne.s32.totalorder %s1601_s7, %s1265_s3  ;;  %p1270_p3 = scmp.lt.u32.totalorder %s1601_s7, %s1658_s2 }
 0x20e   : > { %p1271_p7 = scmp.lt.u32.totalorder %s1269_s16, %s1265_s3  ;;  %p1273_p4 = scmp.lt.u32.totalorder %s1265_s3, %s1601_s7 }
 0x20f   : > { %p1267_p1 = pnand %p1266_p9, %p1459_p10 }
 0x210   : > { %p1272_p13 = por %p1271_p7, %p1270_p3 }
 0x211   : > { %p1268_p2 = pneg %p1267_p1 }
 0x212   : > { %p1274_p6 = por %p1273_p4, %p1272_p13 }
 0x214   : > { %p1275_p8 = pnand %p1274_p6, %p1268_p2 }
 0x216   : > { %1278 = shalt.err (!%p1275_p8)
}
 0x217   : > { %s1346_s17 = smov 64   ;;  %s1347_s19 = smov 4  }
 0x218   : > { %1064 = dma.vmem_to_hbm [thread:$0]  (%p1459_p10), %s1603_s4, 512, %s1601_s7, %s784_s27, %s1346_s17, %s1346_s17, %s1347_s19  }
 0x219 PF: > { %s814_s21 = sand.u32 1, %s1317_s9   ;;  %p1676_p12 = scmp.ne.s32.totalorder %s1666_s20, 0 }
 0x21a   : > { %p1677_p11 = scmp.ge.s32.totalorder %s1337_s14, 2  ;;  %s815_s5 = scalar_lea.sflag [#allocation4], %s814_s21 }
 0x21c   : > { %p1075_p0 = pnand %p1677_p11, %p1676_p12 }
 0x21e   : > { %1312 = dma.done.wait (!%p1075_p0), %s815_s5, 512  }
 0x21f   : > { %1314 = vsyncadd (!%p1075_p0), %s815_s5, 4294966784  ;;  %s19_s14 = sadd.s32 1, %s1337_s14   ;;  %s1678_s9 = smov %s1321_s10 }
 0x220   : > { %p16_p5 = scmp.ge.s32.totalorder %s19_s14, 4   ;;  %s1679_s10 = smov %s1325_s11 }
 0x221   : > { %s1680_s11 = smov %s1468_s28  ;;  %s1681_s12 = smov %s1333_s13 }
 0x222   : > { %s1682_s13 = smov %s1684_s25  ;;  %18 = sbr.rel (!%p16_p5) target bundleno = 7 (0x7), region = 78 }
 0x229   :  { %820 = vsyncpa [#allocation3], 1 }
 0x22a   :  { %822 = vsyncpa [#allocation3 + $0x1], 1 }
 0x22b   :  { %823 = vsyncpa [#allocation6], 1 }
 0x22c   :  { %824 = vsyncpa [#allocation4], 1 }
 0x22d   :  { %826 = vsyncpa [#allocation4 + $0x1], 1 }

// kernel: gnet_forward.11
= control target key start
LH: loop header
LB: loop body
LE: loop exit
PB: predicated region body
PF: predicated region fallthrough
CT: control target
= control target key end

     0   :  { %10 = vsyncpa [#allocation3], 0  ;;  %s1260_s0 = inlined_call_operand.hbm [shape: bf16[32,576], index: 0, kind: input, shape index: {}]   ;;  %s1261_s1 = inlined_call_operand.hbm [shape: bf16[576,128], index: 1, kind: input, shape index: {}]   ;;  %s1262_s2 = inlined_call_operand.hbm [shape: f32[8,32], index: 2, kind: input, shape index: {}]   ;;  %s1263_s3 = inlined_call_operand.hbm [shape: f32[8,128], index: 3, kind: input, shape index: {}]   ;;  %s1264_s4 = inlined_call_operand.hbm [shape: f32[2,8], index: 4, kind: input, shape index: {}]   ;;  %s1265_s5 = inlined_call_operand.hbm [shape: f32[2,1], index: 5, kind: output, shape index: {}]  }
   0x1   :  { %11 = vsyncpa [#allocation6], 0 }
   0x2   :  { %12 = vsyncpa [#allocation9], 0 }
   0x3   :  { %13 = vsyncpa [#allocation4], 0  ;;  %s1143_s18 = smov [#allocation5]   ;;  %s1003_s22 = scalar_lea.hbm %s1261_s1, 4608 }
   0x4   :  { %s31_s19 = sshll.u32 %s1143_s18, 4  ;;  %p1004_p0 = scmp.ne.s32.totalorder %s1261_s1, %s1003_s22  ;;  %s32_s19 = int_to_ptr.vmem [resolvable:$true] %s31_s19 }
   0x5   :  { %p1007_p1 = scmp.lt.u32.totalorder %s1003_s22, %s1261_s1 }
   0x7   :  { %p1009_p2 = pnand %p1007_p1, %p1004_p0 }
   0x9   :  { %1012 = shalt.err (!%p1009_p2)
}
   0xa   :  { %s1013_s27 = scalar_lea.vmem %s32_s19, 4608  ;;  %p1018_p4 = scmp.lt.s32.totalorder %s32_s19, %s32_s19 }
   0xb   :  { %p1014_p3 = scmp.ne.s32.totalorder %s32_s19, %s1013_s27  ;;  %p1019_p5 = scmp.lt.s32.totalorder %s1013_s27, %s1013_s27 }
   0xd   :  { %p1020_p6 = por %p1019_p5, %p1018_p4 }
   0xf   :  { %p1021_p7 = pnand %p1020_p6, %p1014_p3 }
  0x11   :  { %1024 = shalt.err (!%p1021_p7)
}
  0x12   :  { %s1144_s28 = smov 64   ;;  %s1145_s29 = smov 4  }
  0x13   :  { %37 = dma.hbm_to_vmem [thread:$0]  %s1261_s1, 4608, %s32_s19, [#allocation6], %s1144_s28, %s1144_s28, %s1145_s29  }
  0x14   :  { %s1146_s7 = smov [#allocation8]   ;;  %s1147_s9 = smov [#allocation2]  }
  0x15   :  { %s54_s8 = sshll.u32 %s1146_s7, 4  ;;  %s19_s10 = sshll.u32 %s1147_s9, 4  ;;  %s55_s8 = int_to_ptr.vmem [resolvable:$true] %s54_s8  ;;  %s20_s10 = int_to_ptr.vmem [resolvable:$true] %s19_s10 }
  0x16   :  { %s1025_s13 = scalar_lea.hbm %s1263_s3, 128 }
  0x17   :  { %p1026_p8 = scmp.ne.s32.totalorder %s1263_s3, %s1025_s13  ;;  %p1029_p9 = scmp.lt.u32.totalorder %s1025_s13, %s1263_s3 }
  0x19   :  { %p1031_p10 = pnand %p1029_p9, %p1026_p8 }
  0x1b   :  { %1034 = shalt.err (!%p1031_p10)
}
  0x1c   :  { %s1035_s1 = scalar_lea.vmem %s55_s8, 128  ;;  %p1040_p12 = scmp.lt.s32.totalorder %s55_s8, %s55_s8 }
  0x1d   :  { %p1036_p11 = scmp.ne.s32.totalorder %s55_s8, %s1035_s1  ;;  %p1041_p13 = scmp.lt.s32.totalorder %s1035_s1, %s1035_s1 }
  0x1f   :  { %p1042_p0 = por %p1041_p13, %p1040_p12 }
  0x21   :  { %p1043_p1 = pnand %p1042_p0, %p1036_p11 }
  0x23   :  { %1046 = shalt.err (!%p1043_p1)
}
  0x24   :  { %57 = dma.hbm_to_vmem [thread:$0]  %s1263_s3, 128, %s55_s8, [#allocation9]  }
  0x25   :  { %s1047_s22 = scalar_lea.hbm %s1260_s0, 1280 }
  0x26   :  { %p1048_p2 = scmp.ne.s32.totalorder %s1260_s0, %s1047_s22  ;;  %p1051_p3 = scmp.lt.u32.totalorder %s1047_s22, %s1260_s0 }
  0x28   :  { %p1053_p4 = pnand %p1051_p3, %p1048_p2 }
  0x2a   :  { %1056 = shalt.err (!%p1053_p4)
}
  0x2b   :  { %s1057_s27 = scalar_lea.vmem %s20_s10, 1280  ;;  %p1062_p6 = scmp.lt.s32.totalorder %s20_s10, %s20_s10 }
  0x2c   :  { %p1058_p5 = scmp.ne.s32.totalorder %s20_s10, %s1057_s27  ;;  %p1063_p7 = scmp.lt.s32.totalorder %s1057_s27, %s1057_s27 }
  0x2e   :  { %p1064_p8 = por %p1063_p7, %p1062_p6 }
  0x30   :  { %p1065_p9 = pnand %p1064_p8, %p1058_p5 }
  0x32   :  { %1068 = shalt.err (!%p1065_p9)
}
  0x33   :  { %s1148_s3 = smov 320   ;;  %s1149_s28 = smov 20  }
  0x34   :  { %25 = dma.hbm_to_vmem [thread:$0]  %s1260_s0, 1280, %s20_s10, [#allocation3], %s1148_s3, %s1148_s3, %s1149_s28  }
  0x35   :  { %s1150_s6 = smov [#allocation7]   ;;  %s1151_s8 = smov [#allocation10]  }
  0x36   :  { %s44_s7 = sshll.u32 %s1150_s6, 4  ;;  %s64_s9 = sshll.u32 %s1151_s8, 4  ;;  %s45_s7 = int_to_ptr.vmem [resolvable:$true] %s44_s7  ;;  %s65_s9 = int_to_ptr.vmem [resolvable:$true] %s64_s9 }
  0x37   :  { %s1069_s13 = scalar_lea.hbm %s1262_s2, 128 }
  0x38   :  { %p1070_p10 = scmp.ne.s32.totalorder %s1262_s2, %s1069_s13  ;;  %p1073_p11 = scmp.lt.u32.totalorder %s1069_s13, %s1262_s2 }
  0x3a   :  { %p1075_p12 = pnand %p1073_p11, %p1070_p10 }
  0x3c   :  { %1078 = shalt.err (!%p1075_p12)
}
  0x3d   :  { %s1079_s0 = scalar_lea.vmem %s45_s7, 128  ;;  %p1084_p0 = scmp.lt.s32.totalorder %s45_s7, %s45_s7 }
  0x3e   :  { %p1080_p13 = scmp.ne.s32.totalorder %s45_s7, %s1079_s0  ;;  %p1085_p1 = scmp.lt.s32.totalorder %s1079_s0, %s1079_s0 }
  0x40   :  { %p1086_p2 = por %p1085_p1, %p1084_p0 }
  0x42   :  { %p1087_p3 = pnand %p1086_p2, %p1080_p13 }
  0x44   :  { %1090 = shalt.err (!%p1087_p3)
}
  0x45   :  { %47 = dma.hbm_to_vmem [thread:$0]  %s1262_s2, 128, %s45_s7, [#allocation6]  }
  0x46   :  { %s1091_s20 = scalar_lea.hbm %s1264_s4, 32 }
  0x47   :  { %p1092_p4 = scmp.ne.s32.totalorder %s1264_s4, %s1091_s20  ;;  %p1095_p5 = scmp.lt.u32.totalorder %s1091_s20, %s1264_s4 }
  0x49   :  { %p1097_p6 = pnand %p1095_p5, %p1092_p4 }
  0x4b   :  { %1100 = shalt.err (!%p1097_p6)
}
  0x4c   :  { %s1101_s25 = scalar_lea.vmem %s65_s9, 32  ;;  %p1106_p8 = scmp.lt.s32.totalorder %s65_s9, %s65_s9 }
  0x4d   :  { %p1102_p7 = scmp.ne.s32.totalorder %s65_s9, %s1101_s25  ;;  %p1107_p9 = scmp.lt.s32.totalorder %s1101_s25, %s1101_s25 }
  0x4f   :  { %p1108_p10 = por %p1107_p9, %p1106_p8 }
  0x51   :  { %p1109_p11 = pnand %p1108_p10, %p1102_p7 }
  0x53   :  { %1112 = shalt.err (!%p1109_p11)
}
  0x54   :  { %67 = dma.hbm_to_vmem [thread:$0]  %s1264_s4, 32, %s65_s9, [#allocation9]  }
  0x55   :  { %1135 = dma.done.wait [#allocation3], 1280  }
  0x56   :  { %1136 = vsyncadd [#allocation3], 4294966016 }
  0x57   :  { %1137 = dma.done.wait [#allocation6], 4736  }
  0x58   :  { %1138 = vsyncadd [#allocation6], 4294962560 }
  0x59   :  { %1139 = dma.done.wait [#allocation9], 160  }
  0x5a   :  { %1140 = vsyncadd [#allocation9], 4294967136  ;;  %v945_v0 = vld [vmem:[#allocation5 + $0x40] sm:$0xff]   ;;  %v949_v4 = vld [vmem:[#allocation5 + $0x48] sm:$0xff]   ;;  %vm434_vm0 = vcmask 523264   ;;  %v1152_v46 = vmov 0.0|0.0  }
  0x5b   :  { %v946_v1 = vld [vmem:[#allocation5 + $0xc0] sm:$0xff]   ;;  %829 = vmatprep.subr.bf16.mxu0 %v945_v0  ;;  %v950_v5 = vld [vmem:[#allocation5 + $0xc8] sm:$0xff]   ;;  %v953_v8 = vld [vmem:[#allocation5 + $0x50] sm:$0xff]   ;;  %vm1153_vm1 = vmmov 0   ;;  %v1154_v47 = vmov 0.0   ;;  %vm589_vm2 = vcmask 261120  }
  0x5c   :  { %v947_v2 = vld [vmem:[#allocation5] sm:$0xff]   ;;  %857 = vmatprep.subr.bf16.mxu1 %v946_v1  ;;  %v951_v6 = vld [vmem:[#allocation5 + $0x8] sm:$0xff]   ;;  %v954_v9 = vld [vmem:[#allocation5 + $0xd0] sm:$0xff]   ;;  %vm672_vm3 = vcmask 64512   ;;  %vm746_vm4 = vcmask 1041408   ;;  %s1155_s4 = smov [#allocation11]  }
  0x5d   :  { %v948_v3 = vld [vmem:[#allocation5 + $0x80] sm:$0xff]   ;;  %830 = vmatpush3.bf16.msra.mxu0 %v947_v2  ;;  %v952_v7 = vld [vmem:[#allocation5 + $0x88] sm:$0xff]   ;;  %v955_v10 = vld [vmem:[#allocation5 + $0x10] sm:$0xff]   ;;  %s766_s27 = sshll.u32 %s1155_s4, 4  ;;  %vm758_vm5 = vcmask 1024   ;;  %s767_s27 = int_to_ptr.vmem [resolvable:$true] %s766_s27 }
  0x5e   :  { %858 = vmatpush3.bf16.msra.mxu1 %v948_v3  ;;  %831 = vmatprep.subr.bf16.mxu0 %v949_v4  ;;  %v956_v11 = vld [vmem:[#allocation5 + $0x90] sm:$0xff]   ;;  %v957_v12 = vld [vmem:[#allocation5 + $0x58] sm:$0xff]   ;;  %v961_v16 = vld [vmem:[#allocation5 + $0x60] sm:$0xff]   ;;  %s1113_s3 = scalar_lea.vmem %s767_s27, 32  ;;  %p1118_p13 = scmp.lt.s32.totalorder %s767_s27, %s767_s27 }
  0x5f   :  { %859 = vmatprep.subr.bf16.mxu1 %v950_v5  ;;  %v958_v13 = vld [vmem:[#allocation5 + $0xd8] sm:$0xff]   ;;  %v962_v17 = vld [vmem:[#allocation5 + $0xe0] sm:$0xff]   ;;  %v965_v20 = vld [vmem:[#allocation5 + $0x68] sm:$0xff]   ;;  %p1114_p12 = scmp.ne.s32.totalorder %s767_s27, %s1113_s3  ;;  %p1119_p0 = scmp.lt.s32.totalorder %s1113_s3, %s1113_s3 }
  0x60   :  { %v959_v14 = vld [vmem:[#allocation5 + $0x18] sm:$0xff]   ;;  %v963_v18 = vld [vmem:[#allocation5 + $0x20] sm:$0xff]   ;;  %v966_v21 = vld [vmem:[#allocation5 + $0xe8] sm:$0xff]  }
  0x61   :  { %832 = vmatpush3.bf16.msra.mxu0 %v951_v6  ;;  %v960_v15 = vld [vmem:[#allocation5 + $0x98] sm:$0xff]   ;;  %v964_v19 = vld [vmem:[#allocation5 + $0xa0] sm:$0xff]   ;;  %v967_v22 = vld [vmem:[#allocation5 + $0x28] sm:$0xff]   ;;  %p1120_p1 = por %p1119_p0, %p1118_p13 }
  0x62   :  { %860 = vmatpush3.bf16.msra.mxu1 %v952_v7  ;;  %833 = vmatprep.subr.bf16.mxu0 %v953_v8  ;;  %v968_v23 = vld [vmem:[#allocation5 + $0xa8] sm:$0xff]   ;;  %v969_v24 = vld [vmem:[#allocation5 + $0x70] sm:$0xff]   ;;  %v973_v28 = vld [vmem:[#allocation5 + $0x78] sm:$0xff]  }
  0x63   :  { %861 = vmatprep.subr.bf16.mxu1 %v954_v9  ;;  %v970_v25 = vld [vmem:[#allocation5 + $0xf0] sm:$0xff]   ;;  %v974_v29 = vld [vmem:[#allocation5 + $0xf8] sm:$0xff]   ;;  %v983_v36 = vld [vmem:[#allocation5 + $0x100] sm:$0xff]   ;;  %p1121_p2 = pnand %p1120_p1, %p1114_p12 }
  0x64   :  { %v971_v26 = vld [vmem:[#allocation5 + $0x30] sm:$0xff]   ;;  %v975_v30 = vld [vmem:[#allocation5 + $0x38] sm:$0xff]   ;;  %v984_v37 = vld [vmem:[#allocation5 + $0x108] sm:$0xff]  }
  0x65   :  { %834 = vmatpush3.bf16.msra.mxu0 %v955_v10  ;;  %v972_v27 = vld [vmem:[#allocation5 + $0xb0] sm:$0xff]   ;;  %v976_v31 = vld [vmem:[#allocation5 + $0xb8] sm:$0xff]  }
  0x66   :  { %862 = vmatpush3.bf16.msra.mxu1 %v956_v11  ;;  %835 = vmatprep.subr.bf16.mxu0 %v957_v12  ;;  %v977_v32 = vld [vmem:[#allocation2] ss:$20 sps:$4 sm:$0xff]   ;;  %v979_v33 = vld [vmem:[#allocation2 + $0x4] ss:$20 sps:$4 sm:$0xff]   ;;  %v980_v34 = vld [vmem:[#allocation2 + $0x8] ss:$20 sps:$4 sm:$0xff]  }
  0x67   :  { %863 = vmatprep.subr.bf16.mxu1 %v958_v13  ;;  %v982_v35 = vld [vmem:[#allocation2 + $0xc] ss:$20 sps:$4 sm:$0xff]   ;;  %473 = vmatprep.mubr.bf16.mxu0 %v979_v33  ;;  %v987_v39 = vld [vmem:[#allocation2 + $0x34] ss:$20 sps:$4 sm:$0xff]   ;;  %v990_v42 = vld [vmem:[#allocation2 + $0x30] ss:$20 sps:$4 sm:$0xff]  }
  0x68   :  { %522 = vmatprep.mubr.bf16.mxu1 %v982_v35  ;;  %v985_v38 = vld [vmem:[#allocation2 + $0x2c] ss:$20 sps:$4 sm:$0xff]   ;;  %v989_v40 = vld [vmem:[#allocation2 + $0x28] ss:$20 sps:$4 sm:$0xff]   ;;  %v993_v43 = vld [vmem:[#allocation2 + $0x10] ss:$20 sps:$4 sm:$0xff]  }
  0x69   :  { %836 = vmatpush3.bf16.msra.mxu0 %v959_v14  ;;  %v991_v41 = vld [vmem:[#allocation5 + $0x110] sm:$0xff]   ;;  %v992_v44 = vld [vmem:[#allocation5 + $0x118] sm:$0xff]  }
  0x6a   :  { %864 = vmatpush3.bf16.msra.mxu1 %v960_v15  ;;  %837 = vmatprep.subr.bf16.mxu0 %v961_v16  ;;  %v994_v45 = vld [vmem:[#allocation2 + $0x38] ss:$20 sps:$4 sm:$0xff]  }
  0x6b   :  { %865 = vmatprep.subr.bf16.mxu1 %v962_v17 }
  0x6d   :  { %838 = vmatpush3.bf16.msra.mxu0 %v963_v18 }
  0x6e   :  { %866 = vmatpush3.bf16.msra.mxu1 %v964_v19  ;;  %839 = vmatprep.subr.bf16.mxu0 %v965_v20 }
  0x6f   :  { %867 = vmatprep.subr.bf16.mxu1 %v966_v21 }
  0x71   :  { %840 = vmatpush3.bf16.msra.mxu0 %v967_v22  ;;  %v588_v22 = vld [vmem:[#allocation7] sm:$0xff] }
  0x72   :  { %868 = vmatpush3.bf16.msra.mxu1 %v968_v23  ;;  %841 = vmatprep.subr.bf16.mxu0 %v969_v24 }
  0x73   :  { %869 = vmatprep.subr.bf16.mxu1 %v970_v25 }
  0x75   :  { %842 = vmatpush3.bf16.msra.mxu0 %v971_v26 }
  0x76   :  { %870 = vmatpush3.bf16.msra.mxu1 %v972_v27  ;;  %843 = vmatprep.subr.bf16.mxu0 %v973_v28  ;;  %v669_v28 = vld [vmem:[#allocation8] sm:$0xff] }
  0x77   :  { %871 = vmatprep.subr.bf16.mxu1 %v974_v29 }
  0x79   :  { %844 = vmatpush3.bf16.msra.mxu0 %v975_v30 }
  0x7a   :  { %872 = vmatpush3.bf16.msra.mxu1 %v976_v31  ;;  %898 = vmatprep.subr.bf16.mxu0 %v983_v36  ;;  %v671_v31 = vld [vmem:[#allocation10] sm:$0x3] }
  0x7b   :  { %926 = vmatprep.subr.bf16.mxu1 %v1152_v46 }
  0x7c   :  { %474 = vmatmul.mubr.bf16.vlgmr.msra.gmra.mrb[0].mxu0 %v977_v32 }
  0x7d   :  { %523 = vmatmul.mubr.bf16.vlgmr.msra.gmra.mrb[0].mxu1 %v980_v34  ;;  %899 = vmatpush3.bf16.msra.mxu0 %v983_v36 }
  0x7e   :  { %900 = vmatprep.subr.bf16.mxu0 %v984_v37  ;;  %481 = vmatprep.mubr.bf16.mxu0 %v985_v38 }
  0x7f   :  { %530 = vmatprep.mubr.bf16.mxu1 %v987_v39 }
  0x81   :  { %901 = vmatpush3.bf16.msra.mxu0 %v984_v37 }
  0x82   :  { %902 = vmatprep.subr.bf16.mxu0 %v991_v41 }
  0x84   :  { %482 = vmatmul.mubr.bf16.gmra.mrb[4].mxu0 %v989_v40 }
  0x85   :  { %531 = vmatmul.mubr.bf16.gmra.mrb[4].mxu1 %v990_v42  ;;  %906 = vmatprep.mubr.msk.bf16.mxu0 %vm434_vm0, %v993_v43 }
  0x86   :  { %903 = vmatpush3.bf16.msra.mxu0 %v991_v41  ;;  %918 = vmatprep.mubr.msk.f32.mxu1 %vm1153_vm1, %v1154_v47 }
  0x87   :  { %904 = vmatprep.subr.bf16.mxu0 %v992_v44 }
  0x8a   :  { %905 = vmatpush3.bf16.msra.mxu0 %v992_v44 }
  0x8d   :  { %907 = vmatmul.mubr.msk.bf16.vlgmr.msra.gmra.mrb[8].mxu0 %vm434_vm0, %v994_v45 }
 0x14f   :  { %v845_v48 = vpop.f32.mrb[0].mxu0 }
 0x150   :  { %v873_v49 = vpop.f32.mrb[0].mxu1  ;;  %v846_v50 = vpop.f32.mrb[1].mxu0 }
 0x151   :  { %v847_v51 = vadd.f32 %v846_v50, %v845_v48  ;;  %v874_v52 = vpop.f32.mrb[1].mxu1  ;;  %v848_v53 = vpop.f32.mrb[2].mxu0 }
 0x152   :  { %v875_v54 = vadd.f32 %v874_v52, %v873_v49  ;;  %v876_v55 = vpop.f32.mrb[2].mxu1  ;;  %v849_v56 = vpop.f32.mrb[3].mxu0 }
 0x153   :  { %v850_v57 = vadd.f32 %v849_v56, %v848_v53  ;;  %v877_v58 = vpop.f32.mrb[3].mxu1 }
 0x154   :  { %v878_v59 = vadd.f32 %v877_v58, %v876_v55  ;;  %v525_v60 = vadd.f32 %v875_v54, %v847_v51 }
 0x156   :  { %v528_v61 = vadd.f32 %v878_v59, %v850_v57 }
 0x157   :  { %v851_v62 = vpop.f32.mrb[4].mxu0 }
 0x158   :  { %v879_v63 = vpop.f32.mrb[4].mxu1  ;;  %v852_v0 = vpop.f32.mrb[5].mxu0 }
 0x159   :  { %v853_v1 = vadd.f32 %v852_v0, %v851_v62  ;;  %v880_v2 = vpop.f32.mrb[5].mxu1  ;;  %v854_v3 = vpop.f32.mrb[6].mxu0 }
 0x15a   :  { %v881_v4 = vadd.f32 %v880_v2, %v879_v63  ;;  %v882_v5 = vpop.f32.mrb[6].mxu1  ;;  %v855_v6 = vpop.f32.mrb[7].mxu0 }
 0x15b   :  { %v856_v7 = vadd.f32 %v855_v6, %v854_v3  ;;  %v883_v8 = vpop.f32.mrb[7].mxu1 }
 0x15c   :  { %v884_v9 = vadd.f32 %v883_v8, %v882_v5  ;;  %v533_v10 = vadd.f32 %v881_v4, %v853_v1 }
 0x15e   :  { %v536_v11 = vadd.f32 %v884_v9, %v856_v7 }
 0x160   :  { %v908_v12 = vpop.f32.mrb[8].mxu0 }
 0x161   :  { %v582_v13 = vadd.f32 %v908_v12, %v533_v10  ;;  %v573_v14 = vpop.f32.mrb[9].mxu0 }
 0x162   :  { %v574_v15 = vadd.f32 %v573_v14, %v525_v60  ;;  %v909_v16 = vpop.f32.mrb[10].mxu0 }
 0x163   :  { %v585_v17 = vadd.f32 %v909_v16, %v536_v11  ;;  %v576_v18 = vpop.f32.mrb[11].mxu0 }
 0x164   :  { %v577_v19 = vadd.f32 %v576_v18, %v528_v61 }
 0x165   :  { %v930_v20 = vpack.c.bf16 %v585_v17, %v582_v13 }
 0x166   :  { %v927_v21 = vpack.c.bf16 %v577_v19, %v574_v15 }
 0x168   :  { %928 = vmatpush3.bf16.msra.mxu1 %v927_v21 }
 0x169   :  { %929 = vmatprep.subr.bf16.mxu1 %v1152_v46 }
 0x16c   :  { %931 = vmatpush3.bf16.msra.mxu1 %v930_v20 }
 0x16d   :  { %921 = vmatprep.subr.mxu1 %v1154_v47 }
 0x16f   :  { %919 = vmatmul.mubr.msk.f32.vlgmr.msra.gmra.mrb[8].mxu1 %vm589_vm2, %v588_v22 }
 0x170   :  { %923 = vmatprep.mubr.msk.f32.mxu1 %vm1153_vm1, %v1154_v47 }
 0x242   :  { %v659_v23 = vpop.f32.mrb[8].mxu1 }
 0x243   :  { %v826_v24 = vmul.f32 -1.442695, %v659_v23  ;;  %v920_v25 = vpop.f32.mrb[9].mxu1 }
 0x245   :  { %995 = vpow2.f32 %v826_v24 }
 0x24f   :  { %v996_v26 = vpop.eup %995 }
 0x250   :  { %v666_v27 = vadd.f32 1.0, %v996_v26 }
 0x252   :  { %997 = vrcp.f32 %v666_v27 }
 0x25c   :  { %v998_v29 = vpop.eup %997 }
 0x25d   :  { %v670_v30 = vmul.f32 %v998_v29, %v669_v28 }
 0x25f   :  { %922 = vmatpush3.msra.mxu1 %v670_v30 }
 0x260   :  { %924 = vmatmul.mubr.msk.f32.vlgmr.msra.gmra.mrb[10].mxu1 %vm672_vm3, %v671_v31 }
 0x333   :  { %v742_v32 = vpop.f32.mrb[10].mxu1 }
 0x334   :  { %v925_v33 = vpop.f32.mrb[11].mxu1  ;;  %v747_v34 = vsel %vm746_vm4, %v742_v32, 0.0 }
 0x335   :  { %748 = vadd.xlane.f32.xlu0 %v747_v34 }
 0x3c2   :  { %v749_v35 = vpop.xlane.xlu0 %748 }
 0x3c3   :  { %v828_v36 = vmul.f32 -1.442695, %v749_v35 }
 0x3c5   :  { %999 = vpow2.f32 %v828_v36 }
 0x3cf   :  { %v1000_v37 = vpop.eup %999 }
 0x3d0   :  { %v753_v38 = vadd.f32 1.0, %v1000_v37 }
 0x3d2   :  { %1001 = vrcp.f32 %v753_v38 }
 0x3dc   :  { %v1002_v39 = vpop.eup %1001 }
 0x3dd   :  { %v756_v40 = vmul.f32 0.3, %v1002_v39 }
 0x3df   :  { %v757_v41 = vadd.f32 0.7, %v756_v40 }
 0x3e1   :  { %759 = vst.msk [vmem:[#allocation11] sm:$0x3] %vm758_vm5, %v757_v41 }
 0x3e2   :  { %1124 = shalt.err (!%p1121_p2)
}
 0x3e3   :  { %s1125_s30 = scalar_lea.hbm %s1265_s5, 32 }
 0x3e4   :  { %p1126_p3 = scmp.ne.s32.totalorder %s1265_s5, %s1125_s30  ;;  %p1129_p4 = scmp.lt.u32.totalorder %s1125_s30, %s1265_s5 }
 0x3e6   :  { %p1131_p5 = pnand %p1129_p4, %p1126_p3 }
 0x3e8   :  { %1134 = shalt.err (!%p1131_p5)
}
 0x3e9   :  { %769 = dma.vmem_to_hbm [thread:$0]  %s767_s27, 32, %s1265_s5, [#allocation4]  }
 0x3ea   :  { %1141 = dma.done.wait [#allocation4], 32  }
 0x3eb   :  { %1142 = vsyncadd [#allocation4], 4294967264 }
 0x3ec   :  { %773 = vsyncpa [#allocation3], 1 }
 0x3ed   :  { %774 = vsyncpa [#allocation6], 1 }
 0x3ee   :  { %775 = vsyncpa [#allocation9], 1 }
 0x3ef   :  { %776 = vsyncpa [#allocation4], 1 }

</bundles_post_ra>
